<compile_context>
chip_gen: v7x
topology: tpu7x:2x2x1
jax: 0.10.0
libtpu: 0.0.40
codegen_flags: <defaults>
</compile_context>

<pallas_src>
import jax
import jax.numpy as jnp
from jax import lax
from jax.experimental import pallas as pl
from jax.experimental.pallas import tpu as pltpu


# --------------------------------------------------------------------------
# Fused kernel: BN1+ReLU -> 1x1 conv -> BN2+ReLU -> 3x3 conv -> channel concat
# --------------------------------------------------------------------------
def _bottleneck_block_kernel(x_ref, s1_ref, b1_ref, w1_ref, b2_ref, w2_ref,
                             o_ref, ypad_ref):
    H, W = o_ref.shape[1], o_ref.shape[2]
    Cin = x_ref.shape[-1]
    Cout9 = w2_ref.shape[-1]                 # 9 * Cout (taps stacked along N)
    Cout = Cout9 // 9

    # ---- BN1 + ReLU (f32 VPU) ------------------------------------------------
    x = x_ref[0].reshape(H * W, Cin)
    h = jnp.maximum(x * s1_ref[...] + b1_ref[...], 0.0)

    # ---- 1x1 conv (bf16 MXU operands, f32 acc); BN2 scale pre-folded into w1 -
    y = jnp.dot(h.astype(jnp.bfloat16), w1_ref[...],
                preferred_element_type=jnp.float32)
    h2 = jnp.maximum(y + b2_ref[...], 0.0)   # BN2 shift + ReLU
    # TODO(synk): F.dropout for dropRate > 0 not implemented (dropRate = 0).

    # ---- 3x3 conv: ONE matmul, all 9 taps stacked along the MXU N dim --------
    y9 = jnp.dot(h2.astype(jnp.bfloat16), w2_ref[...],
                 preferred_element_type=jnp.float32)     # (H*W, 9*Cout) f32

    # Zero halo-padded scratch = "SAME" padding for free, then shift-add slabs.
    ypad_ref[...] = jnp.zeros_like(ypad_ref)
    ypad_ref[1:H + 1, 1:W + 1, :] = y9.reshape(H, W, Cout9)

    acc = jnp.zeros((H, W, Cout), jnp.float32)
    for kh in range(3):
        for kw in range(3):
            t = kh * 3 + kw
            acc = acc + ypad_ref[kh:kh + H, kw:kw + W,
                                 t * Cout:(t + 1) * Cout]

    # ---- torch.cat([x, out], dim=1) -> two direct channel-slab stores --------
    o_ref[0, :, :, 0:Cin] = x_ref[0]
    o_ref[0, :, :, Cin:Cin + Cout] = acc.astype(o_ref.dtype)


def bottleneck_block(x_nchw, params):
    """x_nchw: [N, Cin, H, W] float32 -> [N, Cin + Cout, H, W] float32."""
    N, Cin, H, W = x_nchw.shape
    w1 = params["w1_folded_bf16"]            # (Cin, Cmid) bf16, BN2-scale folded
    w2 = params["w2_stacked_bf16"]           # (Cmid, 9*Cout) bf16
    Cmid = w1.shape[1]
    Cout9 = w2.shape[1]
    Cout = Cout9 // 9
    Ctot = Cin + Cout
    Wp = ((W + 2 + 7) // 8) * 8              # haloed width, sublane-aligned

    x_nhwc = jnp.transpose(x_nchw, (0, 2, 3, 1))

    out_nhwc = pl.pallas_call(
        _bottleneck_block_kernel,
        out_shape=jax.ShapeDtypeStruct((N, H, W, Ctot), jnp.float32),
        grid_spec=pltpu.PrefetchScalarGridSpec(
            num_scalar_prefetch=0,
            grid=(N,),
            in_specs=[
                pl.BlockSpec((1, H, W, Cin), lambda b: (b, 0, 0, 0)),
                pl.BlockSpec((1, Cin), lambda b: (0, 0)),
                pl.BlockSpec((1, Cin), lambda b: (0, 0)),
                pl.BlockSpec((Cin, Cmid), lambda b: (0, 0)),
                pl.BlockSpec((1, Cmid), lambda b: (0, 0)),
                pl.BlockSpec((Cmid, Cout9), lambda b: (0, 0)),
            ],
            out_specs=pl.BlockSpec((1, H, W, Ctot), lambda b: (b, 0, 0, 0)),
            scratch_shapes=[pltpu.VMEM((H + 2, Wp, Cout9), jnp.float32)],
        ),
        compiler_params=pltpu.CompilerParams(
            dimension_semantics=("parallel",)),
    )(x_nhwc, params["s1"], params["b1"], w1, params["b2"], w2)

    return jnp.transpose(out_nhwc, (0, 3, 1, 2))


# --------------------------------------------------------------------------
# Parameters (inference-mode BatchNorm folded to per-channel scale/shift)
# --------------------------------------------------------------------------
def make_params(key, in_planes, out_planes):
    Cin, Cout = in_planes, out_planes
    Cmid = 4 * out_planes
    eps = 1e-5
    ks = jax.random.split(key, 10)

    g1 = 1.0 + 0.1 * jax.random.normal(ks[0], (Cin,), jnp.float32)
    be1 = 0.1 * jax.random.normal(ks[1], (Cin,), jnp.float32)
    rm1 = 0.1 * jax.random.normal(ks[2], (Cin,), jnp.float32)
    rv1 = jnp.abs(1.0 + 0.1 * jax.random.normal(ks[3], (Cin,), jnp.float32))
    s1 = g1 / jnp.sqrt(rv1 + eps)
    b1 = be1 - rm1 * s1

    g2 = 1.0 + 0.1 * jax.random.normal(ks[4], (Cmid,), jnp.float32)
    be2 = 0.1 * jax.random.normal(ks[5], (Cmid,), jnp.float32)
    rm2 = 0.1 * jax.random.normal(ks[6], (Cmid,), jnp.float32)
    rv2 = jnp.abs(1.0 + 0.1 * jax.random.normal(ks[7], (Cmid,), jnp.float32))
    s2 = g2 / jnp.sqrt(rv2 + eps)
    b2 = be2 - rm2 * s2

    # conv1 (1x1, no bias) as a (Cin, Cmid) matmul matrix.
    w1 = 0.05 * jax.random.normal(ks[8], (Cin, Cmid), jnp.float32)
    # conv2 (3x3, padding=1, no bias) in HWIO.
    w2 = 0.05 * jax.random.normal(ks[9], (3, 3, Cmid, Cout), jnp.float32)

    # Fold BN2 scale into the 1x1-conv columns; cast MXU operands to bf16.
    w1_folded_bf16 = (w1 * s2[None, :]).astype(jnp.bfloat16)
    # All 9 taps stacked along the matmul N dim: column block t = kh*3 + kw
    # holds w2[kh, kw, :, :]  ->  rhs shape (Cmid, 9*Cout).
    w2_stacked_bf16 = (jnp.transpose(w2, (2, 0, 1, 3))
                       .reshape(Cmid, 9 * Cout).astype(jnp.bfloat16))

    return dict(
        s1=s1.reshape(1, -1), b1=b1.reshape(1, -1), b2=b2.reshape(1, -1),
        w1_folded_bf16=w1_folded_bf16, w2_stacked_bf16=w2_stacked_bf16,
        # f32 originals for the references
        w1=w1, w2=w2, s2=s2)


# --------------------------------------------------------------------------
# Pure-JAX references for validation
# --------------------------------------------------------------------------
def reference(x_nchw, params, *, bf16_matmuls):
    x = jnp.transpose(x_nchw, (0, 2, 3, 1)).astype(jnp.float32)   # NHWC
    h = jnp.maximum(x * params["s1"][0] + params["b1"][0], 0.0)
    dn = ("NHWC", "HWIO", "NHWC")
    if bf16_matmuls:
        w1 = (params["w1"] * params["s2"][None, :]).astype(jnp.bfloat16)
        y = jnp.einsum("nhwc,cd->nhwd", h.astype(jnp.bfloat16), w1,
                       preferred_element_type=jnp.float32)
        h2 = jnp.maximum(y + params["b2"][0], 0.0)
        conv = lax.conv_general_dilated(
            h2.astype(jnp.bfloat16), params["w2"].astype(jnp.bfloat16),
            (1, 1), "SAME", dimension_numbers=dn,
            preferred_element_type=jnp.float32)
    else:
        y = jnp.einsum("nhwc,cd->nhwd", h,
                       params["w1"] * params["s2"][None, :])
        h2 = jnp.maximum(y + params["b2"][0], 0.0)
        conv = lax.conv_general_dilated(h2, params["w2"], (1, 1), "SAME",
                                        dimension_numbers=dn)
    out = jnp.concatenate([x, conv], axis=-1)
    return jnp.transpose(out, (0, 3, 1, 2))


if __name__ == "__main__":
    in_planes, out_planes, drop_rate = 64, 32, 0.0
    N, H, W = 2, 16, 16

    key = jax.random.PRNGKey(0)
    k_x, k_p = jax.random.split(key)
    x = jax.random.normal(k_x, (N, in_planes, H, W), jnp.float32)
    params = make_params(k_p, in_planes, out_planes)

    out = jax.block_until_ready(bottleneck_block(x, params))
    assert out.shape == (N, in_planes + out_planes, H, W), out.shape

    # Tight check vs a reference that uses the same bf16-at-MXU precision.
    ref_bf16 = jax.block_until_ready(reference(x, params, bf16_matmuls=True))
    err_b = float(jnp.max(jnp.abs(out - ref_bf16)))
    assert jnp.allclose(out, ref_bf16, atol=5e-3, rtol=5e-3), err_b

    # Looser sanity check vs the full-f32 reference (bf16 operand rounding).
    ref_f32 = jax.block_until_ready(reference(x, params, bf16_matmuls=False))
    err_f = float(jnp.max(jnp.abs(out - ref_f32)))
    assert jnp.allclose(out, ref_f32, atol=3e-2, rtol=3e-2), err_f

    print("KERNEL_OK")
</pallas_src>

<mosaic_0001>
module attributes {stable_mosaic.version = 11 : i64} {
  func.func @_bottleneck_block_kernel(%arg0: i32, %arg1: memref<1x16x16x64xf32, #tpu.memory_space<vmem>>, %arg2: memref<1x64xf32, #tpu.memory_space<vmem>>, %arg3: memref<1x64xf32, #tpu.memory_space<vmem>>, %arg4: memref<64x128xbf16, #tpu.memory_space<vmem>>, %arg5: memref<1x128xf32, #tpu.memory_space<vmem>>, %arg6: memref<128x288xbf16, #tpu.memory_space<vmem>>, %arg7: memref<1x16x16x96xf32, #tpu.memory_space<vmem>>, %arg8: memref<18x24x288xf32, #tpu.memory_space<vmem>>) attributes {dimension_semantics = [#tpu.dimension_semantics<parallel>], iteration_bounds = array<i64: 2>, scalar_prefetch = 0 : i64, scratch_operands = 1 : i64, tpu.core_type = #tpu.core_type<tc>, window_params = [{transform_indices = @transform_0, window_bounds = array<i64: 1, 16, 16, 64>}, {pipeline_mode = #tpu.pipeline_mode<synchronous>, transform_indices = @transform_1, window_bounds = array<i64: 1, 64>}, {pipeline_mode = #tpu.pipeline_mode<synchronous>, transform_indices = @transform_2, window_bounds = array<i64: 1, 64>}, {pipeline_mode = #tpu.pipeline_mode<synchronous>, transform_indices = @transform_3, window_bounds = array<i64: 64, 128>}, {pipeline_mode = #tpu.pipeline_mode<synchronous>, transform_indices = @transform_4, window_bounds = array<i64: 1, 128>}, {pipeline_mode = #tpu.pipeline_mode<synchronous>, transform_indices = @transform_5, window_bounds = array<i64: 128, 288>}, {transform_indices = @transform_6, window_bounds = array<i64: 1, 16, 16, 96>}]} {
    %c0 = arith.constant 0 : index
    %c0_0 = arith.constant 0 : index
    %c0_1 = arith.constant 0 : index
    %c0_2 = arith.constant 0 : index
    %0 = vector.load %arg1[%c0, %c0_0, %c0_1, %c0_2] : memref<1x16x16x64xf32, #tpu.memory_space<vmem>>, vector<1x16x16x64xf32>
    %1 = vector.shape_cast %0 : vector<1x16x16x64xf32> to vector<16x16x64xf32>
    %2 = vector.shape_cast %1 : vector<16x16x64xf32> to vector<256x64xf32>
    %c0_3 = arith.constant 0 : index
    %c0_4 = arith.constant 0 : index
    %3 = vector.load %arg2[%c0_3, %c0_4] : memref<1x64xf32, #tpu.memory_space<vmem>>, vector<1x64xf32>
    %4 = vector.broadcast %3 : vector<1x64xf32> to vector<256x64xf32>
    %5 = arith.mulf %2, %4 : vector<256x64xf32>
    %c0_5 = arith.constant 0 : index
    %c0_6 = arith.constant 0 : index
    %6 = vector.load %arg3[%c0_5, %c0_6] : memref<1x64xf32, #tpu.memory_space<vmem>>, vector<1x64xf32>
    %7 = vector.broadcast %6 : vector<1x64xf32> to vector<256x64xf32>
    %8 = arith.addf %5, %7 : vector<256x64xf32>
    %cst = arith.constant 0.000000e+00 : f32
    %9 = vector.broadcast %cst : f32 to vector<256x64xf32>
    %10 = arith.maximumf %8, %9 : vector<256x64xf32>
    %11 = arith.truncf %10 : vector<256x64xf32> to vector<256x64xbf16>
    %c0_7 = arith.constant 0 : index
    %c0_8 = arith.constant 0 : index
    %12 = vector.load %arg4[%c0_7, %c0_8] : memref<64x128xbf16, #tpu.memory_space<vmem>>, vector<64x128xbf16>
    %cst_9 = arith.constant dense<0.000000e+00> : vector<256x128xf32>
    %13 = tpu.matmul %11, %12, %cst_9 {dimension_numbers = #tpu.dot_dimension_numbers<[1], [0], [0], [1], [0, 0, 1, 1], [], []>} : vector<256x64xbf16>, vector<64x128xbf16>, vector<256x128xf32> -> vector<256x128xf32>
    %c0_10 = arith.constant 0 : index
    %c0_11 = arith.constant 0 : index
    %14 = vector.load %arg5[%c0_10, %c0_11] : memref<1x128xf32, #tpu.memory_space<vmem>>, vector<1x128xf32>
    %15 = vector.broadcast %14 : vector<1x128xf32> to vector<256x128xf32>
    %16 = arith.addf %13, %15 : vector<256x128xf32>
    %cst_12 = arith.constant 0.000000e+00 : f32
    %17 = vector.broadcast %cst_12 : f32 to vector<256x128xf32>
    %18 = arith.maximumf %16, %17 : vector<256x128xf32>
    %19 = arith.truncf %18 : vector<256x128xf32> to vector<256x128xbf16>
    %c0_13 = arith.constant 0 : index
    %c0_14 = arith.constant 0 : index
    %20 = vector.load %arg6[%c0_13, %c0_14] : memref<128x288xbf16, #tpu.memory_space<vmem>>, vector<128x288xbf16>
    %cst_15 = arith.constant dense<0.000000e+00> : vector<256x288xf32>
    %21 = tpu.matmul %19, %20, %cst_15 {dimension_numbers = #tpu.dot_dimension_numbers<[1], [0], [0], [1], [0, 0, 1, 1], [], []>} : vector<256x128xbf16>, vector<128x288xbf16>, vector<256x288xf32> -> vector<256x288xf32>
    %cst_16 = arith.constant 0.000000e+00 : f32
    %22 = vector.broadcast %cst_16 : f32 to vector<18x24x288xf32>
    %c0_17 = arith.constant 0 : index
    %c0_18 = arith.constant 0 : index
    %c0_19 = arith.constant 0 : index
    %23 = vector.load %arg8[%c0_17, %c0_18, %c0_19] : memref<18x24x288xf32, #tpu.memory_space<vmem>>, vector<18x24x288xf32>
    tpu.vector_store %arg8[%c0_17, %c0_18, %c0_19], %22 {strides = array<i32>} : memref<18x24x288xf32, #tpu.memory_space<vmem>>, vector<18x24x288xf32>,
    %24 = vector.shape_cast %21 : vector<256x288xf32> to vector<16x16x288xf32>
    %c1 = arith.constant 1 : index
    %c1_20 = arith.constant 1 : index
    %c0_21 = arith.constant 0 : index
    %25 = vector.load %arg8[%c1, %c1_20, %c0_21] : memref<18x24x288xf32, #tpu.memory_space<vmem>>, vector<16x16x288xf32>
    tpu.vector_store %arg8[%c1, %c1_20, %c0_21], %24 {strides = array<i32>} : memref<18x24x288xf32, #tpu.memory_space<vmem>>, vector<16x16x288xf32>,
    %cst_22 = arith.constant 0.000000e+00 : f32
    %26 = vector.broadcast %cst_22 : f32 to vector<16x16x32xf32>
    %c0_23 = arith.constant 0 : index
    %c0_24 = arith.constant 0 : index
    %c0_25 = arith.constant 0 : index
    %27 = vector.load %arg8[%c0_23, %c0_24, %c0_25] : memref<18x24x288xf32, #tpu.memory_space<vmem>>, vector<16x16x32xf32>
    %28 = arith.addf %26, %27 : vector<16x16x32xf32>
    %c0_26 = arith.constant 0 : index
    %c1_27 = arith.constant 1 : index
    %c32 = arith.constant 32 : index
    %29 = vector.load %arg8[%c0_26, %c1_27, %c32] : memref<18x24x288xf32, #tpu.memory_space<vmem>>, vector<16x16x32xf32>
    %30 = arith.addf %28, %29 : vector<16x16x32xf32>
    %c0_28 = arith.constant 0 : index
    %c2 = arith.constant 2 : index
    %c64 = arith.constant 64 : index
    %31 = vector.load %arg8[%c0_28, %c2, %c64] : memref<18x24x288xf32, #tpu.memory_space<vmem>>, vector<16x16x32xf32>
    %32 = arith.addf %30, %31 : vector<16x16x32xf32>
    %c1_29 = arith.constant 1 : index
    %c0_30 = arith.constant 0 : index
    %c96 = arith.constant 96 : index
    %33 = vector.load %arg8[%c1_29, %c0_30, %c96] : memref<18x24x288xf32, #tpu.memory_space<vmem>>, vector<16x16x32xf32>
    %34 = arith.addf %32, %33 : vector<16x16x32xf32>
    %c1_31 = arith.constant 1 : index
    %c1_32 = arith.constant 1 : index
    %c128 = arith.constant 128 : index
    %35 = vector.load %arg8[%c1_31, %c1_32, %c128] : memref<18x24x288xf32, #tpu.memory_space<vmem>>, vector<16x16x32xf32>
    %36 = arith.addf %34, %35 : vector<16x16x32xf32>
    %c1_33 = arith.constant 1 : index
    %c2_34 = arith.constant 2 : index
    %c160 = arith.constant 160 : index
    %37 = vector.load %arg8[%c1_33, %c2_34, %c160] : memref<18x24x288xf32, #tpu.memory_space<vmem>>, vector<16x16x32xf32>
    %38 = arith.addf %36, %37 : vector<16x16x32xf32>
    %c2_35 = arith.constant 2 : index
    %c0_36 = arith.constant 0 : index
    %c192 = arith.constant 192 : index
    %39 = vector.load %arg8[%c2_35, %c0_36, %c192] : memref<18x24x288xf32, #tpu.memory_space<vmem>>, vector<16x16x32xf32>
    %40 = arith.addf %38, %39 : vector<16x16x32xf32>
    %c2_37 = arith.constant 2 : index
    %c1_38 = arith.constant 1 : index
    %c224 = arith.constant 224 : index
    %41 = vector.load %arg8[%c2_37, %c1_38, %c224] : memref<18x24x288xf32, #tpu.memory_space<vmem>>, vector<16x16x32xf32>
    %42 = arith.addf %40, %41 : vector<16x16x32xf32>
    %c2_39 = arith.constant 2 : index
    %c2_40 = arith.constant 2 : index
    %c256 = arith.constant 256 : index
    %43 = vector.load %arg8[%c2_39, %c2_40, %c256] : memref<18x24x288xf32, #tpu.memory_space<vmem>>, vector<16x16x32xf32>
    %44 = arith.addf %42, %43 : vector<16x16x32xf32>
    %c0_41 = arith.constant 0 : index
    %c0_42 = arith.constant 0 : index
    %c0_43 = arith.constant 0 : index
    %c0_44 = arith.constant 0 : index
    %45 = vector.load %arg1[%c0_41, %c0_42, %c0_43, %c0_44] : memref<1x16x16x64xf32, #tpu.memory_space<vmem>>, vector<1x16x16x64xf32>
    %46 = vector.shape_cast %45 : vector<1x16x16x64xf32> to vector<16x16x64xf32>
    %c0_45 = arith.constant 0 : index
    %c0_46 = arith.constant 0 : index
    %c0_47 = arith.constant 0 : index
    %c0_48 = arith.constant 0 : index
    %47 = vector.load %arg7[%c0_45, %c0_46, %c0_47, %c0_48] : memref<1x16x16x96xf32, #tpu.memory_space<vmem>>, vector<1x16x16x64xf32>
    %48 = vector.shape_cast %47 : vector<1x16x16x64xf32> to vector<16x16x64xf32>
    %49 = vector.shape_cast %46 : vector<16x16x64xf32> to vector<1x16x16x64xf32>
    tpu.vector_store %arg7[%c0_45, %c0_46, %c0_47, %c0_48], %49 {strides = array<i32>} : memref<1x16x16x96xf32, #tpu.memory_space<vmem>>, vector<1x16x16x64xf32>,
    %c0_49 = arith.constant 0 : index
    %c0_50 = arith.constant 0 : index
    %c0_51 = arith.constant 0 : index
    %c64_52 = arith.constant 64 : index
    %50 = vector.load %arg7[%c0_49, %c0_50, %c0_51, %c64_52] : memref<1x16x16x96xf32, #tpu.memory_space<vmem>>, vector<1x16x16x32xf32>
    %51 = vector.shape_cast %50 : vector<1x16x16x32xf32> to vector<16x16x32xf32>
    %52 = vector.shape_cast %44 : vector<16x16x32xf32> to vector<1x16x16x32xf32>
    tpu.vector_store %arg7[%c0_49, %c0_50, %c0_51, %c64_52], %52 {strides = array<i32>} : memref<1x16x16x96xf32, #tpu.memory_space<vmem>>, vector<1x16x16x32xf32>,
    return
  }
  func.func @transform_0(%arg0: i32) -> (i32, i32, i32, i32) {
    %c0_i32 = arith.constant 0 : i32
    %c0_i32_0 = arith.constant 0 : i32
    %c0_i32_1 = arith.constant 0 : i32
    %c0_i32_2 = arith.constant 0 : i32
    return %arg0, %c0_i32, %c0_i32_0, %c0_i32_1 : i32, i32, i32, i32
  }
  func.func @transform_1(%arg0: i32) -> (i32, i32) {
    %c0_i32 = arith.constant 0 : i32
    %c0_i32_0 = arith.constant 0 : i32
    %c0_i32_1 = arith.constant 0 : i32
    return %c0_i32, %c0_i32_0 : i32, i32
  }
  func.func @transform_2(%arg0: i32) -> (i32, i32) {
    %c0_i32 = arith.constant 0 : i32
    %c0_i32_0 = arith.constant 0 : i32
    %c0_i32_1 = arith.constant 0 : i32
    return %c0_i32, %c0_i32_0 : i32, i32
  }
  func.func @transform_3(%arg0: i32) -> (i32, i32) {
    %c0_i32 = arith.constant 0 : i32
    %c0_i32_0 = arith.constant 0 : i32
    %c0_i32_1 = arith.constant 0 : i32
    return %c0_i32, %c0_i32_0 : i32, i32
  }
  func.func @transform_4(%arg0: i32) -> (i32, i32) {
    %c0_i32 = arith.constant 0 : i32
    %c0_i32_0 = arith.constant 0 : i32
    %c0_i32_1 = arith.constant 0 : i32
    return %c0_i32, %c0_i32_0 : i32, i32
  }
  func.func @transform_5(%arg0: i32) -> (i32, i32) {
    %c0_i32 = arith.constant 0 : i32
    %c0_i32_0 = arith.constant 0 : i32
    %c0_i32_1 = arith.constant 0 : i32
    return %c0_i32, %c0_i32_0 : i32, i32
  }
  func.func @transform_6(%arg0: i32) -> (i32, i32, i32, i32) {
    %c0_i32 = arith.constant 0 : i32
    %c0_i32_0 = arith.constant 0 : i32
    %c0_i32_1 = arith.constant 0 : i32
    %c0_i32_2 = arith.constant 0 : i32
    return %arg0, %c0_i32, %c0_i32_0, %c0_i32_1 : i32, i32, i32, i32
  }
}

</mosaic_0001>

<bundles_post_ra>
// kernel: tpu_custom_call.1
= control target key start
LH: loop header
LB: loop body
LE: loop exit
PB: predicated region body
PF: predicated region fallthrough
CT: control target
= control target key end

     0   :  { %11 = vsyncpa [#allocation4], 0  ;;  %s6999_s0 = inlined_call_operand.hbm [shape: f32[2,16,16,64], index: 0, kind: input, shape index: {}]   ;;  %s7000_s1 = inlined_call_operand.vmem [shape: f32[1,64], index: 1, kind: input, shape index: {}]   ;;  %s7001_s2 = inlined_call_operand.vmem [shape: f32[1,64], index: 2, kind: input, shape index: {}]   ;;  %s7002_s3 = inlined_call_operand.vmem [shape: bf16[64,128], index: 3, kind: input, shape index: {}]   ;;  %s7003_s4 = inlined_call_operand.vmem [shape: f32[1,128], index: 4, kind: input, shape index: {}]   ;;  %s7004_s5 = inlined_call_operand.vmem [shape: bf16[128,288], index: 5, kind: input, shape index: {}]   ;;  %s7005_s6 = inlined_call_operand.hbm [shape: f32[2,16,16,96], index: 6, kind: output, shape index: {}]  }
   0x1   :  { %13 = vsyncpa [#allocation4 + $0x1], 0 }
   0x2   :  { %14 = vsyncpa [#allocation5], 0 }
   0x3   :  { %16 = vsyncpa [#allocation5 + $0x1], 0  ;;  %s4741_s21 = smov 0   ;;  %s4743_s22 = smov 0  }
   0x4   :  { %s4745_s23 = smov 0   ;;  %s4747_s24 = smov 0  }
   0x5 LB: > { %s4762_s25 = sadd.s32 4294967295, %s4693_s24   ;;  %s4282_s26 = sadd.s32 4294967294, %s4693_s24   ;;  %s4693_s24 = sphi %s4747_s24, %s7269_s24   ;;  %s4689_s23 = sphi %s4745_s23, %s7268_s23   ;;  %s4685_s22 = sphi %s4743_s22, %s7267_s22   ;;  %s4681_s21 = sphi %s4741_s21, %s7266_s21  }
   0x6   : > { %s4766_s27 = sadd.s32 1, %s4693_s24   ;;  %s29_s28 = sadd.s32 1, %s4689_s23 }
   0x7   : > { %s26_s29 = ssub.s32 %s4693_s24, %s4766_s27  ;;  %p36_p0 = scmp.ne.s32.totalorder %s4689_s23, %s4685_s22 }
   0x8   : > { %p27_p1 = scmp.eq.s32.totalorder %s26_s29, 0  ;;  %p37_p2 = scmp.eq.s32.totalorder %s4693_s24, 0 }
   0x9   : > { %p42_p3 = scmp.ne.s32.totalorder %s4685_s22, %s4681_s21  ;;  %p43_p4 = scmp.eq.s32.totalorder %s4762_s25, 0 }
   0xa   : > { %s4778_s30 = scalar_select %p27_p1, %s4689_s23, %s29_s28  }
   0xb   : > { %p4780_p5 = por %p37_p2, %p36_p0  ;;  %p4784_p6 = por %p43_p4, %p42_p3 }
   0xc   : > { %p171_p7 = scmp.eq.s32.totalorder %s4762_s25, 1  ;;  %p177_p8 = scmp.eq.s32.totalorder %s4282_s26, 1 }
   0xd   : > { %p4489_p10 = scmp.lt.s32.totalorder %s4693_s24, 2  ;;  %s212_s11 = sand.u32 1, %s4689_s23  }
   0xe   : > { %p4791_p11 = por %p171_p7, %p36_p0  ;;  %p4795_p12 = por %p177_p8, %p42_p3 }
   0xf   : > { %s4343_s12 = sshll.u32 %s4693_s24, 12  ;;  %s4285_s13 = sshll.u32 %s212_s11, 8 }
  0x10   : > { %s7017_s9 = scalar_select %p4791_p11, 1, 0 }
  0x11   : > { %s7018_s10 = scalar_select %p4795_p12, 1, 0 }
  0x12   : > { %s4804_s16 = scalar_lea.hbm %s6999_s0, %s4343_s12  ;;  %s216_s17 = scalar_lea.vmem [#allocation3], %s4285_s13 }
  0x13   : > { %s223_s18 = sshll.u32 %s216_s17, 4  ;;  %p4808_p13 = pnand %p4489_p10, %p4780_p5  ;;  %s4812_s18 = int_to_ptr.vmem [resolvable:$true] %s223_s18 }
  0x14   : > { %s4814_s20 = scalar_lea.sflag [#allocation4], %s212_s11  ;;  %s4597_s26 = scalar_lea.hbm %s4804_s16, 4096 }
  0x15   : > { %p4598_p0 = scmp.ne.s32.totalorder %s4804_s16, %s4597_s26  ;;  %p4599_p1 = pneg %p4808_p13 }
  0x16   : > { %s4602_s7 = scalar_lea.hbm %s6999_s0, 8192  ;;  %p4603_p4 = scmp.lt.u32.totalorder %s4804_s16, %s6999_s0 }
  0x17   : > { %p4600_p2 = pnand %p4599_p1, %p4598_p0  ;;  %p4604_p5 = scmp.lt.u32.totalorder %s4602_s7, %s4597_s26 }
  0x18   : > { %p4606_p8 = scmp.lt.u32.totalorder %s4597_s26, %s4804_s16 }
  0x19   : > { %p4601_p3 = pneg %p4600_p2  ;;  %p4605_p7 = por %p4604_p5, %p4603_p4 }
  0x1b   : > { %p4607_p10 = por %p4606_p8, %p4605_p7 }
  0x1d   : > { %p4608_p9 = pnand %p4607_p10, %p4601_p3 }
  0x1f   : > { %4611 = shalt.err (!%p4608_p9)
}
  0x20   : > { %s4612_s11 = scalar_lea.vmem %s4812_s18, 4096  ;;  %s4695_s14 = smov [#allocation3]  }
  0x21   : > { %p4613_p0 = scmp.ne.s32.totalorder %s4812_s18, %s4612_s11  ;;  %s4617_s15 = sshll.u32 %s4695_s14, 4  ;;  %s4618_s15 = int_to_ptr.vmem [resolvable:$false] %s4617_s15 }
  0x22   : > { %s4619_s17 = scalar_lea.vmem %s4618_s15, 8192  ;;  %p4620_p11 = scmp.lt.s32.totalorder %s4812_s18, %s4618_s15 }
  0x23   : > { %p4615_p2 = pnand %p4613_p0, %p4599_p1  ;;  %p4621_p4 = scmp.lt.s32.totalorder %s4619_s17, %s4612_s11 }
  0x25   : > { %p4616_p12 = pneg %p4615_p2  ;;  %p4622_p5 = por %p4621_p4, %p4620_p11 }
  0x27   : > { %p4623_p7 = pnand %p4622_p5, %p4616_p12 }
  0x29   : > { %4626 = shalt.err (!%p4623_p7)
}
  0x2a   : > { %s4696_s26 = smov 128   ;;  %s4697_s28 = smov 8  }
  0x2b   : > { %4484 = dma.hbm_to_vmem [thread:$0]  (!%p4808_p13), %s4804_s16, 4096, %s4812_s18, %s4814_s20, %s4696_s26, %s4696_s26, %s4697_s28  }
  0x2c   : > { %p4288_p9 = scmp.ge.s32.totalorder %s4693_s24, 1  ;;  %p231_p1 = scmp.lt.s32.totalorder %s4693_s24, 3 }
  0x2e   : > { %p232_p3 = pnand %p4288_p9, %p231_p1 }
  0x30   : > { %235 = sbr.rel (%p232_p3) target bundleno = 1149 (0x47d), region = 44 }
  0x37   : > { %s4845_s29 = sand.u32 1, %s4685_s22  }
  0x38   : > { %s4289_s7 = sshll.u32 %s4845_s29, 8  ;;  %s238_s12 = scalar_lea.sflag [#allocation4], %s4845_s29 }
  0x39   : > { %s4851_s13 = scalar_lea.vmem [#allocation3], %s4289_s7 }
  0x3a   : > { %4672 = dma.done.wait (%p4784_p6), %s238_s12, 4096  }
  0x3b   : > { %4674 = vsyncadd (%p4784_p6), %s238_s12, 4294963200  ;;  %vm1242_vm0 = vcmask 261120   ;;  %v4698_v0 = vmov 0.0   ;;  %v4532_v1 = vld [vmem:[%s7002_s3] sm:$0xff]   ;;  %v4533_v2 = vld [vmem:[%s7002_s3 + $0x8] sm:$0xff]   ;;  %vm468_vm1 = vcmask 523264  }
  0x3c   : > { %1241 = vst [vmem:[#allocation2 + $0x8] sm:$0xff] %v4698_v0  ;;  %1240 = vst [vmem:[#allocation2] sm:$0xff] %v4698_v0  ;;  %4389 = vmatprep.subr.bf16.mxu0 %v4532_v1  ;;  %v4534_v3 = vld [vmem:[%s7002_s3 + $0x10] sm:$0xff]   ;;  %v272_v5 = vld [vmem:[%s4851_s13 + $0x8] sm:$0xff]  ;;  %vm2079_vm2 = vcmask 1046528   ;;  %s4700_s8 = smov 64  }
  0x3d   : > { %1247 = vst [vmem:[#allocation2 + $0x30] sm:$0xff] %v4698_v0  ;;  %1250 = vst [vmem:[#allocation2 + $0x48] sm:$0xff] %v4698_v0  ;;  %4390 = vmatpush3.bf16.msra.mxu0 %v4532_v1  ;;  %v271_v4 = vld [vmem:[%s4851_s13] sm:$0xff]  ;;  %v5035_v6 = vld [vmem:[%s7000_s1] ss:$0 sm:$0xff]  ;;  %3390 = vrot.lane.b32.xlu0 %v4698_v0, %s4700_s8  ;;  %s4701_s16 = smov 96  }
  0x3e   : > { %1251 = vst [vmem:[#allocation2 + $0x50] sm:$0xff] %v4698_v0  ;;  %1256 = vst [vmem:[#allocation2 + $0x78] sm:$0xff] %v4698_v0  ;;  %4391 = vmatprep.subr.bf16.mxu0 %v4533_v2  ;;  %v310_v7 = vmul.f32 %v5035_v6, %v271_v4  ;;  %v311_v8 = vmul.f32 %v5035_v6, %v272_v5  ;;  %v5042_v9 = vld [vmem:[%s7001_s2] ss:$0 sm:$0xff]  ;;  %v274_v11 = vld [vmem:[%s4851_s13 + $0x18] sm:$0xff]  ;;  %3392 = vrot.lane.b32.xlu1 %v4698_v0, %s4700_s8  ;;  %vm2352_vm3 = vcmask 1045504  }
  0x3f   : > { %1257 = vst [vmem:[#allocation2 + $0x80] sm:$0xff] %v4698_v0  ;;  %1259 = vst [vmem:[#allocation2 + $0x90] sm:$0xff] %v4698_v0  ;;  %v273_v10 = vld [vmem:[%s4851_s13 + $0x10] sm:$0xff]  ;;  %v313_v13 = vmul.f32 %v5035_v6, %v274_v11  ;;  %v275_v14 = vld [vmem:[%s4851_s13 + $0x20] sm:$0xff]  ;;  %s4702_s20 = smov 32   ;;  %vm1791_vm4 = vcmask 261121  }
  0x40   : > { %1260 = vst [vmem:[#allocation2 + $0x98] sm:$0xff] %v4698_v0  ;;  %1261 = vst.msk [vmem:[#allocation2 + $0xa0] sm:$0xff] %vm1242_vm0, %v4698_v0  ;;  %v312_v12 = vmul.f32 %v5035_v6, %v273_v10  ;;  %v276_v15 = vld [vmem:[%s4851_s13 + $0x28] sm:$0xff]  ;;  %v277_v16 = vld [vmem:[%s4851_s13 + $0x30] sm:$0xff]  ;;  %v349_v17 = vadd.f32 %v5042_v9, %v310_v7  ;;  %v350_v18 = vadd.f32 %v5042_v9, %v311_v8  ;;  %vm1499_vm5 = vcmask 1040384   ;;  %s6379_s11 = scalar_lea.vmem [#allocation6], %s4289_s7 }
  0x41   : > { %1264 = vst.msk [vmem:[#allocation2 + $0xb8] sm:$0xff] %vm1242_vm0, %v4698_v0  ;;  %1265 = vst [vmem:[#allocation2 + $0xc0] sm:$0xff] %v4698_v0  ;;  %4392 = vmatpush3.bf16.msra.mxu0 %v4533_v2  ;;  %v314_v19 = vmul.f32 %v5035_v6, %v275_v14  ;;  %v315_v20 = vmul.f32 %v5035_v6, %v276_v15  ;;  %v278_v21 = vld [vmem:[%s4851_s13 + $0x38] sm:$0xff]  ;;  %v4535_v22 = vld [vmem:[%s7002_s3 + $0x18] sm:$0xff]   ;;  %v352_v24 = vadd.f32 %v5042_v9, %v313_v13  ;;  %vm1798_vm6 = vcmask 253952   ;;  %s4344_s7 = sshll.u32 %s4762_s25, 12 }
  0x42   : > { %1266 = vst [vmem:[#allocation2 + $0xc8] sm:$0xff] %v4698_v0  ;;  %1267 = vst.msk [vmem:[#allocation2 + $0xd0] sm:$0xff] %vm1242_vm0, %v4698_v0  ;;  %4393 = vmatprep.subr.bf16.mxu0 %v4534_v3  ;;  %v351_v23 = vadd.f32 %v5042_v9, %v312_v12  ;;  %v316_v25 = vmul.f32 %v5035_v6, %v277_v16  ;;  %v317_v26 = vmul.f32 %v5035_v6, %v278_v21  ;;  %v279_v27 = vld [vmem:[%s4851_s13 + $0x40] sm:$0xff]  ;;  %v280_v32 = vld [vmem:[%s4851_s13 + $0x48] sm:$0xff]  ;;  %vm4162_vm7 = vcmask 785920   ;;  %s6951_s17 = scalar_lea.hbm %s7005_s6, %s4344_s7  ;;  %s4196_s26 = scalar_lea.sflag [#allocation5], %s4845_s29 }
  0x43   : > { %1268 = vst [vmem:[#allocation2 + $0xd8] sm:$0xff] %v4698_v0  ;;  %1269 = vst [vmem:[#allocation2 + $0xe0] sm:$0xff] %v4698_v0  ;;  %v381_v28 = vmax.f32 %v349_v17, 0.0  ;;  %v382_v29 = vmax.f32 %v350_v18, 0.0  ;;  %v353_v30 = vadd.f32 %v5042_v9, %v314_v19  ;;  %v354_v31 = vadd.f32 %v5042_v9, %v315_v20  ;;  %v4536_v40 = vld [vmem:[%s7004_s5 + $0x4] ss:$12 sps:$4 sm:$0xff]  }
  0x44   : > { %1270 = vst.msk [vmem:[#allocation2 + $0xe8] sm:$0xff] %vm1242_vm0, %v4698_v0  ;;  %1273 = vst.msk [vmem:[#allocation2 + $0x100] sm:$0xff] %vm1242_vm0, %v4698_v0  ;;  %v383_v33 = vmax.f32 %v351_v23, 0.0  ;;  %v384_v34 = vmax.f32 %v352_v24, 0.0  ;;  %v318_v38 = vmul.f32 %v5035_v6, %v279_v27  ;;  %v319_v39 = vmul.f32 %v5035_v6, %v280_v32  ;;  %v4538_v41 = vld [vmem:[%s7004_s5] ss:$12 sps:$4 sm:$0xff]   ;;  %886 = vmatprep.subr.bf16.mxu1 %v4536_v40 }
  0x45   : > { %1274 = vst [vmem:[#allocation2 + $0x108] sm:$0xff] %v4698_v0  ;;  %1275 = vst [vmem:[#allocation2 + $0x110] sm:$0xff] %v4698_v0  ;;  %4394 = vmatpush3.bf16.msra.mxu0 %v4534_v3  ;;  %v413_v35 = vpack.c.bf16 %v382_v29, %v381_v28  ;;  %v385_v36 = vmax.f32 %v353_v30, 0.0  ;;  %v386_v37 = vmax.f32 %v354_v31, 0.0  ;;  %v355_v42 = vadd.f32 %v5042_v9, %v316_v25  ;;  %v281_v44 = vld [vmem:[%s4851_s13 + $0x50] sm:$0xff]  ;;  %v282_v45 = vld [vmem:[%s4851_s13 + $0x58] sm:$0xff] }
  0x46   : > { %1276 = vst.msk [vmem:[#allocation2 + $0x118] sm:$0xff] %vm1242_vm0, %v4698_v0  ;;  %1277 = vst [vmem:[#allocation2 + $0x120] sm:$0xff] %v4698_v0  ;;  %4395 = vmatprep.subr.bf16.mxu0 %v4535_v22  ;;  %v356_v43 = vadd.f32 %v5042_v9, %v317_v26  ;;  %v4539_v46 = vld [vmem:[%s7004_s5 + $0x8] ss:$12 sps:$4 sm:$0xff]   ;;  %v414_v47 = vpack.c.bf16 %v384_v34, %v383_v33  ;;  %v357_v48 = vadd.f32 %v5042_v9, %v318_v38  ;;  %v284_v53 = vld [vmem:[%s4851_s13 + $0x68] sm:$0xff]  ;;  %p7263_p11 = scmp.ne.s32.totalorder %s7017_s9, 0 }
  0x47   : > { %1278 = vst [vmem:[#allocation2 + $0x128] sm:$0xff] %v4698_v0  ;;  %1279 = vst.msk [vmem:[#allocation2 + $0x130] sm:$0xff] %vm1242_vm0, %v4698_v0  ;;  %4397 = vmatprep.mubr.msk.bf16.mxu0 %vm468_vm1, %v413_v35  ;;  %v4540_v49 = vld [vmem:[%s7004_s5 + $0x1c] ss:$12 sps:$4 sm:$0xff]   ;;  %v415_v50 = vpack.c.bf16 %v386_v37, %v385_v36  ;;  %v358_v51 = vadd.f32 %v5042_v9, %v319_v39  ;;  %v283_v52 = vld [vmem:[%s4851_s13 + $0x60] sm:$0xff]  ;;  %887 = vmatpush1.bf16.msra.mxu1 %v4538_v41  ;;  %v387_v56 = vmax.f32 %v355_v42, 0.0 }
  0x48   : > { %1282 = vst.msk [vmem:[#allocation2 + $0x148] sm:$0xff] %vm1242_vm0, %v4698_v0  ;;  %1283 = vst [vmem:[#allocation2 + $0x150] sm:$0xff] %v4698_v0  ;;  %888 = vmatprep.subr.bf16.mxu1 %v4540_v49  ;;  %v4542_v54 = vld [vmem:[%s7004_s5 + $0x18] ss:$12 sps:$4 sm:$0xff]   ;;  %v4543_v55 = vld [vmem:[%s7004_s5 + $0x20] ss:$12 sps:$4 sm:$0xff]   ;;  %v320_v60 = vmul.f32 %v5035_v6, %v281_v44  ;;  %v321_v61 = vmul.f32 %v5035_v6, %v282_v45  ;;  %v322_v62 = vmul.f32 %v5035_v6, %v283_v52 }
  0x49   : > { %1284 = vst [vmem:[#allocation2 + $0x158] sm:$0xff] %v4698_v0  ;;  %1285 = vst.msk [vmem:[#allocation2 + $0x160] sm:$0xff] %vm1242_vm0, %v4698_v0  ;;  %4396 = vmatpush3.bf16.msra.mxu0 %v4535_v22  ;;  %v388_v57 = vmax.f32 %v356_v43, 0.0  ;;  %v4544_v58 = vld [vmem:[%s7004_s5 + $0x34] ss:$12 sps:$4 sm:$0xff]   ;;  %v389_v59 = vmax.f32 %v357_v48, 0.0  ;;  %v323_v1 = vmul.f32 %v5035_v6, %v284_v53 }
  0x4a   : > { %1286 = vst [vmem:[#allocation2 + $0x168] sm:$0xff] %v4698_v0  ;;  %1287 = vst [vmem:[#allocation2 + $0x170] sm:$0xff] %v4698_v0  ;;  %4429 = vmatprep.subr.bf16.mxu0 %v4539_v46  ;;  %v390_v63 = vmax.f32 %v358_v51, 0.0  ;;  %v4546_v2 = vld [vmem:[%s7004_s5 + $0x30] ss:$12 sps:$4 sm:$0xff]   ;;  %v359_v7 = vadd.f32 %v5042_v9, %v320_v60  ;;  %v360_v8 = vadd.f32 %v5042_v9, %v321_v61  ;;  %v285_v11 = vld [vmem:[%s4851_s13 + $0x70] sm:$0xff] }
  0x4b   : > { %1288 = vst.msk [vmem:[#allocation2 + $0x178] sm:$0xff] %vm1242_vm0, %v4698_v0  ;;  %1291 = vst.msk [vmem:[#allocation2 + $0x190] sm:$0xff] %vm1242_vm0, %v4698_v0  ;;  %889 = vmatpush1.bf16.msra.mxu1 %v4542_v54  ;;  %v4547_v3 = vld [vmem:[%s7004_s5 + $0x38] ss:$12 sps:$4 sm:$0xff]   ;;  %v416_v5 = vpack.c.bf16 %v388_v57, %v387_v56  ;;  %v361_v10 = vadd.f32 %v5042_v9, %v322_v62  ;;  %v286_v12 = vld [vmem:[%s4851_s13 + $0x78] sm:$0xff]  ;;  %v362_v14 = vadd.f32 %v5042_v9, %v323_v1  ;;  %s4703_s25 = smov [#allocation6]  }
  0x4c   : > { %1292 = vst [vmem:[#allocation2 + $0x198] sm:$0xff] %v4698_v0  ;;  %1293 = vst [vmem:[#allocation2 + $0x1a0] sm:$0xff] %v4698_v0  ;;  %4398 = vmatmul.mubr.msk.bf16.vlgmr.msra.gmra.mrb[0].mxu0 %vm468_vm1, %v414_v47  ;;  %890 = vmatprep.subr.bf16.mxu1 %v4544_v58  ;;  %v4548_v4 = vld [vmem:[%s7004_s5 + $0x4c] ss:$12 sps:$4 sm:$0xff]   ;;  %v417_v13 = vpack.c.bf16 %v390_v63, %v389_v59  ;;  %v287_v15 = vld [vmem:[%s4851_s13 + $0x80] sm:$0xff]  ;;  %v324_v19 = vmul.f32 %v5035_v6, %v285_v11  ;;  %v391_v21 = vmax.f32 %v359_v7, 0.0 }
  0x4d   : > { %1294 = vst.msk [vmem:[#allocation2 + $0x1a8] sm:$0xff] %vm1242_vm0, %v4698_v0  ;;  %1295 = vst [vmem:[#allocation2 + $0x1b0] sm:$0xff] %v4698_v0  ;;  %4401 = vmatprep.mubr.msk.bf16.mxu0 %vm468_vm1, %v415_v50  ;;  %4430 = vmatpush3.bf16.msra.mxu0 %v4539_v46  ;;  %v288_v16 = vld [vmem:[%s4851_s13 + $0x88] sm:$0xff]  ;;  %v4550_v17 = vld [vmem:[%s7004_s5 + $0x48] ss:$12 sps:$4 sm:$0xff]   ;;  %v392_v22 = vmax.f32 %v360_v8, 0.0  ;;  %v325_v24 = vmul.f32 %v5035_v6, %v286_v12  ;;  %v326_v26 = vmul.f32 %v5035_v6, %v287_v15 }
  0x4e   : > { %1296 = vst [vmem:[#allocation2 + $0x1b8] sm:$0xff] %v4698_v0  ;;  %1297 = vst.msk [vmem:[#allocation2 + $0x1c0] sm:$0xff] %vm1242_vm0, %v4698_v0  ;;  %4431 = vmatprep.subr.bf16.mxu0 %v4543_v55  ;;  %v4551_v18 = vld [vmem:[%s7004_s5 + $0x50] ss:$12 sps:$4 sm:$0xff]   ;;  %v393_v23 = vmax.f32 %v361_v10, 0.0  ;;  %v394_v25 = vmax.f32 %v362_v14, 0.0  ;;  %v327_v27 = vmul.f32 %v5035_v6, %v288_v16  ;;  %v363_v33 = vadd.f32 %v5042_v9, %v324_v19 }
  0x4f   : > { %1300 = vst.msk [vmem:[#allocation2 + $0x1d8] sm:$0xff] %vm1242_vm0, %v4698_v0  ;;  %1301 = vst [vmem:[#allocation2 + $0x1e0] sm:$0xff] %v4698_v0  ;;  %891 = vmatpush1.bf16.msra.mxu1 %v4546_v2  ;;  %v4552_v20 = vld [vmem:[%s7004_s5 + $0x64] ss:$12 sps:$4 sm:$0xff]   ;;  %v4554_v28 = vld [vmem:[%s7004_s5 + $0x60] ss:$12 sps:$4 sm:$0xff]   ;;  %v418_v32 = vpack.c.bf16 %v392_v22, %v391_v21  ;;  %v364_v34 = vadd.f32 %v5042_v9, %v325_v24  ;;  %v365_v36 = vadd.f32 %v5042_v9, %v326_v26 }
  0x50   : > { %1302 = vst [vmem:[#allocation2 + $0x1e8] sm:$0xff] %v4698_v0  ;;  %1303 = vst.msk [vmem:[#allocation2 + $0x1f0] sm:$0xff] %vm1242_vm0, %v4698_v0  ;;  %892 = vmatprep.subr.bf16.mxu1 %v4548_v4  ;;  %v4555_v29 = vld [vmem:[%s7004_s5 + $0x68] ss:$12 sps:$4 sm:$0xff]   ;;  %v289_v30 = vld [vmem:[%s4851_s13 + $0x90] sm:$0xff]  ;;  %v419_v35 = vpack.c.bf16 %v394_v25, %v393_v23  ;;  %v366_v37 = vadd.f32 %v5042_v9, %v327_v27  ;;  %v395_v43 = vmax.f32 %v363_v33, 0.0 }
  0x51   : > { %1304 = vst [vmem:[#allocation2 + $0x1f8] sm:$0xff] %v4698_v0  ;;  %1305 = vst [vmem:[#allocation2 + $0x200] sm:$0xff] %v4698_v0  ;;  %4432 = vmatpush3.bf16.msra.mxu0 %v4543_v55  ;;  %v4556_v31 = vld [vmem:[%s7004_s5 + $0x7c] ss:$12 sps:$4 sm:$0xff]   ;;  %v291_v39 = vld [vmem:[%s4851_s13 + $0xa0] sm:$0xff]  ;;  %v396_v44 = vmax.f32 %v364_v34, 0.0  ;;  %v328_v45 = vmul.f32 %v5035_v6, %v289_v30 }
  0x52   : > { %1306 = vst.msk [vmem:[#allocation2 + $0x208] sm:$0xff] %vm1242_vm0, %v4698_v0  ;;  %1309 = vst.msk [vmem:[#allocation2 + $0x220] sm:$0xff] %vm1242_vm0, %v4698_v0  ;;  %4433 = vmatprep.subr.bf16.mxu0 %v4547_v3  ;;  %v290_v38 = vld [vmem:[%s4851_s13 + $0x98] sm:$0xff]  ;;  %v292_v40 = vld [vmem:[%s4851_s13 + $0xa8] sm:$0xff]  ;;  %v397_v47 = vmax.f32 %v365_v36, 0.0  ;;  %v398_v48 = vmax.f32 %v366_v37, 0.0  ;;  %v330_v49 = vmul.f32 %v5035_v6, %v291_v39 }
  0x53   : > { %1310 = vst [vmem:[#allocation2 + $0x228] sm:$0xff] %v4698_v0  ;;  %1311 = vst [vmem:[#allocation2 + $0x230] sm:$0xff] %v4698_v0  ;;  %893 = vmatpush1.bf16.msra.mxu1 %v4550_v17  ;;  %v4558_v41 = vld [vmem:[%s7004_s5 + $0x78] ss:$12 sps:$4 sm:$0xff]   ;;  %v4559_v42 = vld [vmem:[%s7004_s5 + $0x80] ss:$12 sps:$4 sm:$0xff]   ;;  %v329_v46 = vmul.f32 %v5035_v6, %v290_v38  ;;  %v331_v50 = vmul.f32 %v5035_v6, %v292_v40  ;;  %v420_v51 = vpack.c.bf16 %v396_v44, %v395_v43 }
  0x54   : > { %1312 = vst.msk [vmem:[#allocation2 + $0x238] sm:$0xff] %vm1242_vm0, %v4698_v0  ;;  %1313 = vst [vmem:[#allocation2 + $0x240] sm:$0xff] %v4698_v0  ;;  %4402 = vmatmul.mubr.msk.bf16.gmra.mrb[4].mxu0 %vm468_vm1, %v416_v5  ;;  %894 = vmatprep.subr.bf16.mxu1 %v4552_v20  ;;  %v367_v52 = vadd.f32 %v5042_v9, %v328_v45  ;;  %v421_v54 = vpack.c.bf16 %v398_v48, %v397_v47  ;;  %v293_v57 = vld [vmem:[%s4851_s13 + $0xb0] sm:$0xff]  ;;  %v294_v58 = vld [vmem:[%s4851_s13 + $0xb8] sm:$0xff]  ;;  %s4631_s12 = sshll.u32 %s4703_s25, 4  ;;  %s4632_s12 = int_to_ptr.vmem [resolvable:$false] %s4631_s12 }
  0x55   : > { %1314 = vst [vmem:[#allocation2 + $0x248] sm:$0xff] %v4698_v0  ;;  %1315 = vst.msk [vmem:[#allocation2 + $0x250] sm:$0xff] %vm1242_vm0, %v4698_v0  ;;  %4405 = vmatprep.mubr.msk.bf16.mxu0 %vm468_vm1, %v417_v13  ;;  %4434 = vmatpush3.bf16.msra.mxu0 %v4547_v3  ;;  %v368_v53 = vadd.f32 %v5042_v9, %v329_v46  ;;  %v369_v55 = vadd.f32 %v5042_v9, %v330_v49  ;;  %v295_v59 = vld [vmem:[%s4851_s13 + $0xc0] sm:$0xff]  ;;  %v296_v60 = vld [vmem:[%s4851_s13 + $0xc8] sm:$0xff] }
  0x56   : > { %1318 = vst.msk [vmem:[#allocation2 + $0x268] sm:$0xff] %vm1242_vm0, %v4698_v0  ;;  %1319 = vst [vmem:[#allocation2 + $0x270] sm:$0xff] %v4698_v0  ;;  %4435 = vmatprep.subr.bf16.mxu0 %v4551_v18  ;;  %v370_v56 = vadd.f32 %v5042_v9, %v331_v50  ;;  %v399_v61 = vmax.f32 %v367_v52, 0.0  ;;  %v332_v63 = vmul.f32 %v5035_v6, %v293_v57  ;;  %v297_v14 = vld [vmem:[%s4851_s13 + $0xd0] sm:$0xff]  ;;  %v298_v15 = vld [vmem:[%s4851_s13 + $0xd8] sm:$0xff] }
  0x57   : > { %1320 = vst [vmem:[#allocation2 + $0x278] sm:$0xff] %v4698_v0  ;;  %1321 = vst.msk [vmem:[#allocation2 + $0x280] sm:$0xff] %vm1242_vm0, %v4698_v0  ;;  %895 = vmatpush1.bf16.msra.mxu1 %v4554_v28  ;;  %v400_v62 = vmax.f32 %v368_v53, 0.0  ;;  %v333_v1 = vmul.f32 %v5035_v6, %v294_v58  ;;  %v401_v2 = vmax.f32 %v369_v55, 0.0  ;;  %v334_v4 = vmul.f32 %v5035_v6, %v295_v59  ;;  %v300_v30 = vld [vmem:[%s4851_s13 + $0xe8] sm:$0xff]  ;;  %v301_v33 = vld [vmem:[%s4851_s13 + $0xf0] sm:$0xff] }
  0x58   : > { %1322 = vst [vmem:[#allocation2 + $0x288] sm:$0xff] %v4698_v0  ;;  %1323 = vst [vmem:[#allocation2 + $0x290] sm:$0xff] %v4698_v0  ;;  %896 = vmatprep.subr.bf16.mxu1 %v4556_v31  ;;  %v402_v3 = vmax.f32 %v370_v56, 0.0  ;;  %v335_v5 = vmul.f32 %v5035_v6, %v296_v60  ;;  %v371_v8 = vadd.f32 %v5042_v9, %v332_v63  ;;  %v302_v34 = vld [vmem:[%s4851_s13 + $0xf8] sm:$0xff]  ;;  %v4560_v46 = vld [vmem:[%s7004_s5 + $0x94] ss:$12 sps:$4 sm:$0xff]  }
  0x59   : > { %1324 = vst.msk [vmem:[#allocation2 + $0x298] sm:$0xff] %vm1242_vm0, %v4698_v0  ;;  %1327 = vst.msk [vmem:[#allocation2 + $0x2b0] sm:$0xff] %vm1242_vm0, %v4698_v0  ;;  %4436 = vmatpush3.bf16.msra.mxu0 %v4551_v18  ;;  %v422_v7 = vpack.c.bf16 %v400_v62, %v399_v61  ;;  %v372_v10 = vadd.f32 %v5042_v9, %v333_v1  ;;  %v373_v12 = vadd.f32 %v5042_v9, %v334_v4  ;;  %v4563_v48 = vld [vmem:[%s7004_s5 + $0x98] ss:$12 sps:$4 sm:$0xff]   ;;  %v4566_v49 = vld [vmem:[%s7004_s5 + $0xa8] ss:$12 sps:$4 sm:$0xff]  }
  0x5a   : > { %1328 = vst [vmem:[#allocation2 + $0x2b8] sm:$0xff] %v4698_v0  ;;  %1329 = vst [vmem:[#allocation2 + $0x2c0] sm:$0xff] %v4698_v0  ;;  %4437 = vmatprep.subr.bf16.mxu0 %v4555_v29  ;;  %v423_v11 = vpack.c.bf16 %v402_v3, %v401_v2  ;;  %v374_v13 = vadd.f32 %v5042_v9, %v335_v5  ;;  %v403_v16 = vmax.f32 %v371_v8, 0.0  ;;  %v4567_v50 = vld [vmem:[%s7004_s5 + $0xb0] ss:$12 sps:$4 sm:$0xff]   ;;  %v5229_v53 = vrot.slane %v4698_v0, 1 }
  0x5b   : > { %1330 = vst.msk [vmem:[#allocation2 + $0x2c8] sm:$0xff] %vm1242_vm0, %v4698_v0  ;;  %1331 = vst [vmem:[#allocation2 + $0x2d0] sm:$0xff] %v4698_v0  ;;  %897 = vmatpush1.bf16.msra.mxu1 %v4558_v41  ;;  %v404_v17 = vmax.f32 %v372_v10, 0.0  ;;  %v336_v18 = vmul.f32 %v5035_v6, %v297_v14  ;;  %v337_v19 = vmul.f32 %v5035_v6, %v298_v15  ;;  %v405_v20 = vmax.f32 %v373_v12, 0.0  ;;  %v1999_v52 = vld [vmem:[#allocation2] sm:$0xfe] }
  0x5c   : > { %1332 = vst [vmem:[#allocation2 + $0x2d8] sm:$0xff] %v4698_v0  ;;  %1333 = vst.msk [vmem:[#allocation2 + $0x2e0] sm:$0xff] %vm1242_vm0, %v4698_v0  ;;  %4406 = vmatmul.mubr.msk.bf16.gmra.mrb[8].mxu0 %vm468_vm1, %v418_v32  ;;  %v406_v21 = vmax.f32 %v374_v13, 0.0  ;;  %v339_v32 = vmul.f32 %v5035_v6, %v300_v30  ;;  %v341_v36 = vmul.f32 %v5035_v6, %v302_v34  ;;  %898 = vmatprep.subr.bf16.mxu1 %v4560_v46  ;;  %v2000_v56 = vld [vmem:[#allocation2 + $0x30] sm:$0x1] }
  0x5d   : > { %1336 = vst.msk [vmem:[#allocation2 + $0x2f8] sm:$0xff] %vm1242_vm0, %v4698_v0  ;;  %1337 = vst [vmem:[#allocation2 + $0x300] sm:$0xff] %v4698_v0  ;;  %4409 = vmatprep.mubr.msk.bf16.mxu0 %vm468_vm1, %v419_v35  ;;  %4438 = vmatpush3.bf16.msra.mxu0 %v4555_v29  ;;  %v424_v22 = vpack.c.bf16 %v404_v17, %v403_v16  ;;  %v375_v23 = vadd.f32 %v5042_v9, %v336_v18  ;;  %v299_v29 = vld [vmem:[%s4851_s13 + $0xe0] sm:$0xff]  ;;  %v2083_v57 = vrot.slane %v2000_v56, 1  ;;  %v5244_v59 = vld [vmem:[%s7003_s4] ss:$0 sm:$0xff] }
  0x5e   : > { %1338 = vst [vmem:[#allocation2 + $0x308] sm:$0xff] %v4698_v0  ;;  %1339 = vst.msk [vmem:[#allocation2 + $0x310] sm:$0xff] %vm1242_vm0, %v4698_v0  ;;  %4439 = vmatprep.subr.bf16.mxu0 %v4559_v42  ;;  %v376_v24 = vadd.f32 %v5042_v9, %v337_v19  ;;  %v425_v25 = vpack.c.bf16 %v406_v21, %v405_v20  ;;  %v338_v31 = vmul.f32 %v5035_v6, %v299_v29 }
  0x5f   : > { %1340 = vst [vmem:[#allocation2 + $0x318] sm:$0xff] %v4698_v0  ;;  %1341 = vst [vmem:[#allocation2 + $0x320] sm:$0xff] %v4698_v0  ;;  %v407_v26 = vmax.f32 %v375_v23, 0.0  ;;  %v340_v35 = vmul.f32 %v5035_v6, %v301_v33  ;;  %v378_v38 = vadd.f32 %v5042_v9, %v339_v32  ;;  %v380_v40 = vadd.f32 %v5042_v9, %v341_v36  ;;  %v4562_v6 = vld [vmem:[%s7004_s5 + $0x90] ss:$12 sps:$4 sm:$0xff]  }
  0x60   : > { %1342 = vst.msk [vmem:[#allocation2 + $0x328] sm:$0xff] %vm1242_vm0, %v4698_v0  ;;  %1345 = vst.msk [vmem:[#allocation2 + $0x340] sm:$0xff] %vm1242_vm0, %v4698_v0  ;;  %v408_v27 = vmax.f32 %v376_v24, 0.0  ;;  %v377_v37 = vadd.f32 %v5042_v9, %v338_v31  ;;  %899 = vmatpush1.bf16.msra.mxu1 %v4562_v6  ;;  %v2084_v58 = vsel %vm2079_vm2, %v5229_v53, %v2083_v57 }
  0x61   : > { %1346 = vst [vmem:[#allocation2 + $0x348] sm:$0xff] %v4698_v0  ;;  %1347 = vst [vmem:[#allocation2 + $0x350] sm:$0xff] %v4698_v0  ;;  %4440 = vmatpush3.bf16.msra.mxu0 %v4559_v42  ;;  %v379_v39 = vadd.f32 %v5042_v9, %v340_v35  ;;  %v410_v42 = vmax.f32 %v378_v38, 0.0  ;;  %v412_v44 = vmax.f32 %v380_v40, 0.0  ;;  %v4564_v9 = vld [vmem:[%s7004_s5 + $0xac] ss:$12 sps:$4 sm:$0xff]  }
  0x62   : > { %1348 = vst.msk [vmem:[#allocation2 + $0x358] sm:$0xff] %vm1242_vm0, %v4698_v0  ;;  %1349 = vst [vmem:[#allocation2 + $0x360] sm:$0xff] %v4698_v0  ;;  %v426_v28 = vpack.c.bf16 %v408_v27, %v407_v26  ;;  %v409_v41 = vmax.f32 %v377_v37, 0.0  ;;  %4441 = vmatprep.subr.bf16.mxu0 %v4563_v48  ;;  %900 = vmatprep.subr.bf16.mxu1 %v4564_v9 }
  0x63   : > { %1350 = vst [vmem:[#allocation2 + $0x368] sm:$0xff] %v4698_v0  ;;  %1351 = vst.msk [vmem:[#allocation2 + $0x370] sm:$0xff] %vm1242_vm0, %v4698_v0  ;;  %v411_v43 = vmax.f32 %v379_v39, 0.0 }
  0x64   : > { %1354 = vst.msk [vmem:[#allocation2 + $0x388] sm:$0xff] %vm1242_vm0, %v4698_v0  ;;  %1355 = vst [vmem:[#allocation2 + $0x390] sm:$0xff] %v4698_v0  ;;  %4410 = vmatmul.mubr.msk.bf16.gmra.mrb[12].mxu0 %vm468_vm1, %v420_v51  ;;  %v427_v45 = vpack.c.bf16 %v410_v42, %v409_v41  ;;  %901 = vmatpush1.bf16.msra.mxu1 %v4566_v49  ;;  %v4699_v51 = vmov 0  }
  0x65   : > { %1356 = vst [vmem:[#allocation2 + $0x398] sm:$0xff] %v4698_v0  ;;  %1357 = vst.msk [vmem:[#allocation2 + $0x3a0] sm:$0xff] %vm1242_vm0, %v4698_v0  ;;  %4413 = vmatprep.mubr.msk.bf16.mxu0 %vm468_vm1, %v421_v54  ;;  %v428_v47 = vpack.c.bf16 %v412_v44, %v411_v43  ;;  %4442 = vmatpush3.bf16.msra.mxu0 %v4563_v48  ;;  %v2080_v54 = vrot.slane %v1999_v52, 1 }
  0x66   : > { %1358 = vst [vmem:[#allocation2 + $0x3a8] sm:$0xff] %v4698_v0  ;;  %1359 = vst [vmem:[#allocation2 + $0x3b0] sm:$0xff] %v4698_v0  ;;  %4443 = vmatprep.subr.bf16.mxu0 %v4567_v50  ;;  %918 = vmatprep.mubr.bf16.mxu1 %v4699_v51 }
  0x67   : > { %1360 = vst.msk [vmem:[#allocation2 + $0x3b8] sm:$0xff] %vm1242_vm0, %v4698_v0  ;;  %1363 = vst.msk [vmem:[#allocation2 + $0x3d0] sm:$0xff] %vm1242_vm0, %v4698_v0  ;;  %v2082_v55 = vsel %vm2079_vm2, %v2080_v54, %v5229_v53 }
  0x68   : > { %1364 = vst [vmem:[#allocation2 + $0x3d8] sm:$0xff] %v4698_v0  ;;  %1365 = vst [vmem:[#allocation2 + $0x3e0] sm:$0xff] %v4698_v0  ;;  %2160 = vrot.lane.b32.xlu0 %v2082_v55, %s4701_s16 }
  0x69   : > { %1366 = vst.msk [vmem:[#allocation2 + $0x3e8] sm:$0xff] %vm1242_vm0, %v4698_v0  ;;  %1367 = vst [vmem:[#allocation2 + $0x3f0] sm:$0xff] %v4698_v0  ;;  %4444 = vmatpush3.bf16.msra.mxu0 %v4567_v50 }
  0x6a   : > { %1368 = vst [vmem:[#allocation2 + $0x3f8] sm:$0xff] %v4698_v0  ;;  %1369 = vst.msk [vmem:[#allocation2 + $0x400] sm:$0xff] %vm1242_vm0, %v4698_v0 }
  0x6b   : > { %1372 = vst.msk [vmem:[#allocation2 + $0x418] sm:$0xff] %vm1242_vm0, %v4698_v0  ;;  %1373 = vst [vmem:[#allocation2 + $0x420] sm:$0xff] %v4698_v0 }
  0x6c   : > { %1374 = vst [vmem:[#allocation2 + $0x428] sm:$0xff] %v4698_v0  ;;  %1375 = vst.msk [vmem:[#allocation2 + $0x430] sm:$0xff] %vm1242_vm0, %v4698_v0  ;;  %4414 = vmatmul.mubr.msk.bf16.gmra.mrb[16].mxu0 %vm468_vm1, %v422_v7  ;;  %2162 = vrot.lane.b32.xlu0 %v2084_v58, %s4701_s16 }
  0x6d   : > { %1376 = vst [vmem:[#allocation2 + $0x438] sm:$0xff] %v4698_v0  ;;  %1377 = vst [vmem:[#allocation2 + $0x440] sm:$0xff] %v4698_v0  ;;  %4417 = vmatprep.mubr.msk.bf16.mxu0 %vm468_vm1, %v423_v11 }
  0x6e   : > { %1378 = vst.msk [vmem:[#allocation2 + $0x448] sm:$0xff] %vm1242_vm0, %v4698_v0  ;;  %1381 = vst.msk [vmem:[#allocation2 + $0x460] sm:$0xff] %vm1242_vm0, %v4698_v0 }
  0x6f   : > { %1382 = vst [vmem:[#allocation2 + $0x468] sm:$0xff] %v4698_v0  ;;  %1383 = vst [vmem:[#allocation2 + $0x470] sm:$0xff] %v4698_v0 }
  0x70   : > { %1384 = vst.msk [vmem:[#allocation2 + $0x478] sm:$0xff] %vm1242_vm0, %v4698_v0  ;;  %1385 = vst [vmem:[#allocation2 + $0x480] sm:$0xff] %v4698_v0 }
  0x71   : > { %1386 = vst [vmem:[#allocation2 + $0x488] sm:$0xff] %v4698_v0  ;;  %1387 = vst.msk [vmem:[#allocation2 + $0x490] sm:$0xff] %vm1242_vm0, %v4698_v0 }
  0x72   : > { %1390 = vst.msk [vmem:[#allocation2 + $0x4a8] sm:$0xff] %vm1242_vm0, %v4698_v0  ;;  %1392 = vst [vmem:[#allocation2 + $0x4b8] sm:$0xff] %v4698_v0 }
  0x73   : > { %1393 = vst.msk [vmem:[#allocation2 + $0x4c0] sm:$0xff] %vm1242_vm0, %v4698_v0  ;;  %1395 = vst [vmem:[#allocation2 + $0x4d0] sm:$0xff] %v4698_v0 }
  0x74   : > { %1396 = vst.msk [vmem:[#allocation2 + $0x4d8] sm:$0xff] %vm1242_vm0, %v4698_v0  ;;  %1399 = vst.msk [vmem:[#allocation2 + $0x4f0] sm:$0xff] %vm1242_vm0, %v4698_v0  ;;  %4418 = vmatmul.mubr.msk.bf16.gmra.mrb[20].mxu0 %vm468_vm1, %v424_v22 }
  0x75   : > { %1401 = vst [vmem:[#allocation2 + $0x500] sm:$0xff] %v4698_v0  ;;  %1402 = vst.msk [vmem:[#allocation2 + $0x508] sm:$0xff] %vm1242_vm0, %v4698_v0  ;;  %4421 = vmatprep.mubr.msk.bf16.mxu0 %vm468_vm1, %v425_v25 }
  0x7c   : > { %4422 = vmatmul.mubr.msk.bf16.gmra.mrb[24].mxu0 %vm468_vm1, %v426_v28 }
  0x7d   : > { %4425 = vmatprep.mubr.msk.bf16.mxu0 %vm468_vm1, %v427_v45 }
  0x84   : > { %4426 = vmatmul.mubr.msk.bf16.gmra.mrb[28].mxu0 %vm468_vm1, %v428_v47 }
 0x11f   : > { %v4399_v60 = vpop.f32.mrb[0].mxu0 }
 0x120   : > { %v560_v0 = vadd.f32 %v4399_v60, %v5244_v59  ;;  %v551_v61 = vpop.f32.mrb[1].mxu0 }
 0x121   : > { %v552_v62 = vadd.f32 %v5244_v59, %v551_v61  ;;  %v4400_v63 = vpop.f32.mrb[2].mxu0 }
 0x122   : > { %v563_v1 = vadd.f32 %v4400_v63, %v5244_v59  ;;  %v554_v2 = vpop.f32.mrb[3].mxu0  ;;  %v680_v4 = vmax.f32 %v560_v0, 0.0 }
 0x123   : > { %v555_v3 = vadd.f32 %v5244_v59, %v554_v2  ;;  %v678_v7 = vmax.f32 %v552_v62, 0.0 }
 0x124   : > { %v681_v5 = vmax.f32 %v563_v1, 0.0 }
 0x125   : > { %v679_v8 = vmax.f32 %v555_v3, 0.0 }
 0x126   : > { %v711_v10 = vpack.c.bf16 %v681_v5, %v680_v4 }
 0x127   : > { %v710_v11 = vpack.c.bf16 %v679_v8, %v678_v7  ;;  %v4403_v12 = vpop.f32.mrb[4].mxu0 }
 0x128   : > { %v576_v13 = vadd.f32 %v4403_v12, %v5244_v59  ;;  %v567_v14 = vpop.f32.mrb[5].mxu0 }
 0x129   : > { %919 = vmatmul.mubr.bf16.vlgmr.msra.gmra.mrb[0].mxu1 %v710_v11  ;;  %4445 = vmatprep.mubr.bf16.mxu0 %v710_v11  ;;  %v568_v15 = vadd.f32 %v5244_v59, %v567_v14  ;;  %v4404_v16 = vpop.f32.mrb[6].mxu0 }
 0x12a   : > { %4446 = vmatmul.mubr.bf16.vlgmr.msra.gmra.mrb[32].mxu0 %v711_v10  ;;  %928 = vmatprep.mubr.bf16.mxu1 %v4699_v51  ;;  %v684_v17 = vmax.f32 %v576_v13, 0.0  ;;  %v579_v18 = vadd.f32 %v4404_v16, %v5244_v59  ;;  %v570_v19 = vpop.f32.mrb[7].mxu0 }
 0x12b   : > { %v682_v20 = vmax.f32 %v568_v15, 0.0  ;;  %v571_v21 = vadd.f32 %v5244_v59, %v570_v19 }
 0x12c   : > { %v685_v22 = vmax.f32 %v579_v18, 0.0 }
 0x12d   : > { %v683_v23 = vmax.f32 %v571_v21, 0.0 }
 0x12e   : > { %v713_v24 = vpack.c.bf16 %v685_v22, %v684_v17 }
 0x12f   : > { %v712_v25 = vpack.c.bf16 %v683_v23, %v682_v20  ;;  %v4407_v26 = vpop.f32.mrb[8].mxu0 }
 0x130   : > { %v592_v27 = vadd.f32 %v4407_v26, %v5244_v59  ;;  %v583_v28 = vpop.f32.mrb[9].mxu0 }
 0x131   : > { %929 = vmatmul.mubr.bf16.gmra.mrb[4].mxu1 %v711_v10  ;;  %4449 = vmatprep.mubr.bf16.mxu0 %v712_v25  ;;  %v584_v29 = vadd.f32 %v5244_v59, %v583_v28  ;;  %v4408_v30 = vpop.f32.mrb[10].mxu0 }
 0x132   : > { %938 = vmatprep.mubr.bf16.mxu1 %v4699_v51  ;;  %4450 = vmatmul.mubr.bf16.gmra.mrb[36].mxu0 %v713_v24  ;;  %v688_v31 = vmax.f32 %v592_v27, 0.0  ;;  %v595_v32 = vadd.f32 %v4408_v30, %v5244_v59  ;;  %v586_v33 = vpop.f32.mrb[11].mxu0 }
 0x133   : > { %v686_v34 = vmax.f32 %v584_v29, 0.0  ;;  %v587_v35 = vadd.f32 %v5244_v59, %v586_v33 }
 0x134   : > { %v689_v36 = vmax.f32 %v595_v32, 0.0 }
 0x135   : > { %v687_v37 = vmax.f32 %v587_v35, 0.0 }
 0x136   : > { %v715_v38 = vpack.c.bf16 %v689_v36, %v688_v31 }
 0x137   : > { %v714_v39 = vpack.c.bf16 %v687_v37, %v686_v34  ;;  %v4411_v40 = vpop.f32.mrb[12].mxu0 }
 0x138   : > { %v608_v41 = vadd.f32 %v4411_v40, %v5244_v59  ;;  %v599_v42 = vpop.f32.mrb[13].mxu0 }
 0x139   : > { %939 = vmatmul.mubr.bf16.gmra.mrb[8].mxu1 %v712_v25  ;;  %4453 = vmatprep.mubr.bf16.mxu0 %v714_v39  ;;  %v600_v43 = vadd.f32 %v5244_v59, %v599_v42  ;;  %v4412_v44 = vpop.f32.mrb[14].mxu0 }
 0x13a   : > { %948 = vmatprep.mubr.bf16.mxu1 %v4699_v51  ;;  %4454 = vmatmul.mubr.bf16.gmra.mrb[40].mxu0 %v715_v38  ;;  %v692_v45 = vmax.f32 %v608_v41, 0.0  ;;  %v611_v46 = vadd.f32 %v4412_v44, %v5244_v59  ;;  %v602_v47 = vpop.f32.mrb[15].mxu0  ;;  %v4568_v41 = vld [vmem:[#allocation2 + $0x8] sm:$0xff] }
 0x13b   : > { %v690_v6 = vmax.f32 %v600_v43, 0.0  ;;  %v603_v48 = vadd.f32 %v5244_v59, %v602_v47  ;;  %v2354_v42 = vrot.slane %v4568_v41, 2 }
 0x13c   : > { %v693_v9 = vmax.f32 %v611_v46, 0.0 }
 0x13d   : > { %v691_v49 = vmax.f32 %v603_v48, 0.0 }
 0x13e   : > { %v717_v50 = vpack.c.bf16 %v693_v9, %v692_v45 }
 0x13f   : > { %v716_v52 = vpack.c.bf16 %v691_v49, %v690_v6  ;;  %v4415_v54 = vpop.f32.mrb[16].mxu0  ;;  %v3489_v49 = vld [vmem:[#allocation2 + $0x500] sm:$0x1] }
 0x140   : > { %v624_v55 = vadd.f32 %v4415_v54, %v5244_v59  ;;  %v615_v56 = vpop.f32.mrb[17].mxu0  ;;  %v3600_v54 = vrot.slane %v3489_v49, 1 }
 0x141   : > { %949 = vmatmul.mubr.bf16.gmra.mrb[12].mxu1 %v713_v24  ;;  %4457 = vmatprep.mubr.bf16.mxu0 %v716_v52  ;;  %v616_v57 = vadd.f32 %v5244_v59, %v615_v56  ;;  %v4416_v58 = vpop.f32.mrb[18].mxu0 }
 0x142   : > { %958 = vmatprep.mubr.bf16.mxu1 %v4699_v51  ;;  %4458 = vmatmul.mubr.bf16.gmra.mrb[44].mxu0 %v717_v50  ;;  %v696_v60 = vmax.f32 %v624_v55, 0.0  ;;  %v627_v0 = vadd.f32 %v4416_v58, %v5244_v59  ;;  %v618_v61 = vpop.f32.mrb[19].mxu0  ;;  %v3601_v58 = vsel %vm2079_vm2, %v5229_v53, %v3600_v54 }
 0x143   : > { %v694_v62 = vmax.f32 %v616_v57, 0.0  ;;  %v619_v63 = vadd.f32 %v5244_v59, %v618_v61 }
 0x144   : > { %v697_v1 = vmax.f32 %v627_v0, 0.0 }
 0x145   : > { %v695_v2 = vmax.f32 %v619_v63, 0.0 }
 0x146   : > { %v719_v3 = vpack.c.bf16 %v697_v1, %v696_v60  ;;  %v3488_v60 = vld [vmem:[#allocation2 + $0x4d0] sm:$0xfe] }
 0x147   : > { %v718_v4 = vpack.c.bf16 %v695_v2, %v694_v62  ;;  %v4419_v5 = vpop.f32.mrb[20].mxu0  ;;  %v3597_v0 = vrot.slane %v3488_v60, 1 }
 0x148   : > { %v640_v7 = vadd.f32 %v4419_v5, %v5244_v59  ;;  %v631_v8 = vpop.f32.mrb[21].mxu0 }
 0x149   : > { %959 = vmatmul.mubr.bf16.gmra.mrb[16].mxu1 %v714_v39  ;;  %4461 = vmatprep.mubr.bf16.mxu0 %v718_v4  ;;  %v632_v10 = vadd.f32 %v5244_v59, %v631_v8  ;;  %v4420_v11 = vpop.f32.mrb[22].mxu0  ;;  %v3599_v61 = vsel %vm2079_vm2, %v3597_v0, %v5229_v53 }
 0x14a   : > { %968 = vmatprep.mubr.bf16.mxu1 %v4699_v51  ;;  %4462 = vmatmul.mubr.bf16.gmra.mrb[48].mxu0 %v719_v3  ;;  %v700_v12 = vmax.f32 %v640_v7, 0.0  ;;  %v643_v13 = vadd.f32 %v4420_v11, %v5244_v59  ;;  %v634_v14 = vpop.f32.mrb[23].mxu0 }
 0x14b   : > { %v698_v15 = vmax.f32 %v632_v10, 0.0  ;;  %v635_v16 = vadd.f32 %v5244_v59, %v634_v14 }
 0x14c   : > { %v701_v17 = vmax.f32 %v643_v13, 0.0 }
 0x14d   : > { %v699_v18 = vmax.f32 %v635_v16, 0.0 }
 0x14e   : > { %v5275_v19 = vpack.c.bf16 %v701_v17, %v700_v12 }
 0x14f   : > { %v720_v20 = vpack.c.bf16 %v699_v18, %v698_v15  ;;  %v4423_v21 = vpop.f32.mrb[24].mxu0 }
 0x150   : > { %v656_v22 = vadd.f32 %v4423_v21, %v5244_v59  ;;  %v647_v23 = vpop.f32.mrb[25].mxu0 }
 0x151   : > { %969 = vmatmul.mubr.bf16.gmra.mrb[20].mxu1 %v715_v38  ;;  %v648_v24 = vadd.f32 %v5244_v59, %v647_v23  ;;  %v4424_v25 = vpop.f32.mrb[26].mxu0  ;;  %4465 = vmatprep.mubr.bf16.mxu0 %v720_v20  ;;  %v2289_v38 = vld [vmem:[#allocation2 + $0x30] sm:$0x3] }
 0x152   : > { %978 = vmatprep.mubr.bf16.mxu1 %v4699_v51  ;;  %v704_v26 = vmax.f32 %v656_v22, 0.0  ;;  %v659_v27 = vadd.f32 %v4424_v25, %v5244_v59  ;;  %v650_v28 = vpop.f32.mrb[27].mxu0  ;;  %4466 = vmatmul.mubr.bf16.gmra.mrb[52].mxu0 %v5275_v19  ;;  %v2356_v43 = vrot.slane %v2289_v38, 2 }
 0x153   : > { %v702_v29 = vmax.f32 %v648_v24, 0.0  ;;  %v651_v30 = vadd.f32 %v5244_v59, %v650_v28 }
 0x154   : > { %v705_v31 = vmax.f32 %v659_v27, 0.0  ;;  %v2357_v48 = vsel %vm2352_vm3, %v2354_v42, %v2356_v43 }
 0x155   : > { %v703_v32 = vmax.f32 %v651_v30, 0.0  ;;  %2435 = vrot.lane.b32.xlu1 %v2357_v48, %s4700_s8 }
 0x156   : > { %v723_v33 = vpack.c.bf16 %v705_v31, %v704_v26 }
 0x157   : > { %v722_v34 = vpack.c.bf16 %v703_v32, %v702_v29  ;;  %v4427_v35 = vpop.f32.mrb[28].mxu0 }
 0x158   : > { %v672_v36 = vadd.f32 %v4427_v35, %v5244_v59  ;;  %v663_v37 = vpop.f32.mrb[29].mxu0 }
 0x159   : > { %979 = vmatmul.mubr.bf16.gmra.mrb[24].mxu1 %v716_v52  ;;  %4469 = vmatprep.mubr.bf16.mxu0 %v722_v34  ;;  %v664_v39 = vadd.f32 %v5244_v59, %v663_v37  ;;  %v4428_v40 = vpop.f32.mrb[30].mxu0  ;;  %v2288_v52 = vld [vmem:[#allocation2] sm:$0xfc] }
 0x15a   : > { %988 = vmatprep.mubr.bf16.mxu1 %v4699_v51  ;;  %4470 = vmatmul.mubr.bf16.gmra.mrb[56].mxu0 %v723_v33  ;;  %v708_v44 = vmax.f32 %v672_v36, 0.0  ;;  %v675_v45 = vadd.f32 %v4428_v40, %v5244_v59  ;;  %v666_v46 = vpop.f32.mrb[31].mxu0  ;;  %v2353_v56 = vrot.slane %v2288_v52, 2 }
 0x15b   : > { %v706_v47 = vmax.f32 %v664_v39, 0.0  ;;  %v667_v6 = vadd.f32 %v5244_v59, %v666_v46  ;;  %3664 = vrot.lane.b32.xlu1 %v3601_v58, %s4702_s20 }
 0x15c   : > { %v709_v9 = vmax.f32 %v675_v45, 0.0  ;;  %v2355_v59 = vsel %vm2352_vm3, %v2353_v56, %v2354_v42 }
 0x15d   : > { %2433 = vrot.lane.b32.xlu0 %v2355_v59, %s4700_s8 }
 0x15e   : > { %v725_v55 = vpack.c.bf16 %v709_v9, %v708_v44 }
 0x161   : > { %989 = vmatmul.mubr.bf16.gmra.mrb[28].mxu1 %v717_v50  ;;  %v707_v50 = vmax.f32 %v667_v6, 0.0  ;;  %3662 = vrot.lane.b32.xlu0 %v3599_v61, %s4702_s20 }
 0x162   : > { %998 = vmatprep.mubr.bf16.mxu1 %v4699_v51 }
 0x163   : > { %v724_v57 = vpack.c.bf16 %v707_v50, %v706_v47 }
 0x165   : > { %4473 = vmatprep.mubr.bf16.mxu0 %v724_v57 }
 0x166   : > { %4474 = vmatmul.mubr.bf16.gmra.mrb[60].mxu0 %v725_v55 }
 0x169   : > { %999 = vmatmul.mubr.bf16.gmra.mrb[32].mxu1 %v718_v4 }
 0x16a   : > { %1008 = vmatprep.mubr.bf16.mxu1 %v4699_v51 }
 0x171   : > { %1009 = vmatmul.mubr.bf16.gmra.mrb[36].mxu1 %v719_v3 }
 0x172   : > { %1018 = vmatprep.mubr.bf16.mxu1 %v4699_v51 }
 0x179   : > { %1019 = vmatmul.mubr.bf16.gmra.mrb[40].mxu1 %v720_v20 }
 0x17a   : > { %1028 = vmatprep.mubr.bf16.mxu1 %v4699_v51 }
 0x181   : > { %1029 = vmatmul.mubr.bf16.gmra.mrb[44].mxu1 %v5275_v19 }
 0x182   : > { %1038 = vmatprep.mubr.bf16.mxu1 %v4699_v51 }
 0x189   : > { %1039 = vmatmul.mubr.bf16.gmra.mrb[48].mxu1 %v722_v34 }
 0x18a   : > { %1048 = vmatprep.mubr.bf16.mxu1 %v4699_v51 }
 0x191   : > { %1049 = vmatmul.mubr.bf16.gmra.mrb[52].mxu1 %v723_v33 }
 0x192   : > { %1058 = vmatprep.mubr.bf16.mxu1 %v4699_v51 }
 0x199   : > { %1059 = vmatmul.mubr.bf16.gmra.mrb[56].mxu1 %v724_v57 }
 0x19a   : > { %1068 = vmatprep.mubr.bf16.mxu1 %v4699_v51 }
 0x1a1   : > { %1069 = vmatmul.mubr.bf16.gmra.mrb[60].mxu1 %v725_v55 }
 0x1fc   : > { %v920_v62 = vpop.f32.mrb[0].mxu1 }
 0x1fd   : > { %v1500_v63 = vrot.slane %v920_v62, 7  ;;  %v922_v1 = vpop.f32.mrb[1].mxu1  ;;  %v4447_v2 = vpop.f32.mrb[32].mxu0 }
 0x1fe   : > { %v1501_v53 = vrot.slane %v922_v1, 7  ;;  %v1511_v3 = vrot.slane %v4447_v2, 7  ;;  %v924_v4 = vpop.f32.mrb[2].mxu1  ;;  %v1113_v5 = vpop.f32.mrb[33].mxu0 }
 0x1ff   : > { %1789 = vst [vmem:[#allocation2 + $0x48] sm:$0xfe] %v1500_v63  ;;  %v1503_v7 = vrot.slane %v924_v4, 7  ;;  %v926_v8 = vpop.f32.mrb[3].mxu1  ;;  %v4448_v10 = vpop.f32.mrb[34].mxu0 }
 0x200   : > { %1790 = vst [vmem:[#allocation2 + $0x50] sm:$0xfe] %v1501_v53  ;;  %1802 = vst.msk [vmem:[#allocation2 + $0xa0] sm:$0xfe] %vm1791_vm4, %v1511_v3  ;;  %v1505_v51 = vrot.slane %v926_v8, 7  ;;  %v1516_v11 = vrot.slane %v4448_v10, 7 }
 0x201   : > { %v1116_v12 = vpop.f32.mrb[35].mxu0  ;;  %v5309_v13 = vsel %vm1499_vm5, %v1500_v63, %v1503_v7  ;;  %1796 = vst [vmem:[#allocation2 + $0x78] sm:$0x1] %v1503_v7 }
 0x202   : > { %1793 = vst [vmem:[#allocation2 + $0x60] sm:$0xff] %v5309_v13  ;;  %v5313_v14 = vsel %vm1499_vm5, %v1501_v53, %v1505_v51  ;;  %1797 = vst [vmem:[#allocation2 + $0x80] sm:$0x1] %v1505_v51  ;;  %v1517_v15 = vsel %vm1499_vm5, %v1511_v3, %v1516_v11  ;;  %2627 = vrot.lane.b32.xlu1 %v5309_v13, %s4702_s20  ;;  %v2359_v19 = vrot.slane %v5309_v13, 2  ;;  %v2086_v20 = vrot.slane %v5309_v13, 1 }
 0x203   : > { %1808 = vst.msk [vmem:[#allocation2 + $0xd0] sm:$0x1] %vm1798_vm6, %v1516_v11  ;;  %1794 = vst [vmem:[#allocation2 + $0x68] sm:$0xff] %v5313_v14  ;;  %v3058_v45 = vrot.slane %v5313_v14, 2 }
 0x204   : > { %1805 = vst.msk [vmem:[#allocation2 + $0xb8] sm:$0xff] %vm1242_vm0, %v1517_v15  ;;  %v930_v16 = vpop.f32.mrb[4].mxu1 }
 0x205   : > { %v1509_v17 = vrot.slane %v930_v16, 7  ;;  %v932_v18 = vpop.f32.mrb[5].mxu1  ;;  %v4451_v21 = vpop.f32.mrb[36].mxu0 }
 0x206   : > { %v1510_v22 = vrot.slane %v932_v18, 7  ;;  %v934_v23 = vpop.f32.mrb[6].mxu1  ;;  %v2561_v24 = vld [vmem:[#allocation2 + $0x48] sm:$0xff]  ;;  %v1529_v26 = vrot.slane %v4451_v21, 7  ;;  %v1129_v31 = vpop.f32.mrb[37].mxu0 }
 0x207   : > { %v2290_v25 = vld [vmem:[#allocation2 + $0x48] sm:$0xfc]  ;;  %1800 = vst [vmem:[#allocation2 + $0x90] sm:$0xfe] %v1509_v17  ;;  %v1512_v27 = vrot.slane %v934_v23, 7  ;;  %2625 = vrot.lane.b32.xlu0 %v2561_v24, %s4702_s20  ;;  %v936_v28 = vpop.f32.mrb[7].mxu1 }
 0x208   : > { %v2358_v29 = vrot.slane %v2290_v25, 2  ;;  %v2001_v30 = vld [vmem:[#allocation2 + $0x48] sm:$0xfe]  ;;  %1801 = vst [vmem:[#allocation2 + $0x98] sm:$0xfe] %v1510_v22  ;;  %v1514_v32 = vrot.slane %v936_v28, 7 }
 0x209   : > { %v2085_v33 = vrot.slane %v2001_v30, 1  ;;  %v2993_v34 = vld [vmem:[#allocation2 + $0x50] sm:$0xfc]  ;;  %v2002_v35 = vld [vmem:[#allocation2 + $0x78] sm:$0x1]  ;;  %v5326_v36 = vsel %vm1499_vm5, %v1509_v17, %v1512_v27  ;;  %v4452_v43 = vpop.f32.mrb[38].mxu0 }
 0x20a   : > { %1820 = vst.msk [vmem:[#allocation2 + $0x130] sm:$0xfe] %vm1791_vm4, %v1529_v26  ;;  %1806 = vst [vmem:[#allocation2 + $0xc0] sm:$0x1] %v1512_v27  ;;  %v2360_v37 = vsel %vm2352_vm3, %v2358_v29, %v2359_v19  ;;  %v5333_v38 = vsel %vm1499_vm5, %v1510_v22, %v1514_v32  ;;  %v3057_v40 = vrot.slane %v2993_v34, 2  ;;  %v2088_v41 = vrot.slane %v2002_v35, 1 }
 0x20b   : > { %1803 = vst [vmem:[#allocation2 + $0xa8] sm:$0xff] %v5326_v36  ;;  %1807 = vst [vmem:[#allocation2 + $0xc8] sm:$0x1] %v1514_v32  ;;  %v2087_v39 = vsel %vm2079_vm2, %v2085_v33, %v2086_v20  ;;  %v2291_v42 = vld [vmem:[#allocation2 + $0x78] sm:$0x3]  ;;  %2437 = vrot.lane.b32.xlu0 %v2360_v37, %s4700_s8  ;;  %v1132_v44 = vpop.f32.mrb[39].mxu0 }
 0x20c   : > { %2164 = vrot.lane.b32.xlu1 %v2087_v39, %s4701_s16  ;;  %v940_v46 = vpop.f32.mrb[8].mxu1  ;;  %v1520_v47 = vrot.slane %v1129_v31, 7  ;;  %v2361_v6 = vrot.slane %v2291_v42, 2  ;;  %v1534_v49 = vrot.slane %v4452_v43, 7  ;;  %v1525_v50 = vrot.slane %v1132_v44, 7 }
 0x20d   : > { %v1518_v48 = vrot.slane %v940_v46, 7  ;;  %v942_v9 = vpop.f32.mrb[9].mxu1  ;;  %v5339_v52 = vpop.f32.mrb[40].mxu0  ;;  %v3059_v54 = vsel %vm2352_vm3, %v3057_v40, %v3058_v45  ;;  %v2089_v55 = vsel %vm2079_vm2, %v2086_v20, %v2088_v41  ;;  %v2994_v59 = vld [vmem:[#allocation2 + $0x80] sm:$0x3]  ;;  %v2091_v21 = vrot.slane %v5326_v36, 1 }
 0x20e   : > { %v1519_v56 = vrot.slane %v942_v9, 7  ;;  %v944_v57 = vpop.f32.mrb[10].mxu1  ;;  %1811 = vst.msk [vmem:[#allocation2 + $0xe8] sm:$0xfe] %vm1791_vm4, %v1520_v47  ;;  %v1547_v58 = vrot.slane %v5339_v52, 7  ;;  %v1535_v61 = vsel %vm1499_vm5, %v1529_v26, %v1534_v49  ;;  %v1526_v62 = vsel %vm1499_vm5, %v1520_v47, %v1525_v50  ;;  %v2563_v2 = vld [vmem:[#allocation2 + $0x90] sm:$0xff] }
 0x20f   : > { %3137 = vrot.lane.b32.xlu0 %v3059_v54, %s4701_s16  ;;  %1809 = vst [vmem:[#allocation2 + $0xd8] sm:$0xfe] %v1518_v48  ;;  %v1521_v60 = vrot.slane %v944_v57, 7  ;;  %v946_v0 = vpop.f32.mrb[11].mxu1  ;;  %1826 = vst.msk [vmem:[#allocation2 + $0x160] sm:$0x1] %vm1798_vm6, %v1534_v49  ;;  %v2362_v53 = vsel %vm2352_vm3, %v2359_v19, %v2361_v6 }
 0x210   : > { %2166 = vrot.lane.b32.xlu1 %v2089_v55, %s4701_s16  ;;  %1817 = vst.msk [vmem:[#allocation2 + $0x118] sm:$0x1] %vm1798_vm6, %v1525_v50  ;;  %1810 = vst [vmem:[#allocation2 + $0xe0] sm:$0xfe] %v1519_v56  ;;  %v1523_v63 = vrot.slane %v946_v0, 7  ;;  %v3060_v3 = vrot.slane %v2994_v59, 2 }
 0x211   : > { %1823 = vst.msk [vmem:[#allocation2 + $0x148] sm:$0xff] %vm1242_vm0, %v1535_v61  ;;  %1814 = vst.msk [vmem:[#allocation2 + $0x100] sm:$0xff] %vm1242_vm0, %v1526_v62  ;;  %v5357_v1 = vsel %vm1499_vm5, %v1518_v48, %v1521_v60  ;;  %v2003_v5 = vld [vmem:[#allocation2 + $0x90] sm:$0xfe]  ;;  %v5368_v7 = vpop.f32.mrb[41].mxu0  ;;  %v3266_v13 = vld [vmem:[#allocation2 + $0x98] sm:$0xff] }
 0x212   : > { %1838 = vst.msk [vmem:[#allocation2 + $0x1c0] sm:$0xfe] %vm1791_vm4, %v1547_v58  ;;  %1815 = vst [vmem:[#allocation2 + $0x108] sm:$0x1] %v1521_v60  ;;  %v5364_v4 = vsel %vm1499_vm5, %v1519_v56, %v1523_v63  ;;  %v5370_v10 = vpop.f32.mrb[42].mxu0  ;;  %v3061_v14 = vsel %vm2352_vm3, %v3058_v45, %v3060_v3  ;;  %v2090_v15 = vrot.slane %v2003_v5, 1 }
 0x213   : > { %1812 = vst [vmem:[#allocation2 + $0xf0] sm:$0xff] %v5357_v1  ;;  %1816 = vst [vmem:[#allocation2 + $0x110] sm:$0x1] %v1523_v63  ;;  %2629 = vrot.lane.b32.xlu0 %v2563_v2, %s4702_s20  ;;  %v5372_v12 = vpop.f32.mrb[43].mxu0  ;;  %v2292_v18 = vld [vmem:[#allocation2 + $0x90] sm:$0xfc] }
 0x214   : > { %2439 = vrot.lane.b32.xlu1 %v2362_v53, %s4700_s8  ;;  %v950_v8 = vpop.f32.mrb[12].mxu1  ;;  %v2092_v24 = vsel %vm2079_vm2, %v2090_v15, %v2091_v21  ;;  %v2363_v25 = vrot.slane %v2292_v18, 2  ;;  %v2995_v27 = vld [vmem:[#allocation2 + $0x98] sm:$0xfc]  ;;  %v2004_v28 = vld [vmem:[#allocation2 + $0xc0] sm:$0x1] }
 0x215   : > { %v1527_v51 = vrot.slane %v950_v8, 7  ;;  %v952_v11 = vpop.f32.mrb[13].mxu1  ;;  %v5389_v29 = vpop.f32.mrb[44].mxu0  ;;  %v2364_v30 = vrot.slane %v5326_v36, 2  ;;  %v3062_v33 = vrot.slane %v2995_v27, 2  ;;  %v2093_v34 = vrot.slane %v2004_v28, 1 }
 0x216   : > { %v1528_v16 = vrot.slane %v952_v11, 7  ;;  %v954_v17 = vpop.f32.mrb[14].mxu1  ;;  %v5392_v32 = vpop.f32.mrb[45].mxu0  ;;  %v1538_v39 = vrot.slane %v5368_v7, 7  ;;  %v3458_v42 = vld [vmem:[#allocation2 + $0x98] sm:$0xfe] }
 0x217   : > { %3330 = vrot.lane.b32.xlu0 %v3266_v13, %s4700_s8  ;;  %1818 = vst [vmem:[#allocation2 + $0x120] sm:$0xfe] %v1527_v51  ;;  %v1530_v19 = vrot.slane %v954_v17, 7  ;;  %v956_v20 = vpop.f32.mrb[15].mxu1  ;;  %v5395_v40 = vpop.f32.mrb[46].mxu0  ;;  %v2365_v41 = vsel %vm2352_vm3, %v2363_v25, %v2364_v30  ;;  %v1552_v48 = vrot.slane %v5370_v10, 7  ;;  %v2094_v56 = vsel %vm2079_vm2, %v2091_v21, %v2093_v34 }
 0x218   : > { %3139 = vrot.lane.b32.xlu1 %v3061_v14, %s4701_s16  ;;  %1819 = vst [vmem:[#allocation2 + $0x128] sm:$0xfe] %v1528_v16  ;;  %v1532_v22 = vrot.slane %v956_v20, 7  ;;  %v2293_v43 = vld [vmem:[#allocation2 + $0xc0] sm:$0x3]  ;;  %v1543_v9 = vrot.slane %v5372_v12, 7 }
 0x219   : > { %v5379_v23 = vsel %vm1499_vm5, %v1527_v51, %v1530_v19  ;;  %1824 = vst [vmem:[#allocation2 + $0x150] sm:$0x1] %v1530_v19  ;;  %1829 = vst.msk [vmem:[#allocation2 + $0x178] sm:$0xfe] %vm1791_vm4, %v1538_v39  ;;  %v3522_v50 = vrot.slane %v3458_v42, 1  ;;  %v2366_v54 = vrot.slane %v2293_v43, 2  ;;  %v1553_v59 = vsel %vm1499_vm5, %v1547_v58, %v1552_v48 }
 0x21a   : > { %1821 = vst [vmem:[#allocation2 + $0x138] sm:$0xff] %v5379_v23  ;;  %v5384_v26 = vsel %vm1499_vm5, %v1528_v16, %v1532_v22  ;;  %1825 = vst [vmem:[#allocation2 + $0x158] sm:$0x1] %v1532_v22  ;;  %v1544_v60 = vsel %vm1499_vm5, %v1538_v39, %v1543_v9  ;;  %v2996_v0 = vld [vmem:[#allocation2 + $0xc8] sm:$0x3]  ;;  %v5424_v61 = vpop.f32.mrb[47].mxu0 }
 0x21b   : > { %2168 = vrot.lane.b32.xlu0 %v2092_v24, %s4701_s16  ;;  %1844 = vst.msk [vmem:[#allocation2 + $0x1f0] sm:$0x1] %vm1798_vm6, %v1552_v48  ;;  %1835 = vst.msk [vmem:[#allocation2 + $0x1a8] sm:$0x1] %vm1798_vm6, %v1543_v9  ;;  %v5427_v52 = vrot.slane %v5333_v38, 1  ;;  %v2367_v53 = vsel %vm2352_vm3, %v2364_v30, %v2366_v54  ;;  %v3065_v3 = vrot.slane %v2996_v0, 2 }
 0x21c   : > { %2631 = vrot.lane.b32.xlu1 %v5326_v36, %s4702_s20  ;;  %v960_v31 = vpop.f32.mrb[16].mxu1  ;;  %v3063_v36 = vrot.slane %v5333_v38, 2  ;;  %1841 = vst.msk [vmem:[#allocation2 + $0x1d8] sm:$0xff] %vm1242_vm0, %v1553_v59  ;;  %1832 = vst.msk [vmem:[#allocation2 + $0x190] sm:$0xff] %vm1242_vm0, %v1544_v60  ;;  %v3459_v8 = vld [vmem:[#allocation2 + $0xc8] sm:$0x1] }
 0x21d   : > { %v1536_v35 = vrot.slane %v960_v31, 7  ;;  %v962_v37 = vpop.f32.mrb[17].mxu1  ;;  %v3524_v2 = vsel %vm2079_vm2, %v3522_v50, %v5427_v52  ;;  %v2565_v51 = vld [vmem:[#allocation2 + $0xd8] sm:$0xff]  ;;  %v1565_v12 = vrot.slane %v5389_v29, 7  ;;  %v1556_v14 = vrot.slane %v5392_v32, 7  ;;  %v3268_v19 = vld [vmem:[#allocation2 + $0xe0] sm:$0xff] }
 0x21e   : > { %v1537_v44 = vrot.slane %v962_v37, 7  ;;  %v964_v45 = vpop.f32.mrb[18].mxu1  ;;  %v3064_v49 = vsel %vm2352_vm3, %v3062_v33, %v3063_v36  ;;  %v3066_v15 = vsel %vm2352_vm3, %v3063_v36, %v3065_v3  ;;  %v3525_v16 = vrot.slane %v3459_v8, 1  ;;  %v2005_v18 = vld [vmem:[#allocation2 + $0xd8] sm:$0xfe]  ;;  %v5456_v37 = vpop.f32.mrb[48].mxu0 }
 0x21f   : > { %2441 = vrot.lane.b32.xlu0 %v2365_v41, %s4700_s8  ;;  %1827 = vst [vmem:[#allocation2 + $0x168] sm:$0xfe] %v1536_v35  ;;  %v1539_v46 = vrot.slane %v964_v45, 7  ;;  %v966_v47 = vpop.f32.mrb[19].mxu1  ;;  %1856 = vst.msk [vmem:[#allocation2 + $0x250] sm:$0xfe] %vm1791_vm4, %v1565_v12 }
 0x220   : > { %3332 = vrot.lane.b32.xlu1 %v5333_v38, %s4700_s8  ;;  %1828 = vst [vmem:[#allocation2 + $0x170] sm:$0xfe] %v1537_v44  ;;  %v1541_v6 = vrot.slane %v966_v47, 7  ;;  %1847 = vst.msk [vmem:[#allocation2 + $0x208] sm:$0xfe] %vm1791_vm4, %v1556_v14  ;;  %v2096_v21 = vrot.slane %v5357_v1, 1  ;;  %v3526_v25 = vsel %vm2079_vm2, %v5427_v52, %v3525_v16 }
 0x221   : > { %v5407_v55 = vsel %vm1499_vm5, %v1536_v35, %v1539_v46  ;;  %1833 = vst [vmem:[#allocation2 + $0x198] sm:$0x1] %v1539_v46  ;;  %v2095_v27 = vrot.slane %v2005_v18, 1  ;;  %v1570_v30 = vrot.slane %v5395_v40, 7  ;;  %v2294_v31 = vld [vmem:[#allocation2 + $0xd8] sm:$0xfc] }
 0x222   : > { %1830 = vst [vmem:[#allocation2 + $0x180] sm:$0xff] %v5407_v55  ;;  %v5412_v57 = vsel %vm1499_vm5, %v1537_v44, %v1541_v6  ;;  %1834 = vst [vmem:[#allocation2 + $0x1a0] sm:$0x1] %v1541_v6  ;;  %v1561_v40 = vrot.slane %v5424_v61, 7  ;;  %v2368_v42 = vrot.slane %v2294_v31, 2  ;;  %v2369_v43 = vrot.slane %v5357_v1, 2 }
 0x223   : > { %3141 = vrot.lane.b32.xlu0 %v3064_v49, %s4701_s16  ;;  %v1571_v35 = vsel %vm1499_vm5, %v1565_v12, %v1570_v30  ;;  %1862 = vst.msk [vmem:[#allocation2 + $0x280] sm:$0x1] %vm1798_vm6, %v1570_v30  ;;  %v2097_v41 = vsel %vm2079_vm2, %v2095_v27, %v2096_v21  ;;  %v5471_v45 = vpop.f32.mrb[49].mxu0  ;;  %v2997_v36 = vld [vmem:[#allocation2 + $0xe0] sm:$0xfc]  ;;  %v3068_v49 = vrot.slane %v5364_v4, 2 }
 0x224   : > { %2170 = vrot.lane.b32.xlu1 %v2094_v56, %s4701_s16  ;;  %v970_v58 = vpop.f32.mrb[20].mxu1  ;;  %1859 = vst.msk [vmem:[#allocation2 + $0x268] sm:$0xff] %vm1242_vm0, %v1571_v35  ;;  %v2006_v46 = vld [vmem:[#allocation2 + $0x108] sm:$0x1]  ;;  %v1562_v47 = vsel %vm1499_vm5, %v1556_v14, %v1561_v40  ;;  %v5478_v6 = vpop.f32.mrb[50].mxu0  ;;  %v2370_v56 = vsel %vm2352_vm3, %v2368_v42, %v2369_v43  ;;  %v3067_v59 = vrot.slane %v2997_v36, 2 }
 0x225   : > { %v1545_v62 = vrot.slane %v970_v58, 7  ;;  %v972_v63 = vpop.f32.mrb[21].mxu1  ;;  %1853 = vst.msk [vmem:[#allocation2 + $0x238] sm:$0x1] %vm1798_vm6, %v1561_v40  ;;  %v5481_v9 = vpop.f32.mrb[51].mxu0  ;;  %v2098_v60 = vrot.slane %v2006_v46, 1 }
 0x226   : > { %v1546_v5 = vrot.slane %v972_v63, 7  ;;  %v974_v7 = vpop.f32.mrb[22].mxu1  ;;  %1850 = vst.msk [vmem:[#allocation2 + $0x220] sm:$0xff] %vm1242_vm0, %v1562_v47  ;;  %v3460_v0 = vld [vmem:[#allocation2 + $0xe0] sm:$0xfe]  ;;  %v5489_v3 = vrot.slane %v5364_v4, 1  ;;  %v3069_v8 = vsel %vm2352_vm3, %v3067_v59, %v3068_v49 }
 0x227   : > { %3602 = vrot.lane.b32.xlu0 %v3524_v2, %s4702_s20  ;;  %1836 = vst [vmem:[#allocation2 + $0x1b0] sm:$0xfe] %v1545_v62  ;;  %v1548_v10 = vrot.slane %v974_v7, 7  ;;  %v976_v38 = vpop.f32.mrb[23].mxu1  ;;  %v3461_v16 = vld [vmem:[#allocation2 + $0x110] sm:$0x1] }
 0x228   : > { %2443 = vrot.lane.b32.xlu1 %v2367_v53, %s4700_s8  ;;  %1837 = vst [vmem:[#allocation2 + $0x1b8] sm:$0xfe] %v1546_v5  ;;  %v1550_v11 = vrot.slane %v976_v38, 7  ;;  %v2567_v27 = vld [vmem:[#allocation2 + $0x120] sm:$0xff]  ;;  %v1574_v31 = vrot.slane %v5471_v45, 7  ;;  %v2101_v40 = vrot.slane %v5379_v23, 1 }
 0x229   : > { %v5436_v13 = vsel %vm1499_vm5, %v1545_v62, %v1548_v10  ;;  %1842 = vst [vmem:[#allocation2 + $0x1e0] sm:$0x1] %v1548_v10  ;;  %v2295_v62 = vld [vmem:[#allocation2 + $0x108] sm:$0x3]  ;;  %v2099_v10 = vsel %vm2079_vm2, %v2096_v21, %v2098_v60 }
 0x22a   : > { %1839 = vst [vmem:[#allocation2 + $0x1c8] sm:$0xff] %v5436_v13  ;;  %v5442_v17 = vsel %vm1499_vm5, %v1546_v5, %v1550_v11  ;;  %1843 = vst [vmem:[#allocation2 + $0x1e8] sm:$0x1] %v1550_v11  ;;  %v3527_v5 = vrot.slane %v3460_v0, 1  ;;  %v2371_v38 = vrot.slane %v2295_v62, 2  ;;  %v3270_v45 = vld [vmem:[#allocation2 + $0x128] sm:$0xff] }
 0x22b   : > { %2633 = vrot.lane.b32.xlu0 %v2565_v51, %s4702_s20  ;;  %1865 = vst.msk [vmem:[#allocation2 + $0x298] sm:$0xfe] %vm1791_vm4, %v1574_v31  ;;  %v2374_v0 = vrot.slane %v5379_v23, 2  ;;  %v2008_v62 = vld [vmem:[#allocation2 + $0x150] sm:$0x1] }
 0x22c   : > { %3143 = vrot.lane.b32.xlu1 %v3066_v15, %s4701_s16  ;;  %v980_v20 = vpop.f32.mrb[24].mxu1  ;;  %v3529_v12 = vsel %vm2079_vm2, %v3527_v5, %v5489_v3  ;;  %v2103_v5 = vrot.slane %v2008_v62, 1 }
 0x22d   : > { %v1554_v22 = vrot.slane %v980_v20, 7  ;;  %v982_v24 = vpop.f32.mrb[25].mxu1 }
 0x22e   : > { %v1555_v28 = vrot.slane %v982_v24, 7  ;;  %v984_v29 = vpop.f32.mrb[26].mxu1  ;;  %v1583_v24 = vrot.slane %v5456_v37, 7  ;;  %v1579_v37 = vrot.slane %v5481_v9, 7  ;;  %v2296_v9 = vld [vmem:[#allocation2 + $0x120] sm:$0xfc] }
 0x22f   : > { %3334 = vrot.lane.b32.xlu0 %v3268_v19, %s4700_s8  ;;  %1845 = vst [vmem:[#allocation2 + $0x1f8] sm:$0xfe] %v1554_v22  ;;  %v1557_v32 = vrot.slane %v984_v29, 7  ;;  %v986_v33 = vpop.f32.mrb[27].mxu1  ;;  %v3530_v29 = vrot.slane %v3461_v16, 1  ;;  %v2373_v60 = vrot.slane %v2296_v9, 2 }
 0x230   : > { %3604 = vrot.lane.b32.xlu1 %v3526_v25, %s4702_s20  ;;  %1846 = vst [vmem:[#allocation2 + $0x200] sm:$0xfe] %v1555_v28  ;;  %v1559_v34 = vrot.slane %v986_v33, 7  ;;  %1874 = vst.msk [vmem:[#allocation2 + $0x2e0] sm:$0xfe] %vm1791_vm4, %v1583_v24  ;;  %v2379_v9 = vrot.slane %v5407_v55, 2 }
 0x231   : > { %v5459_v39 = vsel %vm1499_vm5, %v1554_v22, %v1557_v32  ;;  %1851 = vst [vmem:[#allocation2 + $0x228] sm:$0x1] %v1557_v32  ;;  %v2007_v32 = vld [vmem:[#allocation2 + $0x120] sm:$0xfe]  ;;  %v3531_v36 = vsel %vm2079_vm2, %v5489_v3, %v3530_v29  ;;  %1871 = vst.msk [vmem:[#allocation2 + $0x2c8] sm:$0x1] %vm1798_vm6, %v1579_v37 }
 0x232   : > { %1848 = vst [vmem:[#allocation2 + $0x210] sm:$0xff] %v5459_v39  ;;  %v5469_v44 = vsel %vm1499_vm5, %v1555_v28, %v1559_v34  ;;  %1852 = vst [vmem:[#allocation2 + $0x230] sm:$0x1] %v1559_v34  ;;  %v1588_v34 = vrot.slane %v5478_v6, 7  ;;  %v2100_v46 = vrot.slane %v2007_v32, 1 }
 0x233   : > { %2172 = vrot.lane.b32.xlu0 %v2097_v41, %s4701_s16 }
 0x234   : > { %2635 = vrot.lane.b32.xlu1 %v5357_v1, %s4702_s20  ;;  %v990_v48 = vpop.f32.mrb[28].mxu1  ;;  %v2372_v1 = vsel %vm2352_vm3, %v2369_v43, %v2371_v38  ;;  %v1589_v43 = vsel %vm1499_vm5, %v1583_v24, %v1588_v34  ;;  %1880 = vst.msk [vmem:[#allocation2 + $0x310] sm:$0x1] %vm1798_vm6, %v1588_v34  ;;  %v2102_v59 = vsel %vm2079_vm2, %v2100_v46, %v2101_v40  ;;  %v5556_v38 = vrot.slane %v5384_v26, 1 }
 0x235   : > { %v1563_v50 = vrot.slane %v990_v48, 7  ;;  %v992_v54 = vpop.f32.mrb[29].mxu1  ;;  %1877 = vst.msk [vmem:[#allocation2 + $0x2f8] sm:$0xff] %vm1242_vm0, %v1589_v43  ;;  %v1580_v48 = vsel %vm1499_vm5, %v1574_v31, %v1579_v37  ;;  %v2106_v34 = vrot.slane %v5407_v55, 1  ;;  %v4467_v37 = vpop.f32.mrb[52].mxu0 }
 0x236   : > { %v1564_v61 = vrot.slane %v992_v54, 7  ;;  %v994_v58 = vpop.f32.mrb[30].mxu1  ;;  %1868 = vst.msk [vmem:[#allocation2 + $0x2b0] sm:$0xff] %vm1242_vm0, %v1580_v48  ;;  %v1601_v43 = vrot.slane %v4467_v37, 7 }
 0x237   : > { %2445 = vrot.lane.b32.xlu0 %v2370_v56, %s4700_s8  ;;  %1854 = vst [vmem:[#allocation2 + $0x240] sm:$0xfe] %v1563_v50  ;;  %v1566_v63 = vrot.slane %v994_v58, 7  ;;  %v996_v2 = vpop.f32.mrb[31].mxu1  ;;  %v2999_v58 = vld [vmem:[#allocation2 + $0x128] sm:$0xfc] }
 0x238   : > { %3336 = vrot.lane.b32.xlu1 %v5364_v4, %s4700_s8  ;;  %1855 = vst [vmem:[#allocation2 + $0x248] sm:$0xfe] %v1564_v61  ;;  %v1568_v53 = vrot.slane %v996_v2, 7  ;;  %v2998_v4 = vld [vmem:[#allocation2 + $0x110] sm:$0x3]  ;;  %v3072_v2 = vrot.slane %v2999_v58, 2 }
 0x239   : > { %v5492_v7 = vsel %vm1499_vm5, %v1563_v50, %v1566_v63  ;;  %1860 = vst [vmem:[#allocation2 + $0x270] sm:$0x1] %v1566_v63  ;;  %v3070_v14 = vrot.slane %v2998_v4, 2  ;;  %v2375_v63 = vsel %vm2352_vm3, %v2373_v60, %v2374_v0  ;;  %v2104_v4 = vsel %vm2079_vm2, %v2101_v40, %v2103_v5  ;;  %v2298_v40 = vld [vmem:[#allocation2 + $0x168] sm:$0xfc] }
 0x23a   : > { %1857 = vst [vmem:[#allocation2 + $0x258] sm:$0xff] %v5492_v7  ;;  %v5500_v51 = vsel %vm1499_vm5, %v1564_v61, %v1568_v53  ;;  %1861 = vst [vmem:[#allocation2 + $0x278] sm:$0x1] %v1568_v53  ;;  %v3073_v53 = vrot.slane %v5384_v26, 2 }
 0x23b   : > { %3145 = vrot.lane.b32.xlu0 %v3069_v8, %s4701_s16  ;;  %v3071_v28 = vsel %vm2352_vm3, %v3068_v49, %v3070_v14  ;;  %v3462_v8 = vld [vmem:[#allocation2 + $0x128] sm:$0xfe]  ;;  %1892 = vst.msk [vmem:[#allocation2 + $0x370] sm:$0xfe] %vm1791_vm4, %v1601_v43 }
 0x23c   : > { %2174 = vrot.lane.b32.xlu1 %v2099_v10, %s4701_s16  ;;  %v1000_v11 = vpop.f32.mrb[32].mxu1  ;;  %v2297_v10 = vld [vmem:[#allocation2 + $0x150] sm:$0x3] }
 0x23d   : > { %v1002_v15 = vpop.f32.mrb[33].mxu1  ;;  %v1572_v18 = vrot.slane %v1000_v11, 7  ;;  %v3532_v11 = vrot.slane %v3462_v8, 1 }
 0x23e   : > { %v1573_v19 = vrot.slane %v1002_v15, 7  ;;  %v1004_v20 = vpop.f32.mrb[34].mxu1 }
 0x23f   : > { %3606 = vrot.lane.b32.xlu0 %v3529_v12, %s4702_s20  ;;  %v1575_v21 = vrot.slane %v1004_v20, 7  ;;  %v1006_v22 = vpop.f32.mrb[35].mxu1  ;;  %1863 = vst [vmem:[#allocation2 + $0x288] sm:$0xfe] %v1572_v18  ;;  %v2376_v12 = vrot.slane %v2297_v10, 2  ;;  %v3534_v14 = vsel %vm2079_vm2, %v3532_v11, %v5556_v38  ;;  %v3078_v10 = vrot.slane %v5412_v57, 2 }
 0x240   : > { %2447 = vrot.lane.b32.xlu1 %v2372_v1, %s4700_s8  ;;  %1864 = vst [vmem:[#allocation2 + $0x290] sm:$0xfe] %v1573_v19  ;;  %v1577_v25 = vrot.slane %v1006_v22, 7  ;;  %v3000_v1 = vld [vmem:[#allocation2 + $0x158] sm:$0x3] }
 0x241   : > { %v5512_v30 = vsel %vm1499_vm5, %v1572_v18, %v1575_v21  ;;  %1869 = vst [vmem:[#allocation2 + $0x2b8] sm:$0x1] %v1575_v21  ;;  %v2377_v15 = vsel %vm2352_vm3, %v2374_v0, %v2376_v12  ;;  %v3075_v16 = vrot.slane %v3000_v1, 2  ;;  %v2569_v18 = vld [vmem:[#allocation2 + $0x168] sm:$0xff]  ;;  %v5570_v21 = vpop.permute.xlu0 %3390  ;;  %v2378_v0 = vrot.slane %v2298_v40, 2 }
 0x242   : > { %1866 = vst [vmem:[#allocation2 + $0x2a0] sm:$0xff] %v5512_v30  ;;  %v5520_v33 = vsel %vm1499_vm5, %v1573_v19, %v1577_v25  ;;  %1870 = vst [vmem:[#allocation2 + $0x2c0] sm:$0x1] %v1577_v25  ;;  %v2009_v22 = vld [vmem:[#allocation2 + $0x168] sm:$0xfe]  ;;  %v3272_v25 = vld [vmem:[#allocation2 + $0x170] sm:$0xff] }
 0x243   : > { %2637 = vrot.lane.b32.xlu0 %v2567_v27, %s4702_s20  ;;  %1867 = vst [vmem:[#allocation2 + $0x2a8] sm:$0xff] %v5520_v33  ;;  %v3076_v19 = vsel %vm2352_vm3, %v3073_v53, %v3075_v16  ;;  %7020 = vst [vmem:[#allocation9_spill] sm:$0xff] %v5570_v21  ;;  %v2105_v32 = vrot.slane %v2009_v22, 1  ;;  %v2380_v12 = vsel %vm2352_vm3, %v2378_v0, %v2379_v9 }
 0x244   : > { %3147 = vrot.lane.b32.xlu1 %v3071_v28, %s4701_s16  ;;  %v1010_v35 = vpop.f32.mrb[36].mxu1 }
 0x245   : > { %v1581_v41 = vrot.slane %v1010_v35, 7  ;;  %v1012_v42 = vpop.f32.mrb[37].mxu1  ;;  %v5577_v48 = vpop.permute.xlu0 %2160  ;;  %v2107_v60 = vsel %vm2079_vm2, %v2105_v32, %v2106_v34  ;;  %v3002_v32 = vld [vmem:[#allocation2 + $0x1a0] sm:$0x3] }
 0x246   : > { %v1582_v47 = vrot.slane %v1012_v42, 7  ;;  %v1014_v6 = vpop.f32.mrb[38].mxu1 }
 0x247   : > { %3338 = vrot.lane.b32.xlu0 %v3270_v45, %s4700_s8  ;;  %1872 = vst [vmem:[#allocation2 + $0x2d0] sm:$0xfe] %v1581_v41  ;;  %v1584_v49 = vrot.slane %v1014_v6, 7  ;;  %v1016_v50 = vpop.f32.mrb[39].mxu1  ;;  %v1193_v45 = vpop.f32.mrb[53].mxu0 }
 0x248   : > { %3608 = vrot.lane.b32.xlu1 %v3531_v36, %s4702_s20  ;;  %1873 = vst [vmem:[#allocation2 + $0x2d8] sm:$0xfe] %v1582_v47  ;;  %v1586_v54 = vrot.slane %v1016_v50, 7  ;;  %v4468_v6 = vpop.f32.mrb[54].mxu0 }
 0x249   : > { %v5538_v56 = vsel %vm1499_vm5, %v1581_v41, %v1584_v49  ;;  %1878 = vst [vmem:[#allocation2 + $0x300] sm:$0x1] %v1584_v49  ;;  %v1196_v8 = vpop.f32.mrb[55].mxu0  ;;  %v5604_v16 = vpop.permute.xlu0 %2162 }
 0x24a   : > { %1875 = vst [vmem:[#allocation2 + $0x2e8] sm:$0xff] %v5538_v56  ;;  %v5544_v61 = vsel %vm1499_vm5, %v1582_v47, %v1586_v54  ;;  %1879 = vst [vmem:[#allocation2 + $0x308] sm:$0x1] %v1586_v54  ;;  %v1592_v47 = vrot.slane %v1193_v45, 7 }
 0x24b   : > { %2176 = vrot.lane.b32.xlu0 %v2102_v59, %s4701_s16  ;;  %1876 = vst [vmem:[#allocation2 + $0x2f0] sm:$0xff] %v5544_v61  ;;  %v1606_v59 = vrot.slane %v4468_v6, 7 }
 0x24c   : > { %2639 = vrot.lane.b32.xlu1 %v5379_v23, %s4702_s20  ;;  %v3074_v23 = vsel %vm2352_vm3, %v3072_v2, %v3073_v53  ;;  %v1020_v24 = vpop.f32.mrb[40].mxu1  ;;  %1883 = vst.msk [vmem:[#allocation2 + $0x328] sm:$0xfe] %vm1791_vm4, %v1592_v47  ;;  %v2010_v2 = vld [vmem:[#allocation2 + $0x198] sm:$0x1] }
 0x24d   : > { %v1590_v27 = vrot.slane %v1020_v24, 7  ;;  %v1022_v28 = vpop.f32.mrb[41].mxu1  ;;  %v1607_v53 = vsel %vm1499_vm5, %v1601_v43, %v1606_v59  ;;  %1898 = vst.msk [vmem:[#allocation2 + $0x3a0] sm:$0x1] %vm1798_vm6, %v1606_v59 }
 0x24e   : > { %v1591_v29 = vrot.slane %v1022_v28, 7  ;;  %v1024_v35 = vpop.f32.mrb[42].mxu1  ;;  %1895 = vst.msk [vmem:[#allocation2 + $0x388] sm:$0xff] %vm1242_vm0, %v1607_v53  ;;  %v2012_v53 = vld [vmem:[#allocation2 + $0x1e0] sm:$0x1] }
 0x24f   : > { %2449 = vrot.lane.b32.xlu0 %v2375_v63, %s4700_s8  ;;  %1881 = vst [vmem:[#allocation2 + $0x318] sm:$0xfe] %v1590_v27  ;;  %v1593_v41 = vrot.slane %v1024_v35, 7  ;;  %v1026_v42 = vpop.f32.mrb[43].mxu1  ;;  %v3001_v63 = vld [vmem:[#allocation2 + $0x170] sm:$0xfc]  ;;  %v5627_v35 = vpop.permute.xlu0 %2433 }
 0x250   : > { %3340 = vrot.lane.b32.xlu1 %v5384_v26, %s4700_s8  ;;  %v3463_v26 = vld [vmem:[#allocation2 + $0x158] sm:$0x1]  ;;  %1882 = vst [vmem:[#allocation2 + $0x320] sm:$0xfe] %v1591_v29  ;;  %v1595_v36 = vrot.slane %v1026_v42, 7  ;;  %v3077_v1 = vrot.slane %v3001_v63, 2 }
 0x251   : > { %v3535_v20 = vrot.slane %v3463_v26, 1  ;;  %v5581_v49 = vsel %vm1499_vm5, %v1590_v27, %v1593_v41  ;;  %1887 = vst [vmem:[#allocation2 + $0x348] sm:$0x1] %v1593_v41  ;;  %v5606_v26 = vpop.permute.xlu1 %3392  ;;  %v3080_v41 = vrot.slane %v3002_v32, 2  ;;  %v2384_v63 = vrot.slane %v5436_v13, 2 }
 0x252   : > { %1884 = vst [vmem:[#allocation2 + $0x330] sm:$0xff] %v5581_v49  ;;  %v5589_v58 = vsel %vm1499_vm5, %v1591_v29, %v1595_v36  ;;  %1888 = vst [vmem:[#allocation2 + $0x350] sm:$0x1] %v1595_v36  ;;  %v3079_v27 = vsel %vm2352_vm3, %v3077_v1, %v3078_v10  ;;  %v2301_v1 = vld [vmem:[#allocation2 + $0x1e0] sm:$0x3] }
 0x253   : > { %3149 = vrot.lane.b32.xlu0 %v3074_v23, %s4701_s16  ;;  %v3536_v31 = vsel %vm2079_vm2, %v5556_v38, %v3535_v20  ;;  %1885 = vst [vmem:[#allocation2 + $0x338] sm:$0xff] %v5589_v58  ;;  %7021 = vst [vmem:[#allocation10_spill] sm:$0xff] %v5606_v26  ;;  %v3081_v42 = vsel %vm2352_vm3, %v3078_v10, %v3080_v41  ;;  %v5637_v45 = vpop.permute.xlu0 %3662  ;;  %v2573_v41 = vld [vmem:[#allocation2 + $0x1f8] sm:$0xff] }
 0x254   : > { %2178 = vrot.lane.b32.xlu1 %v2104_v4, %s4701_s16  ;;  %v1030_v46 = vpop.f32.mrb[44].mxu1  ;;  %v1597_v4 = vrot.slane %v1196_v8, 7  ;;  %7022 = vst [vmem:[#allocation11_spill] sm:$0xff] %v5637_v45  ;;  %v3093_v45 = vrot.slane %v5500_v51, 2 }
 0x255   : > { %v1599_v50 = vrot.slane %v1030_v46, 7  ;;  %v1032_v54 = vpop.f32.mrb[45].mxu1  ;;  %v5629_v37 = vpop.permute.xlu1 %2435  ;;  %v2011_v46 = vld [vmem:[#allocation2 + $0x1b0] sm:$0xfe] }
 0x256   : > { %v1600_v62 = vrot.slane %v1032_v54, 7  ;;  %v1034_v5 = vpop.f32.mrb[46].mxu1  ;;  %v1598_v22 = vsel %vm1499_vm5, %v1592_v47, %v1597_v4  ;;  %1889 = vst.msk [vmem:[#allocation2 + $0x358] sm:$0x1] %vm1798_vm6, %v1597_v4  ;;  %v3274_v47 = vld [vmem:[#allocation2 + $0x1b8] sm:$0xff]  ;;  %v3083_v4 = vrot.slane %v5442_v17, 2 }
 0x257   : > { %3610 = vrot.lane.b32.xlu0 %v3534_v14, %s4702_s20  ;;  %1890 = vst [vmem:[#allocation2 + $0x360] sm:$0xfe] %v1599_v50  ;;  %v1602_v23 = vrot.slane %v1034_v5, 7  ;;  %v1036_v11 = vpop.f32.mrb[47].mxu1  ;;  %v2108_v14 = vrot.slane %v2010_v2, 1  ;;  %1886 = vst.msk [vmem:[#allocation2 + $0x340] sm:$0xff] %vm1242_vm0, %v1598_v22 }
 0x258   : > { %2451 = vrot.lane.b32.xlu1 %v2377_v15, %s4700_s8  ;;  %1891 = vst [vmem:[#allocation2 + $0x368] sm:$0xfe] %v1600_v62  ;;  %v1604_v15 = vrot.slane %v1036_v11, 7  ;;  %v2300_v54 = vld [vmem:[#allocation2 + $0x1b0] sm:$0xfc]  ;;  %v2113_v11 = vrot.slane %v2012_v53, 1 }
 0x259   : > { %v5609_v20 = vsel %vm1499_vm5, %v1599_v50, %v1602_v23  ;;  %1896 = vst [vmem:[#allocation2 + $0x390] sm:$0x1] %v1602_v23  ;;  %v2109_v28 = vsel %vm2079_vm2, %v2106_v34, %v2108_v14  ;;  %v2571_v34 = vld [vmem:[#allocation2 + $0x1b0] sm:$0xff]  ;;  %v5641_v36 = vpop.permute.xlu1 %3664  ;;  %v2111_v50 = vrot.slane %v5436_v13, 1  ;;  %v3003_v2 = vld [vmem:[#allocation2 + $0x1b8] sm:$0xfc] }
 0x25a   : > { %1893 = vst [vmem:[#allocation2 + $0x378] sm:$0xff] %v5609_v20  ;;  %v5616_v24 = vsel %vm1499_vm5, %v1600_v62, %v1604_v15  ;;  %1897 = vst [vmem:[#allocation2 + $0x398] sm:$0x1] %v1604_v15  ;;  %v2383_v62 = vrot.slane %v2300_v54, 2  ;;  %v3082_v23 = vrot.slane %v3003_v2, 2  ;;  %v2116_v53 = vrot.slane %v5459_v39, 1 }
 0x25b   : > { %2641 = vrot.lane.b32.xlu0 %v2569_v18, %s4702_s20  ;;  %v3464_v18 = vld [vmem:[#allocation2 + $0x170] sm:$0xfe]  ;;  %7023 = vst [vmem:[#allocation12_spill] sm:$0xff] %v5641_v36 }
 0x25c   : > { %3151 = vrot.lane.b32.xlu1 %v3076_v19, %s4701_s16  ;;  %v2299_v19 = vld [vmem:[#allocation2 + $0x198] sm:$0x3]  ;;  %v3537_v29 = vrot.slane %v3464_v18, 1  ;;  %v2385_v10 = vsel %vm2352_vm3, %v2383_v62, %v2384_v63  ;;  %v3084_v18 = vsel %vm2352_vm3, %v3082_v23, %v3083_v4  ;;  %v4471_v23 = vpop.f32.mrb[56].mxu0 }
 0x25f   : > { %3342 = vrot.lane.b32.xlu0 %v3272_v25, %s4700_s8  ;;  %v5619_v25 = vrot.slane %v5412_v57, 1 }
 0x260   : > { %3612 = vrot.lane.b32.xlu1 %v3536_v31, %s4702_s20  ;;  %v2381_v31 = vrot.slane %v2299_v19, 2  ;;  %v2114_v19 = vsel %vm2079_vm2, %v2111_v50, %v2113_v11 }
 0x262   : > { %v2382_v40 = vsel %vm2352_vm3, %v2379_v9, %v2381_v31  ;;  %v2110_v9 = vrot.slane %v2011_v46, 1  ;;  %v2013_v46 = vld [vmem:[#allocation2 + $0x1f8] sm:$0xfe] }
 0x263   : > { %2180 = vrot.lane.b32.xlu0 %v2107_v60, %s4701_s16  ;;  %v2115_v2 = vrot.slane %v2013_v46, 1  ;;  %v2389_v46 = vrot.slane %v5459_v39, 2 }
 0x264   : > { %2643 = vrot.lane.b32.xlu1 %v5407_v55, %s4702_s20  ;;  %v3465_v55 = vld [vmem:[#allocation2 + $0x1a0] sm:$0x1]  ;;  %v2112_v0 = vsel %vm2079_vm2, %v2110_v9, %v2111_v50 }
 0x265   : > { %v3540_v43 = vrot.slane %v3465_v55, 1 }
 0x267   : > { %2453 = vrot.lane.b32.xlu0 %v2380_v12, %s4700_s8  ;;  %v3541_v6 = vsel %vm2079_vm2, %v5619_v25, %v3540_v43  ;;  %v3466_v12 = vld [vmem:[#allocation2 + $0x1b8] sm:$0xfe] }
 0x268   : > { %3344 = vrot.lane.b32.xlu1 %v5412_v57, %s4700_s8  ;;  %v3539_v57 = vsel %vm2079_vm2, %v3537_v29, %v5619_v25  ;;  %v3542_v22 = vrot.slane %v3466_v12, 1 }
 0x26b   : > { %3153 = vrot.lane.b32.xlu0 %v3079_v27, %s4701_s16  ;;  %v2386_v27 = vrot.slane %v2301_v1, 2  ;;  %v1619_v1 = vrot.slane %v4471_v23, 7 }
 0x26c   : > { %2182 = vrot.lane.b32.xlu1 %v2109_v28, %s4701_s16  ;;  %v3004_v28 = vld [vmem:[#allocation2 + $0x1e8] sm:$0x3] }
 0x26d   : > { %v2387_v32 = vsel %vm2352_vm3, %v2384_v63, %v2386_v27  ;;  %1910 = vst.msk [vmem:[#allocation2 + $0x400] sm:$0xfe] %vm1791_vm4, %v1619_v1 }
 0x26f   : > { %3614 = vrot.lane.b32.xlu0 %v3539_v57, %s4702_s20  ;;  %v3085_v57 = vrot.slane %v3004_v28, 2 }
 0x270   : > { %2455 = vrot.lane.b32.xlu1 %v2382_v40, %s4700_s8  ;;  %v3467_v40 = vld [vmem:[#allocation2 + $0x1e8] sm:$0x1] }
 0x271   : > { %v3545_v43 = vrot.slane %v3467_v40, 1 }
 0x273   : > { %2645 = vrot.lane.b32.xlu0 %v2571_v34, %s4702_s20 }
 0x274   : > { %3155 = vrot.lane.b32.xlu1 %v3081_v42, %s4701_s16  ;;  %v5650_v60 = vpop.permute.xlu1 %2627  ;;  %v3086_v42 = vsel %vm2352_vm3, %v3083_v4, %v3085_v57  ;;  %v2302_v4 = vld [vmem:[#allocation2 + $0x1f8] sm:$0xfc] }
 0x277   : > { %3346 = vrot.lane.b32.xlu0 %v3274_v47, %s4700_s8  ;;  %v1040_v47 = vpop.f32.mrb[48].mxu1 }
 0x278   : > { %3616 = vrot.lane.b32.xlu1 %v3541_v6, %s4702_s20  ;;  %v3276_v6 = vld [vmem:[#allocation2 + $0x200] sm:$0xff]  ;;  %v1608_v9 = vrot.slane %v1040_v47, 7  ;;  %v1042_v50 = vpop.f32.mrb[49].mxu1 }
 0x279   : > { %v5648_v59 = vpop.permute.xlu0 %2625  ;;  %v1609_v62 = vrot.slane %v1042_v50, 7  ;;  %v2014_v50 = vld [vmem:[#allocation2 + $0x228] sm:$0x1] }
 0x27a   : > { %1899 = vst [vmem:[#allocation2 + $0x3a8] sm:$0xfe] %v1608_v9 }
 0x27b   : > { %2184 = vrot.lane.b32.xlu0 %v2112_v0, %s4701_s16  ;;  %1900 = vst [vmem:[#allocation2 + $0x3b0] sm:$0xfe] %v1609_v62 }
 0x27c   : > { %2647 = vrot.lane.b32.xlu1 %v5436_v13, %s4702_s20  ;;  %v5667_v13 = vrot.slane %v5442_v17, 1 }
 0x27d   : > { %v5657_v5 = vpop.permute.xlu0 %2437 }
 0x27e   : > { %v5659_v8 = vpop.permute.xlu1 %2164  ;;  %v3546_v63 = vsel %vm2079_vm2, %v5667_v13, %v3545_v43  ;;  %v2388_v43 = vrot.slane %v2302_v4, 2 }
 0x27f   : > { %2457 = vrot.lane.b32.xlu0 %v2385_v10, %s4700_s8  ;;  %v1044_v10 = vpop.f32.mrb[50].mxu1 }
 0x280   : > { %3348 = vrot.lane.b32.xlu1 %v5442_v17, %s4700_s8  ;;  %v3544_v17 = vsel %vm2079_vm2, %v3542_v22, %v5667_v13  ;;  %v1611_v11 = vrot.slane %v1044_v10, 7  ;;  %v1046_v12 = vpop.f32.mrb[51].mxu1 }
 0x281   : > { %v5669_v14 = vpop.permute.xlu0 %3137  ;;  %v1050_v22 = vpop.f32.mrb[52].mxu1 }
 0x282   : > { %v5671_v15 = vpop.permute.xlu1 %2166  ;;  %v5707_v57 = vsel %vm1499_vm5, %v1608_v9, %v1611_v11  ;;  %1905 = vst [vmem:[#allocation2 + $0x3d8] sm:$0x1] %v1611_v11  ;;  %v1617_v40 = vrot.slane %v1050_v22, 7  ;;  %v3005_v9 = vld [vmem:[#allocation2 + $0x200] sm:$0xfc]  ;;  %v3088_v22 = vrot.slane %v5469_v44, 2 }
 0x283   : > { %3157 = vrot.lane.b32.xlu0 %v3084_v18, %s4701_s16  ;;  %v1209_v18 = vpop.f32.mrb[57].mxu0  ;;  %1902 = vst [vmem:[#allocation2 + $0x3c0] sm:$0xff] %v5707_v57 }
 0x284   : > { %2186 = vrot.lane.b32.xlu1 %v2114_v19, %s4701_s16  ;;  %v1613_v19 = vrot.slane %v1046_v12, 7  ;;  %v1610_v27 = vrot.slane %v1209_v18, 7  ;;  %v4472_v28 = vpop.f32.mrb[58].mxu0  ;;  %1908 = vst [vmem:[#allocation2 + $0x3f0] sm:$0xfe] %v1617_v40  ;;  %v2390_v18 = vsel %vm2352_vm3, %v2388_v43, %v2389_v46 }
 0x285   : > { %v5677_v29 = vpop.permute.xlu0 %2629  ;;  %v1212_v10 = vpop.f32.mrb[59].mxu0 }
 0x286   : > { %v5679_v31 = vpop.permute.xlu1 %2439  ;;  %v5716_v47 = vsel %vm1499_vm5, %v1609_v62, %v1613_v19  ;;  %1906 = vst [vmem:[#allocation2 + $0x3e0] sm:$0x1] %v1613_v19  ;;  %1901 = vst.msk [vmem:[#allocation2 + $0x3b8] sm:$0xfe] %vm1791_vm4, %v1610_v27  ;;  %v1615_v12 = vrot.slane %v1212_v10, 7  ;;  %v3087_v19 = vrot.slane %v3005_v9, 2 }
 0x287   : > { %3618 = vrot.lane.b32.xlu0 %v3544_v17, %s4702_s20  ;;  %v5742_v9 = vrot.slane %v5469_v44, 1 }
 0x288   : > { %2459 = vrot.lane.b32.xlu1 %v2387_v32, %s4700_s8  ;;  %1907 = vst.msk [vmem:[#allocation2 + $0x3e8] sm:$0x1] %vm1798_vm6, %v1615_v12 }
 0x289   : > { %v5686_v55 = vpop.permute.xlu0 %3330 }
 0x28a   : > { %v5688_v34 = vpop.permute.xlu1 %3139 }
 0x28b   : > { %2649 = vrot.lane.b32.xlu0 %v2573_v41, %s4702_s20  ;;  %v1624_v41 = vrot.slane %v4472_v28, 7  ;;  %v2118_v28 = vrot.slane %v2014_v50, 1 }
 0x28c   : > { %3159 = vrot.lane.b32.xlu1 %v3086_v42, %s4701_s16  ;;  %v2117_v42 = vsel %vm2079_vm2, %v2115_v2, %v2116_v53 }
 0x28d   : > { %v5693_v54 = vpop.permute.xlu0 %2168  ;;  %v1625_v2 = vsel %vm1499_vm5, %v1619_v1, %v1624_v41  ;;  %1916 = vst.msk [vmem:[#allocation2 + $0x430] sm:$0x1] %vm1798_vm6, %v1624_v41  ;;  %v3468_v41 = vld [vmem:[#allocation2 + $0x200] sm:$0xfe]  ;;  %v2119_v10 = vsel %vm2079_vm2, %v2116_v53, %v2118_v28 }
 0x28e   : > { %v5695_v0 = vpop.permute.xlu1 %2631  ;;  %1913 = vst.msk [vmem:[#allocation2 + $0x418] sm:$0xff] %vm1242_vm0, %v1625_v2  ;;  %v1616_v2 = vsel %vm1499_vm5, %v1610_v27, %v1615_v12  ;;  %v3089_v27 = vsel %vm2352_vm3, %v3087_v19, %v3088_v22 }
 0x28f   : > { %3350 = vrot.lane.b32.xlu0 %v3276_v6, %s4700_s8  ;;  %v1052_v6 = vpop.f32.mrb[53].mxu1  ;;  %1904 = vst.msk [vmem:[#allocation2 + $0x3d0] sm:$0xff] %vm1242_vm0, %v1616_v2 }
 0x290   : > { %3620 = vrot.lane.b32.xlu1 %v3546_v63, %s4702_s20  ;;  %v1618_v63 = vrot.slane %v1052_v6, 7  ;;  %v1054_v62 = vpop.f32.mrb[54].mxu1 }
 0x291   : > { %v5702_v17 = vpop.permute.xlu0 %2441  ;;  %v1620_v11 = vrot.slane %v1054_v62, 7  ;;  %v1056_v1 = vpop.f32.mrb[55].mxu1 }
 0x292   : > { %v5704_v32 = vpop.permute.xlu1 %3332  ;;  %1909 = vst [vmem:[#allocation2 + $0x3f8] sm:$0xfe] %v1618_v63  ;;  %v1622_v43 = vrot.slane %v1056_v1, 7 }
 0x293   : > { %2188 = vrot.lane.b32.xlu0 %v2117_v42, %s4701_s16  ;;  %v2303_v42 = vld [vmem:[#allocation2 + $0x228] sm:$0x3]  ;;  %v5735_v6 = vsel %vm1499_vm5, %v1617_v40, %v1620_v11  ;;  %1914 = vst [vmem:[#allocation2 + $0x420] sm:$0x1] %v1620_v11  ;;  %v3547_v11 = vrot.slane %v3468_v41, 1  ;;  %v2575_v41 = vld [vmem:[#allocation2 + $0x240] sm:$0xff] }
 0x294   : > { %2651 = vrot.lane.b32.xlu1 %v5459_v39, %s4702_s20  ;;  %1911 = vst [vmem:[#allocation2 + $0x408] sm:$0xff] %v5735_v6  ;;  %v5749_v40 = vsel %vm1499_vm5, %v1618_v63, %v1622_v43  ;;  %1915 = vst [vmem:[#allocation2 + $0x428] sm:$0x1] %v1622_v43  ;;  %v2391_v12 = vrot.slane %v2303_v42, 2  ;;  %v3469_v39 = vld [vmem:[#allocation2 + $0x230] sm:$0x1] }
 0x295   : > { %v5725_v23 = vpop.permute.xlu0 %3141  ;;  %v3549_v63 = vsel %vm2079_vm2, %v3547_v11, %v5742_v9  ;;  %v3550_v43 = vrot.slane %v3469_v39, 1  ;;  %v3278_v11 = vld [vmem:[#allocation2 + $0x248] sm:$0xff] }
 0x296   : > { %v5727_v4 = vpop.permute.xlu1 %2170  ;;  %v2392_v19 = vsel %vm2352_vm3, %v2389_v46, %v2391_v12 }
 0x297   : > { %2461 = vrot.lane.b32.xlu0 %v2390_v18, %s4700_s8  ;;  %v3551_v12 = vsel %vm2079_vm2, %v5742_v9, %v3550_v43  ;;  %v3007_v43 = vld [vmem:[#allocation2 + $0x248] sm:$0xfc] }
 0x298   : > { %3352 = vrot.lane.b32.xlu1 %v5469_v44, %s4700_s8  ;;  %v3006_v44 = vld [vmem:[#allocation2 + $0x230] sm:$0x3]  ;;  %v3092_v26 = vrot.slane %v3007_v43, 2 }
 0x299   : > { %v5744_v50 = vpop.permute.xlu0 %3602  ;;  %v3090_v2 = vrot.slane %v3006_v44, 2 }
 0x29a   : > { %v5746_v62 = vpop.permute.xlu1 %2443 }
 0x29b   : > { %7024 = vst [vmem:[#allocation13_spill] sm:$0xff] %v5746_v62  ;;  %3161 = vrot.lane.b32.xlu0 %v3089_v27, %s4701_s16  ;;  %v3091_v42 = vsel %vm2352_vm3, %v3088_v22, %v3090_v2  ;;  %v2015_v27 = vld [vmem:[#allocation2 + $0x240] sm:$0xfe] }
 0x29c   : > { %2190 = vrot.lane.b32.xlu1 %v2119_v10, %s4701_s16  ;;  %v2120_v44 = vrot.slane %v2015_v27, 1  ;;  %v2304_v22 = vld [vmem:[#allocation2 + $0x240] sm:$0xfc]  ;;  %v2016_v27 = vld [vmem:[#allocation2 + $0x270] sm:$0x1] }
 0x29d   : > { %v5757_v18 = vpop.permute.xlu0 %2633 }
 0x29e   : > { %v5759_v1 = vpop.permute.xlu1 %3143 }
 0x29f   : > { %7025 = vst [vmem:[#allocation14_spill] sm:$0xff] %v5759_v1  ;;  %3622 = vrot.lane.b32.xlu0 %v3549_v63, %s4702_s20  ;;  %v2121_v63 = vrot.slane %v5492_v7, 1 }
 0x2a0   : > { %2463 = vrot.lane.b32.xlu1 %v2392_v19, %s4700_s8 }
 0x2a1   : > { %v5766_v53 = vpop.permute.xlu0 %3334  ;;  %v2122_v39 = vsel %vm2079_vm2, %v2120_v44, %v2121_v63  ;;  %v2123_v44 = vrot.slane %v2016_v27, 1 }
 0x2a2   : > { %7026 = vst [vmem:[#allocation15_spill] sm:$0xff] %v5766_v53  ;;  %v5768_v28 = vpop.permute.xlu1 %3604 }
 0x2a3   : > { %7027 = vst [vmem:[#allocation16_spill] sm:$0xff] %v5768_v28  ;;  %2653 = vrot.lane.b32.xlu0 %v2575_v41, %s4702_s20  ;;  %v2393_v41 = vrot.slane %v2304_v22, 2  ;;  %v3470_v22 = vld [vmem:[#allocation2 + $0x248] sm:$0xfe]  ;;  %v2124_v43 = vsel %vm2079_vm2, %v2121_v63, %v2123_v44 }
 0x2a4   : > { %3163 = vrot.lane.b32.xlu1 %v3091_v42, %s4701_s16  ;;  %v2394_v42 = vrot.slane %v5492_v7, 2  ;;  %v2577_v63 = vld [vmem:[#allocation2 + $0x288] sm:$0xff] }
 0x2a5   : > { %v5773_v46 = vpop.permute.xlu0 %2172 }
 0x2a6   : > { %v5775_v10 = vpop.permute.xlu1 %2635  ;;  %v2395_v36 = vsel %vm2352_vm3, %v2393_v41, %v2394_v42  ;;  %v3094_v41 = vsel %vm2352_vm3, %v3092_v26, %v3093_v45  ;;  %v3471_v26 = vld [vmem:[#allocation2 + $0x278] sm:$0x1] }
 0x2a7   : > { %7028 = vst [vmem:[#allocation17_spill] sm:$0xff] %v5775_v10  ;;  %3354 = vrot.lane.b32.xlu0 %v3278_v11, %s4700_s8 }
 0x2a8   : > { %3624 = vrot.lane.b32.xlu1 %v3551_v12, %s4702_s20 }
 0x2a9   : > { %v5782_v19 = vpop.permute.xlu0 %2445 }
 0x2aa   : > { %7029 = vst [vmem:[#allocation18_spill] sm:$0xff] %v5782_v19  ;;  %v5784_v2 = vpop.permute.xlu1 %3336 }
 0x2ab   : > { %7030 = vst [vmem:[#allocation19_spill] sm:$0xff] %v5784_v2  ;;  %2192 = vrot.lane.b32.xlu0 %v2122_v39, %s4701_s16  ;;  %v2305_v39 = vld [vmem:[#allocation2 + $0x270] sm:$0x3]  ;;  %v3552_v2 = vrot.slane %v3470_v22, 1 }
 0x2ac   : > { %2655 = vrot.lane.b32.xlu1 %v5492_v7, %s4702_s20  ;;  %v5801_v7 = vrot.slane %v5500_v51, 1  ;;  %v2396_v27 = vrot.slane %v2305_v39, 2 }
 0x2ad   : > { %v5791_v11 = vpop.permute.xlu0 %3145 }
 0x2ae   : > { %7031 = vst [vmem:[#allocation20_spill] sm:$0xff] %v5791_v11  ;;  %v5793_v12 = vpop.permute.xlu1 %2174 }
 0x2af   : > { %7032 = vst [vmem:[#allocation21_spill] sm:$0xff] %v5793_v12  ;;  %2465 = vrot.lane.b32.xlu0 %v2395_v36, %s4700_s8  ;;  %v3008_v36 = vld [vmem:[#allocation2 + $0x278] sm:$0x3] }
 0x2b0   : > { %3356 = vrot.lane.b32.xlu1 %v5500_v51, %s4700_s8  ;;  %v3554_v51 = vsel %vm2079_vm2, %v3552_v2, %v5801_v7  ;;  %v2017_v2 = vld [vmem:[#allocation2 + $0x288] sm:$0xfe] }
 0x2b1   : > { %v5803_v21 = vpop.permute.xlu0 %3606 }
 0x2b2   : > { %7033 = vst [vmem:[#allocation22_spill] sm:$0xff] %v5803_v21  ;;  %v5805_v11 = vpop.permute.xlu1 %2447  ;;  %v2397_v21 = vsel %vm2352_vm3, %v2394_v42, %v2396_v27  ;;  %v1060_v42 = vpop.f32.mrb[56].mxu1 }
 0x2b3   : > { %7034 = vst [vmem:[#allocation23_spill] sm:$0xff] %v5805_v11  ;;  %3165 = vrot.lane.b32.xlu0 %v3094_v41, %s4701_s16  ;;  %v3095_v11 = vrot.slane %v3008_v36, 2  ;;  %v3555_v41 = vrot.slane %v3471_v26, 1  ;;  %v1626_v27 = vrot.slane %v1060_v42, 7  ;;  %v1062_v36 = vpop.f32.mrb[57].mxu1  ;;  %v4475_v26 = vpop.f32.mrb[60].mxu0 }
 0x2b4   : > { %2194 = vrot.lane.b32.xlu1 %v2124_v43, %s4701_s16  ;;  %v3280_v43 = vld [vmem:[#allocation2 + $0x290] sm:$0xff] }
 0x2b5   : > { %v5811_v10 = vpop.permute.xlu0 %2637  ;;  %v3096_v39 = vsel %vm2352_vm3, %v3093_v45, %v3095_v11  ;;  %1917 = vst [vmem:[#allocation2 + $0x438] sm:$0xfe] %v1626_v27  ;;  %v1064_v11 = vpop.f32.mrb[58].mxu1 }
 0x2b6   : > { %7035 = vst [vmem:[#allocation24_spill] sm:$0xff] %v5811_v10  ;;  %v5813_v28 = vpop.permute.xlu1 %3147  ;;  %v1066_v42 = vpop.f32.mrb[59].mxu1 }
 0x2b7   : > { %7036 = vst [vmem:[#allocation25_spill] sm:$0xff] %v5813_v28  ;;  %3626 = vrot.lane.b32.xlu0 %v3554_v51, %s4702_s20  ;;  %v1627_v28 = vrot.slane %v1062_v36, 7  ;;  %v1631_v36 = vrot.slane %v1066_v42, 7  ;;  %v1070_v53 = vpop.f32.mrb[60].mxu1 }
 0x2b8   : > { %2467 = vrot.lane.b32.xlu1 %v2397_v21, %s4700_s8 }
 0x2b9   : > { %v5820_v44 = vpop.permute.xlu0 %3338  ;;  %1918 = vst [vmem:[#allocation2 + $0x440] sm:$0xfe] %v1627_v28  ;;  %1924 = vst [vmem:[#allocation2 + $0x470] sm:$0x1] %v1631_v36 }
 0x2ba   : > { %7037 = vst [vmem:[#allocation26_spill] sm:$0xff] %v5820_v44  ;;  %v5822_v22 = vpop.permute.xlu1 %3608  ;;  %v2125_v44 = vrot.slane %v2017_v2, 1 }
 0x2bb   : > { %7038 = vst [vmem:[#allocation27_spill] sm:$0xff] %v5822_v22  ;;  %2657 = vrot.lane.b32.xlu0 %v2577_v63, %s4702_s20  ;;  %v3556_v22 = vsel %vm2079_vm2, %v5801_v7, %v3555_v41  ;;  %v2306_v63 = vld [vmem:[#allocation2 + $0x288] sm:$0xfc] }
 0x2bc   : > { %3167 = vrot.lane.b32.xlu1 %v3096_v39, %s4701_s16  ;;  %v1629_v39 = vrot.slane %v1064_v11, 7  ;;  %v7043_v11 = vrot.slane %v5512_v30, 1  ;;  %v2398_v42 = vrot.slane %v2306_v63, 2 }
 0x2bd   : > { %v5827_v51 = vpop.permute.xlu0 %2176 }
 0x2be   : > { %7039 = vst [vmem:[#allocation28_spill] sm:$0xff] %v5827_v51  ;;  %v5829_v21 = vpop.permute.xlu1 %2639  ;;  %v1637_v51 = vrot.slane %v4475_v26, 7  ;;  %v5841_v12 = vsel %vm1499_vm5, %v1626_v27, %v1629_v39  ;;  %1923 = vst [vmem:[#allocation2 + $0x468] sm:$0x1] %v1629_v39  ;;  %v2127_v26 = vsel %vm2079_vm2, %v2125_v44, %v7043_v11  ;;  %v1072_v27 = vpop.f32.mrb[61].mxu1 }
 0x2bf   : > { %7040 = vst [vmem:[#allocation29_spill] sm:$0xff] %v5829_v21  ;;  %3358 = vrot.lane.b32.xlu0 %v3280_v43, %s4700_s8  ;;  %v1225_v21 = vpop.f32.mrb[61].mxu0  ;;  %1920 = vst [vmem:[#allocation2 + $0x450] sm:$0xff] %v5841_v12  ;;  %v2018_v39 = vld [vmem:[#allocation2 + $0x2b8] sm:$0x1]  ;;  %v1636_v44 = vrot.slane %v1072_v27, 7 }
 0x2c0   : > { %3628 = vrot.lane.b32.xlu1 %v3556_v22, %s4702_s20  ;;  %v1628_v10 = vrot.slane %v1225_v21, 7  ;;  %v4476_v41 = vpop.f32.mrb[62].mxu0  ;;  %1928 = vst.msk [vmem:[#allocation2 + $0x490] sm:$0xfe] %vm1791_vm4, %v1637_v51  ;;  %v1635_v22 = vrot.slane %v1070_v53, 7  ;;  %v2399_v21 = vrot.slane %v5512_v30, 2 }
 0x2c1   : > { %v5836_v2 = vpop.permute.xlu0 %2449  ;;  %v1642_v43 = vrot.slane %v4476_v41, 7  ;;  %v3009_v53 = vld [vmem:[#allocation2 + $0x290] sm:$0xfc]  ;;  %1927 = vst [vmem:[#allocation2 + $0x488] sm:$0xfe] %v1636_v44  ;;  %v3098_v27 = vrot.slane %v5520_v33, 2 }
 0x2c2   : > { %7041 = vst [vmem:[#allocation30_spill] sm:$0xff] %v5836_v2  ;;  %v5838_v45 = vpop.permute.xlu1 %3340  ;;  %v5850_v2 = vsel %vm1499_vm5, %v1627_v28, %v1631_v36  ;;  %1919 = vst.msk [vmem:[#allocation2 + $0x448] sm:$0xfe] %vm1791_vm4, %v1628_v10  ;;  %v1074_v28 = vpop.f32.mrb[62].mxu1  ;;  %v2400_v1 = vsel %vm2352_vm3, %v2398_v42, %v2399_v21  ;;  %v3097_v62 = vrot.slane %v3009_v53, 2  ;;  %v2128_v19 = vrot.slane %v2018_v39, 1 }
 0x2c3   : > { %7042 = vst [vmem:[#allocation31_spill] sm:$0xff] %v5838_v45  ;;  %2196 = vrot.lane.b32.xlu0 %v2127_v26, %s4701_s16  ;;  %1926 = vst [vmem:[#allocation2 + $0x480] sm:$0xfe] %v1635_v22  ;;  %v1643_v63 = vsel %vm1499_vm5, %v1637_v51, %v1642_v43  ;;  %v1228_v36 = vpop.f32.mrb[63].mxu0  ;;  %v1638_v26 = vrot.slane %v1074_v28, 7  ;;  %v1076_v51 = vpop.f32.mrb[63].mxu1 }
 0x2c4   : > { %2659 = vrot.lane.b32.xlu1 %v5512_v30, %s4702_s20  ;;  %1934 = vst.msk [vmem:[#allocation2 + $0x4c0] sm:$0x1] %vm1798_vm6, %v1642_v43  ;;  %v1633_v45 = vrot.slane %v1228_v36, 7  ;;  %v3472_v43 = vld [vmem:[#allocation2 + $0x290] sm:$0xfe]  ;;  %v1640_v28 = vrot.slane %v1076_v51, 7 }
 0x2c5   : > { %1931 = vst.msk [vmem:[#allocation2 + $0x4a8] sm:$0xff] %vm1242_vm0, %v1643_v63  ;;  %v5859_v41 = vpop.permute.xlu0 %3149  ;;  %v2307_v63 = vld [vmem:[#allocation2 + $0x2b8] sm:$0x3]  ;;  %v3558_v42 = vrot.slane %v5520_v33, 1  ;;  %v3557_v36 = vrot.slane %v3472_v43, 1 }
 0x2c6   : > { %7044 = vst [vmem:[#allocation32_spill] sm:$0xff] %v5859_v41  ;;  %v5861_v11 = vpop.permute.xlu1 %2178  ;;  %v1639_v41 = vsel %vm1499_vm5, %v1635_v22, %v1638_v26  ;;  %1925 = vst.msk [vmem:[#allocation2 + $0x478] sm:$0x1] %vm1798_vm6, %v1633_v45  ;;  %v5878_v39 = vsel %vm1499_vm5, %v1636_v44, %v1640_v28  ;;  %v3099_v22 = vsel %vm2352_vm3, %v3097_v62, %v3098_v27 }
 0x2c7   : > { %7045 = vst [vmem:[#allocation33_spill] sm:$0xff] %v5861_v11  ;;  %2469 = vrot.lane.b32.xlu0 %v2400_v1, %s4700_s8  ;;  %v1634_v11 = vsel %vm1499_vm5, %v1628_v10, %v1633_v45  ;;  %1929 = vst [vmem:[#allocation2 + $0x498] sm:$0xff] %v1639_v41  ;;  %v7048_v10 = vrot.slane %v5512_v30, 1  ;;  %v2401_v41 = vrot.slane %v2307_v63, 2  ;;  %v3559_v26 = vsel %vm2079_vm2, %v3557_v36, %v3558_v42  ;;  %v2579_v63 = vld [vmem:[#allocation2 + $0x2d0] sm:$0xff]  ;;  %v3282_v36 = vld [vmem:[#allocation2 + $0x2d8] sm:$0xff] }
 0x2c8   : > { %3360 = vrot.lane.b32.xlu1 %v5520_v33, %s4700_s8  ;;  %1922 = vst.msk [vmem:[#allocation2 + $0x460] sm:$0xff] %vm1242_vm0, %v1634_v11  ;;  %1933 = vst [vmem:[#allocation2 + $0x4b8] sm:$0x1] %v1640_v28  ;;  %v3010_v33 = vld [vmem:[#allocation2 + $0x2c0] sm:$0x3] }
 0x2c9   : > { %v5873_v53 = vpop.permute.xlu0 %3610  ;;  %v2129_v45 = vsel %vm2079_vm2, %v7048_v10, %v2128_v19  ;;  %1930 = vst [vmem:[#allocation2 + $0x4a0] sm:$0xff] %v5878_v39  ;;  %v2402_v62 = vsel %vm2352_vm3, %v2399_v21, %v2401_v41  ;;  %v3100_v30 = vrot.slane %v3010_v33, 2  ;;  %v3473_v19 = vld [vmem:[#allocation2 + $0x2c0] sm:$0x1]  ;;  %v2019_v10 = vld [vmem:[#allocation2 + $0x2d0] sm:$0xfe] }
 0x2ca   : > { %7046 = vst [vmem:[#allocation34_spill] sm:$0xff] %v5873_v53  ;;  %v5875_v1 = vpop.permute.xlu1 %2451  ;;  %v2130_v33 = vrot.slane %v2019_v10, 1  ;;  %v3292_v53 = vld [vmem:[#allocation2 + $0x440] sm:$0xff] }
 0x2cb   : > { %7047 = vst [vmem:[#allocation35_spill] sm:$0xff] %v5875_v1  ;;  %3169 = vrot.lane.b32.xlu0 %v3099_v22, %s4701_s16  ;;  %v3101_v28 = vsel %vm2352_vm3, %v3098_v27, %v3100_v30  ;;  %v3560_v22 = vrot.slane %v3473_v19, 1  ;;  %v2308_v27 = vld [vmem:[#allocation2 + $0x2d0] sm:$0xfc] }
 0x2cc   : > { %2198 = vrot.lane.b32.xlu1 %v2129_v45, %s4701_s16 }
 0x2cd   : > { %v5887_v11 = vpop.permute.xlu0 %2641  ;;  %v3561_v41 = vsel %vm2079_vm2, %v3558_v42, %v3560_v22  ;;  %v3011_v42 = vld [vmem:[#allocation2 + $0x2d8] sm:$0xfc]  ;;  %v2020_v22 = vld [vmem:[#allocation2 + $0x300] sm:$0x1] }
 0x2ce   : > { %7049 = vst [vmem:[#allocation36_spill] sm:$0xff] %v5887_v11  ;;  %v5889_v44 = vpop.permute.xlu1 %3151 }
 0x2cf   : > { %7050 = vst [vmem:[#allocation37_spill] sm:$0xff] %v5889_v44  ;;  %3630 = vrot.lane.b32.xlu0 %v3559_v26, %s4702_s20  ;;  %v2131_v26 = vrot.slane %v5538_v56, 1 }
 0x2d0   : > { %2471 = vrot.lane.b32.xlu1 %v2402_v62, %s4700_s8 }
 0x2d1   : > { %v5895_v51 = vpop.permute.xlu0 %3342  ;;  %v2132_v19 = vsel %vm2079_vm2, %v2130_v33, %v2131_v26  ;;  %v2133_v33 = vrot.slane %v2020_v22, 1  ;;  %v3012_v22 = vld [vmem:[#allocation2 + $0x308] sm:$0x3] }
 0x2d2   : > { %7051 = vst [vmem:[#allocation38_spill] sm:$0xff] %v5895_v51  ;;  %v5897_v43 = vpop.permute.xlu1 %3612  ;;  %v3735_v51 = vld [vmem:[#allocation2 + $0x118] sm:$0x3] }
 0x2d3   : > { %7052 = vst [vmem:[#allocation39_spill] sm:$0xff] %v5897_v43  ;;  %2661 = vrot.lane.b32.xlu0 %v2579_v63, %s4702_s20  ;;  %v2403_v63 = vrot.slane %v2308_v27, 2  ;;  %v3102_v43 = vrot.slane %v3011_v42, 2  ;;  %v3474_v27 = vld [vmem:[#allocation2 + $0x2d8] sm:$0xfe] }
 0x2d4   : > { %3171 = vrot.lane.b32.xlu1 %v3101_v28, %s4701_s16  ;;  %v2404_v28 = vrot.slane %v5538_v56, 2  ;;  %v3562_v42 = vrot.slane %v3474_v27, 1 }
 0x2d5   : > { %v5902_v21 = vpop.permute.xlu0 %2180 }
 0x2d6   : > { %7053 = vst [vmem:[#allocation40_spill] sm:$0xff] %v5902_v21  ;;  %v5904_v45 = vpop.permute.xlu1 %2643 }
 0x2d7   : > { %7054 = vst [vmem:[#allocation41_spill] sm:$0xff] %v5904_v45  ;;  %3362 = vrot.lane.b32.xlu0 %v3282_v36, %s4700_s8 }
 0x2d8   : > { %3632 = vrot.lane.b32.xlu1 %v3561_v41, %s4702_s20  ;;  %v2405_v41 = vsel %vm2352_vm3, %v2403_v63, %v2404_v28  ;;  %v2134_v63 = vsel %vm2079_vm2, %v2131_v26, %v2133_v33  ;;  %v2581_v26 = vld [vmem:[#allocation2 + $0x318] sm:$0xff] }
 0x2d9   : > { %v5910_v62 = vpop.permute.xlu0 %2453 }
 0x2da   : > { %7055 = vst [vmem:[#allocation42_spill] sm:$0xff] %v5910_v62  ;;  %v5912_v30 = vpop.permute.xlu1 %3344 }
 0x2db   : > { %7056 = vst [vmem:[#allocation43_spill] sm:$0xff] %v5912_v30  ;;  %2200 = vrot.lane.b32.xlu0 %v2132_v19, %s4701_s16  ;;  %v3103_v30 = vrot.slane %v5544_v61, 2  ;;  %v2309_v19 = vld [vmem:[#allocation2 + $0x300] sm:$0x3] }
 0x2dc   : > { %2663 = vrot.lane.b32.xlu1 %v5538_v56, %s4702_s20  ;;  %v3563_v56 = vrot.slane %v5544_v61, 1  ;;  %v2406_v44 = vrot.slane %v2309_v19, 2 }
 0x2dd   : > { %v5919_v10 = vpop.permute.xlu0 %3153 }
 0x2de   : > { %7057 = vst [vmem:[#allocation44_spill] sm:$0xff] %v5919_v10  ;;  %v5921_v36 = vpop.permute.xlu1 %2182 }
 0x2df   : > { %7058 = vst [vmem:[#allocation45_spill] sm:$0xff] %v5921_v36  ;;  %2473 = vrot.lane.b32.xlu0 %v2405_v41, %s4700_s8  ;;  %v3104_v36 = vsel %vm2352_vm3, %v3102_v43, %v3103_v30  ;;  %v3475_v43 = vld [vmem:[#allocation2 + $0x308] sm:$0x1] }
 0x2e0   : > { %3364 = vrot.lane.b32.xlu1 %v5544_v61, %s4700_s8  ;;  %v3564_v61 = vsel %vm2079_vm2, %v3562_v42, %v3563_v56  ;;  %v3565_v19 = vrot.slane %v3475_v43, 1 }
 0x2e1   : > { %v5929_v45 = vpop.permute.xlu0 %3614 }
 0x2e2   : > { %7059 = vst [vmem:[#allocation46_spill] sm:$0xff] %v5929_v45  ;;  %v5931_v10 = vpop.permute.xlu1 %2455  ;;  %v2407_v45 = vsel %vm2352_vm3, %v2404_v28, %v2406_v44  ;;  %v3284_v44 = vld [vmem:[#allocation2 + $0x320] sm:$0xff] }
 0x2e3   : > { %7060 = vst [vmem:[#allocation47_spill] sm:$0xff] %v5931_v10  ;;  %3173 = vrot.lane.b32.xlu0 %v3104_v36, %s4701_s16  ;;  %v3105_v10 = vrot.slane %v3012_v22, 2 }
 0x2e4   : > { %2202 = vrot.lane.b32.xlu1 %v2134_v63, %s4701_s16  ;;  %v2021_v63 = vld [vmem:[#allocation2 + $0x318] sm:$0xfe] }
 0x2e5   : > { %v5937_v41 = vpop.permute.xlu0 %2645  ;;  %v3106_v27 = vsel %vm2352_vm3, %v3103_v30, %v3105_v10  ;;  %v2135_v22 = vrot.slane %v2021_v63, 1  ;;  %v2310_v30 = vld [vmem:[#allocation2 + $0x318] sm:$0xfc] }
 0x2e6   : > { %7061 = vst [vmem:[#allocation48_spill] sm:$0xff] %v5937_v41  ;;  %v5939_v1 = vpop.permute.xlu1 %3155  ;;  %v2761_v41 = vld [vmem:[#allocation2 + $0x110] sm:$0x1] }
 0x2e7   : > { %7062 = vst [vmem:[#allocation49_spill] sm:$0xff] %v5939_v1  ;;  %3634 = vrot.lane.b32.xlu0 %v3564_v61, %s4702_s20  ;;  %v2136_v61 = vrot.slane %v5581_v49, 1  ;;  %v2409_v1 = vrot.slane %v5581_v49, 2 }
 0x2e8   : > { %2475 = vrot.lane.b32.xlu1 %v2407_v45, %s4700_s8  ;;  %v3566_v45 = vsel %vm2079_vm2, %v3563_v56, %v3565_v19  ;;  %v3013_v56 = vld [vmem:[#allocation2 + $0x320] sm:$0xfc]  ;;  %v2022_v19 = vld [vmem:[#allocation2 + $0x348] sm:$0x1] }
 0x2e9   : > { %v5945_v33 = vpop.permute.xlu0 %3346 }
 0x2ea   : > { %7063 = vst [vmem:[#allocation50_spill] sm:$0xff] %v5945_v33  ;;  %v5947_v36 = vpop.permute.xlu1 %3616 }
 0x2eb   : > { %7064 = vst [vmem:[#allocation51_spill] sm:$0xff] %v5947_v36  ;;  %2665 = vrot.lane.b32.xlu0 %v2581_v26, %s4702_s20  ;;  %v2137_v26 = vsel %vm2079_vm2, %v2135_v22, %v2136_v61  ;;  %v2138_v22 = vrot.slane %v2022_v19, 1  ;;  %v3014_v19 = vld [vmem:[#allocation2 + $0x350] sm:$0x3] }
 0x2ec   : > { %3175 = vrot.lane.b32.xlu1 %v3106_v27, %s4701_s16  ;;  %v2408_v27 = vrot.slane %v2310_v30, 2  ;;  %v3476_v30 = vld [vmem:[#allocation2 + $0x320] sm:$0xfe] }
 0x2ed   : > { %v5952_v28 = vpop.permute.xlu0 %2184 }
 0x2ee   : > { %7065 = vst [vmem:[#allocation52_spill] sm:$0xff] %v5952_v28  ;;  %v5954_v42 = vpop.permute.xlu1 %2647 }
 0x2ef   : > { %7066 = vst [vmem:[#allocation53_spill] sm:$0xff] %v5954_v42  ;;  %3366 = vrot.lane.b32.xlu0 %v3284_v44, %s4700_s8  ;;  %v3107_v42 = vrot.slane %v3013_v56, 2  ;;  %v3567_v56 = vrot.slane %v3476_v30, 1 }
 0x2f0   : > { %3636 = vrot.lane.b32.xlu1 %v3566_v45, %s4702_s20  ;;  %v2410_v45 = vsel %vm2352_vm3, %v2408_v27, %v2409_v1  ;;  %v2139_v27 = vsel %vm2079_vm2, %v2136_v61, %v2138_v22  ;;  %v2583_v22 = vld [vmem:[#allocation2 + $0x360] sm:$0xff] }
 0x2f1   : > { %v5960_v10 = vpop.permute.xlu0 %2457 }
 0x2f2   : > { %7067 = vst [vmem:[#allocation54_spill] sm:$0xff] %v5960_v10  ;;  %v5962_v43 = vpop.permute.xlu1 %3348 }
 0x2f3   : > { %7068 = vst [vmem:[#allocation55_spill] sm:$0xff] %v5962_v43  ;;  %2204 = vrot.lane.b32.xlu0 %v2137_v26, %s4701_s16  ;;  %v3108_v43 = vrot.slane %v5589_v58, 2  ;;  %v2311_v26 = vld [vmem:[#allocation2 + $0x348] sm:$0x3] }
 0x2f4   : > { %2667 = vrot.lane.b32.xlu1 %v5581_v49, %s4702_s20  ;;  %v3568_v49 = vrot.slane %v5589_v58, 1  ;;  %v2411_v33 = vrot.slane %v2311_v26, 2 }
 0x2f5   : > { %v5969_v63 = vpop.permute.xlu0 %3157 }
 0x2f6   : > { %7069 = vst [vmem:[#allocation56_spill] sm:$0xff] %v5969_v63  ;;  %v5971_v44 = vpop.permute.xlu1 %2186 }
 0x2f7   : > { %7070 = vst [vmem:[#allocation57_spill] sm:$0xff] %v5971_v44  ;;  %2477 = vrot.lane.b32.xlu0 %v2410_v45, %s4700_s8  ;;  %v3109_v44 = vsel %vm2352_vm3, %v3107_v42, %v3108_v43  ;;  %v3477_v42 = vld [vmem:[#allocation2 + $0x350] sm:$0x1] }
 0x2f8   : > { %3368 = vrot.lane.b32.xlu1 %v5589_v58, %s4700_s8  ;;  %v3569_v58 = vsel %vm2079_vm2, %v3567_v56, %v3568_v49  ;;  %v3570_v26 = vrot.slane %v3477_v42, 1  ;;  %v3286_v56 = vld [vmem:[#allocation2 + $0x368] sm:$0xff] }
 0x2f9   : > { %v5979_v36 = vpop.permute.xlu0 %3618 }
 0x2fa   : > { %7071 = vst [vmem:[#allocation58_spill] sm:$0xff] %v5979_v36  ;;  %v5981_v63 = vpop.permute.xlu1 %2459  ;;  %v2412_v36 = vsel %vm2352_vm3, %v2409_v1, %v2411_v33 }
 0x2fb   : > { %7072 = vst [vmem:[#allocation59_spill] sm:$0xff] %v5981_v63  ;;  %3177 = vrot.lane.b32.xlu0 %v3109_v44, %s4701_s16  ;;  %v3110_v63 = vrot.slane %v3014_v19, 2 }
 0x2fc   : > { %2206 = vrot.lane.b32.xlu1 %v2139_v27, %s4701_s16  ;;  %v2023_v27 = vld [vmem:[#allocation2 + $0x360] sm:$0xfe] }
 0x2fd   : > { %v5987_v45 = vpop.permute.xlu0 %2649  ;;  %v3111_v30 = vsel %vm2352_vm3, %v3108_v43, %v3110_v63  ;;  %v2140_v19 = vrot.slane %v2023_v27, 1  ;;  %v2312_v43 = vld [vmem:[#allocation2 + $0x360] sm:$0xfc] }
 0x2fe   : > { %7073 = vst [vmem:[#allocation60_spill] sm:$0xff] %v5987_v45  ;;  %v5989_v10 = vpop.permute.xlu1 %3159 }
 0x2ff   : > { %7074 = vst [vmem:[#allocation61_spill] sm:$0xff] %v5989_v10  ;;  %3638 = vrot.lane.b32.xlu0 %v3569_v58, %s4702_s20  ;;  %v2141_v58 = vrot.slane %v5609_v20, 1 }
 0x300   : > { %2479 = vrot.lane.b32.xlu1 %v2412_v36, %s4700_s8  ;;  %v3571_v36 = vsel %vm2079_vm2, %v3568_v49, %v3570_v26  ;;  %v3015_v49 = vld [vmem:[#allocation2 + $0x368] sm:$0xfc]  ;;  %v2024_v26 = vld [vmem:[#allocation2 + $0x390] sm:$0x1] }
 0x301   : > { %v5995_v61 = vpop.permute.xlu0 %3350  ;;  %v3112_v10 = vrot.slane %v3015_v49, 2 }
 0x302   : > { %7075 = vst [vmem:[#allocation62_spill] sm:$0xff] %v5995_v61  ;;  %v5997_v44 = vpop.permute.xlu1 %3620 }
 0x303   : > { %7076 = vst [vmem:[#allocation63_spill] sm:$0xff] %v5997_v44  ;;  %2669 = vrot.lane.b32.xlu0 %v2583_v22, %s4702_s20  ;;  %v2142_v22 = vsel %vm2079_vm2, %v2140_v19, %v2141_v58  ;;  %v2414_v44 = vrot.slane %v5609_v20, 2  ;;  %v2143_v19 = vrot.slane %v2024_v26, 1 }
 0x304   : > { %3179 = vrot.lane.b32.xlu1 %v3111_v30, %s4701_s16  ;;  %v2413_v30 = vrot.slane %v2312_v43, 2  ;;  %v3478_v43 = vld [vmem:[#allocation2 + $0x368] sm:$0xfe] }
 0x305   : > { %v6002_v1 = vpop.permute.xlu0 %2188  ;;  %v2144_v49 = vsel %vm2079_vm2, %v2141_v58, %v2143_v19  ;;  %v2585_v58 = vld [vmem:[#allocation2 + $0x3a8] sm:$0xff] }
 0x306   : > { %7077 = vst [vmem:[#allocation64_spill] sm:$0xff] %v6002_v1  ;;  %v6004_v33 = vpop.permute.xlu1 %2651 }
 0x307   : > { %7078 = vst [vmem:[#allocation65_spill] sm:$0xff] %v6004_v33  ;;  %3370 = vrot.lane.b32.xlu0 %v3286_v56, %s4700_s8 }
 0x308   : > { %3640 = vrot.lane.b32.xlu1 %v3571_v36, %s4702_s20  ;;  %v2415_v36 = vsel %vm2352_vm3, %v2413_v30, %v2414_v44 }
 0x309   : > { %v6010_v63 = vpop.permute.xlu0 %2461 }
 0x30a   : > { %7079 = vst [vmem:[#allocation66_spill] sm:$0xff] %v6010_v63  ;;  %v6012_v42 = vpop.permute.xlu1 %3352 }
 0x30b   : > { %7080 = vst [vmem:[#allocation67_spill] sm:$0xff] %v6012_v42  ;;  %2208 = vrot.lane.b32.xlu0 %v2142_v22, %s4701_s16  ;;  %v3113_v42 = vrot.slane %v5616_v24, 2  ;;  %v2313_v22 = vld [vmem:[#allocation2 + $0x390] sm:$0x3] }
 0x30c   : > { %2671 = vrot.lane.b32.xlu1 %v5609_v20, %s4702_s20  ;;  %v6029_v20 = vrot.slane %v5616_v24, 1  ;;  %v2416_v26 = vrot.slane %v2313_v22, 2 }
 0x30d   : > { %v6019_v27 = vpop.permute.xlu0 %3161  ;;  %v3114_v30 = vsel %vm2352_vm3, %v3112_v10, %v3113_v42  ;;  %v3479_v10 = vld [vmem:[#allocation2 + $0x398] sm:$0x1] }
 0x30e   : > { %7081 = vst [vmem:[#allocation68_spill] sm:$0xff] %v6019_v27  ;;  %v6021_v56 = vpop.permute.xlu1 %2190  ;;  %7083 = vst [vmem:[#allocation70_spill] sm:$0xff] %v6029_v20 }
 0x30f   : > { %7082 = vst [vmem:[#allocation69_spill] sm:$0xff] %v6021_v56  ;;  %2481 = vrot.lane.b32.xlu0 %v2415_v36, %s4700_s8  ;;  %v3572_v56 = vrot.slane %v3478_v43, 1  ;;  %v3016_v36 = vld [vmem:[#allocation2 + $0x398] sm:$0x3] }
 0x310   : > { %3372 = vrot.lane.b32.xlu1 %v5616_v24, %s4700_s8 }
 0x311   : > { %v6031_v33 = vpop.permute.xlu0 %3622  ;;  %v3574_v24 = vsel %vm2079_vm2, %v3572_v56, %v6029_v20  ;;  %v2025_v56 = vld [vmem:[#allocation2 + $0x3a8] sm:$0xfe] }
 0x312   : > { %7084 = vst [vmem:[#allocation71_spill] sm:$0xff] %v6031_v33  ;;  %v6033_v27 = vpop.permute.xlu1 %2463  ;;  %v3115_v33 = vrot.slane %v3016_v36, 2  ;;  %v2145_v36 = vrot.slane %v2025_v56, 1  ;;  %v2026_v56 = vld [vmem:[#allocation2 + $0x3d8] sm:$0x1] }
 0x313   : > { %7085 = vst [vmem:[#allocation72_spill] sm:$0xff] %v6033_v27  ;;  %3181 = vrot.lane.b32.xlu0 %v3114_v30, %s4701_s16  ;;  %v2417_v27 = vsel %vm2352_vm3, %v2414_v44, %v2416_v26  ;;  %v3575_v30 = vrot.slane %v3479_v10, 1  ;;  %v3288_v44 = vld [vmem:[#allocation2 + $0x3b0] sm:$0xff] }
 0x314   : > { %2210 = vrot.lane.b32.xlu1 %v2144_v49, %s4701_s16  ;;  %v3116_v22 = vsel %vm2352_vm3, %v3113_v42, %v3115_v33  ;;  %v2314_v33 = vld [vmem:[#allocation2 + $0x3a8] sm:$0xfc] }
 0x315   : > { %v6039_v61 = vpop.permute.xlu0 %2653 }
 0x316   : > { %7086 = vst [vmem:[#allocation73_spill] sm:$0xff] %v6039_v61  ;;  %v6041_v63 = vpop.permute.xlu1 %3163  ;;  %v3730_v61 = vld [vmem:[#allocation2 + $0xa0] sm:$0xfc] }
 0x317   : > { %7087 = vst [vmem:[#allocation74_spill] sm:$0xff] %v6041_v63  ;;  %3642 = vrot.lane.b32.xlu0 %v3574_v24, %s4702_s20  ;;  %v2146_v24 = vrot.slane %v5707_v57, 1 }
 0x318   : > { %2483 = vrot.lane.b32.xlu1 %v2417_v27, %s4700_s8  ;;  %v3576_v27 = vsel %vm2079_vm2, %v6029_v20, %v3575_v30  ;;  %v3017_v30 = vld [vmem:[#allocation2 + $0x3b0] sm:$0xfc] }
 0x319   : > { %v6048_v19 = vpop.permute.xlu0 %3354  ;;  %v3117_v63 = vrot.slane %v3017_v30, 2 }
 0x31a   : > { %7088 = vst [vmem:[#allocation75_spill] sm:$0xff] %v6048_v19  ;;  %v6050_v43 = vpop.permute.xlu1 %3624 }
 0x31b   : > { %7089 = vst [vmem:[#allocation76_spill] sm:$0xff] %v6050_v43  ;;  %2673 = vrot.lane.b32.xlu0 %v2585_v58, %s4702_s20  ;;  %v2147_v58 = vsel %vm2079_vm2, %v2145_v36, %v2146_v24  ;;  %v2419_v43 = vrot.slane %v5707_v57, 2  ;;  %v2148_v36 = vrot.slane %v2026_v56, 1 }
 0x31c   : > { %3183 = vrot.lane.b32.xlu1 %v3116_v22, %s4701_s16  ;;  %v2418_v22 = vrot.slane %v2314_v33, 2  ;;  %v3480_v33 = vld [vmem:[#allocation2 + $0x3b0] sm:$0xfe] }
 0x31d   : > { %v6055_v49 = vpop.permute.xlu0 %2192  ;;  %v2149_v30 = vsel %vm2079_vm2, %v2146_v24, %v2148_v36 }
 0x31e   : > { %7090 = vst [vmem:[#allocation77_spill] sm:$0xff] %v6055_v49  ;;  %v6057_v26 = vpop.permute.xlu1 %2655  ;;  %v2420_v20 = vsel %vm2352_vm3, %v2418_v22, %v2419_v43  ;;  %v3732_v49 = vld [vmem:[#allocation2 + $0xd0] sm:$0x3] }
 0x31f   : > { %7091 = vst [vmem:[#allocation78_spill] sm:$0xff] %v6057_v26  ;;  %3374 = vrot.lane.b32.xlu0 %v3288_v44, %s4700_s8 }
 0x320   : > { %3644 = vrot.lane.b32.xlu1 %v3576_v27, %s4702_s20 }
 0x321   : > { %v6064_v42 = vpop.permute.xlu0 %2465 }
 0x322   : > { %7092 = vst [vmem:[#allocation79_spill] sm:$0xff] %v6064_v42  ;;  %v6066_v10 = vpop.permute.xlu1 %3356 }
 0x323   : > { %7093 = vst [vmem:[#allocation80_spill] sm:$0xff] %v6066_v10  ;;  %2212 = vrot.lane.b32.xlu0 %v2147_v58, %s4701_s16  ;;  %v3118_v10 = vrot.slane %v5716_v47, 2  ;;  %v2315_v58 = vld [vmem:[#allocation2 + $0x3d8] sm:$0x3] }
 0x324   : > { %2675 = vrot.lane.b32.xlu1 %v5707_v57, %s4702_s20  ;;  %v6083_v57 = vrot.slane %v5716_v47, 1  ;;  %v2421_v56 = vrot.slane %v2315_v58, 2 }
 0x325   : > { %v6073_v44 = vpop.permute.xlu0 %3165  ;;  %v3119_v22 = vsel %vm2352_vm3, %v3117_v63, %v3118_v10  ;;  %v3481_v63 = vld [vmem:[#allocation2 + $0x3e0] sm:$0x1] }
 0x326   : > { %7094 = vst [vmem:[#allocation81_spill] sm:$0xff] %v6073_v44  ;;  %v6075_v27 = vpop.permute.xlu1 %2194  ;;  %7096 = vst [vmem:[#allocation83_spill] sm:$0xff] %v6083_v57 }
 0x327   : > { %7095 = vst [vmem:[#allocation82_spill] sm:$0xff] %v6075_v27  ;;  %2485 = vrot.lane.b32.xlu0 %v2420_v20, %s4700_s8  ;;  %v3577_v27 = vrot.slane %v3480_v33, 1  ;;  %v3018_v20 = vld [vmem:[#allocation2 + $0x3e0] sm:$0x3]  ;;  %v2587_v33 = vld [vmem:[#allocation2 + $0x3f0] sm:$0xff] }
 0x328   : > { %3376 = vrot.lane.b32.xlu1 %v5716_v47, %s4700_s8 }
 0x329   : > { %v6085_v26 = vpop.permute.xlu0 %3626  ;;  %v3579_v47 = vsel %vm2079_vm2, %v3577_v27, %v6083_v57  ;;  %v2027_v27 = vld [vmem:[#allocation2 + $0x3f0] sm:$0xfe] }
 0x32a   : > { %7097 = vst [vmem:[#allocation84_spill] sm:$0xff] %v6085_v26  ;;  %v6087_v44 = vpop.permute.xlu1 %2467  ;;  %v3120_v26 = vrot.slane %v3018_v20, 2  ;;  %v2150_v20 = vrot.slane %v2027_v27, 1  ;;  %v2028_v27 = vld [vmem:[#allocation2 + $0x420] sm:$0x1] }
 0x32b   : > { %7098 = vst [vmem:[#allocation85_spill] sm:$0xff] %v6087_v44  ;;  %3185 = vrot.lane.b32.xlu0 %v3119_v22, %s4701_s16  ;;  %v2422_v44 = vsel %vm2352_vm3, %v2419_v43, %v2421_v56  ;;  %v3580_v22 = vrot.slane %v3481_v63, 1  ;;  %v3290_v56 = vld [vmem:[#allocation2 + $0x3f8] sm:$0xff] }
 0x32c   : > { %2214 = vrot.lane.b32.xlu1 %v2149_v30, %s4701_s16  ;;  %v3121_v58 = vsel %vm2352_vm3, %v3118_v10, %v3120_v26  ;;  %v2316_v26 = vld [vmem:[#allocation2 + $0x3f0] sm:$0xfc] }
 0x32d   : > { %v6093_v19 = vpop.permute.xlu0 %2657 }
 0x32e   : > { %7099 = vst [vmem:[#allocation86_spill] sm:$0xff] %v6093_v19  ;;  %v6095_v42 = vpop.permute.xlu1 %3167 }
 0x32f   : > { %7100 = vst [vmem:[#allocation87_spill] sm:$0xff] %v6095_v42  ;;  %3646 = vrot.lane.b32.xlu0 %v3579_v47, %s4702_s20  ;;  %v2151_v47 = vrot.slane %v5735_v6, 1 }
 0x330   : > { %2487 = vrot.lane.b32.xlu1 %v2422_v44, %s4700_s8  ;;  %v3581_v44 = vsel %vm2079_vm2, %v6083_v57, %v3580_v22  ;;  %v3019_v22 = vld [vmem:[#allocation2 + $0x3f8] sm:$0xfc] }
 0x331   : > { %v6102_v24 = vpop.permute.xlu0 %3358  ;;  %v3122_v42 = vrot.slane %v3019_v22, 2 }
 0x332   : > { %7101 = vst [vmem:[#allocation88_spill] sm:$0xff] %v6102_v24  ;;  %v6104_v36 = vpop.permute.xlu1 %3628 }
 0x333   : > { %7102 = vst [vmem:[#allocation89_spill] sm:$0xff] %v6104_v36  ;;  %2677 = vrot.lane.b32.xlu0 %v2587_v33, %s4702_s20  ;;  %v2152_v33 = vsel %vm2079_vm2, %v2150_v20, %v2151_v47  ;;  %v2424_v36 = vrot.slane %v5735_v6, 2  ;;  %v2153_v20 = vrot.slane %v2028_v27, 1 }
 0x334   : > { %3187 = vrot.lane.b32.xlu1 %v3121_v58, %s4701_s16  ;;  %v2423_v58 = vrot.slane %v2316_v26, 2  ;;  %v3482_v26 = vld [vmem:[#allocation2 + $0x3f8] sm:$0xfe] }
 0x335   : > { %v6109_v43 = vpop.permute.xlu0 %2196  ;;  %v2154_v22 = vsel %vm2079_vm2, %v2151_v47, %v2153_v20  ;;  %v3483_v47 = vld [vmem:[#allocation2 + $0x428] sm:$0x1] }
 0x336   : > { %7103 = vst [vmem:[#allocation90_spill] sm:$0xff] %v6109_v43  ;;  %v6111_v30 = vpop.permute.xlu1 %2659  ;;  %v2425_v57 = vsel %vm2352_vm3, %v2423_v58, %v2424_v36  ;;  %v2755_v43 = vld [vmem:[#allocation2 + $0x80] sm:$0x1]  ;;  %v4569_v20 = vld [vmem:[#allocation2 + $0x8] sm:$0xff]  ;;  %v3585_v1 = vrot.slane %v3483_v47, 1 }
 0x337   : > { %7104 = vst [vmem:[#allocation91_spill] sm:$0xff] %v6111_v30  ;;  %3378 = vrot.lane.b32.xlu0 %v3290_v56, %s4700_s8  ;;  %v2852_v19 = vrot.slane %v2755_v43, 1 }
 0x338   : > { %3648 = vrot.lane.b32.xlu1 %v3581_v44, %s4702_s20 }
 0x339   : > { %v6118_v10 = vpop.permute.xlu0 %2469 }
 0x33a   : > { %7105 = vst [vmem:[#allocation92_spill] sm:$0xff] %v6118_v10  ;;  %v6120_v63 = vpop.permute.xlu1 %3360 }
 0x33b   : > { %7106 = vst [vmem:[#allocation93_spill] sm:$0xff] %v6120_v63  ;;  %2216 = vrot.lane.b32.xlu0 %v2152_v33, %s4701_s16  ;;  %v3123_v63 = vrot.slane %v5749_v40, 2  ;;  %v2317_v33 = vld [vmem:[#allocation2 + $0x420] sm:$0x3] }
 0x33c   : > { %2679 = vrot.lane.b32.xlu1 %v5735_v6, %s4702_s20  ;;  %v6137_v6 = vrot.slane %v5749_v40, 1  ;;  %v2426_v27 = vrot.slane %v2317_v33, 2  ;;  %v2756_v33 = vld [vmem:[#allocation2 + $0x98] sm:$0xfe] }
 0x33d   : > { %v6127_v56 = vpop.permute.xlu0 %3169  ;;  %v3124_v58 = vsel %vm2352_vm3, %v3122_v42, %v3123_v63  ;;  %v2854_v28 = vrot.slane %v2756_v33, 1  ;;  %v3829_v33 = vrot.slane %v3732_v49, 2 }
 0x33e   : > { %7107 = vst [vmem:[#allocation94_spill] sm:$0xff] %v6127_v56  ;;  %v6129_v44 = vpop.permute.xlu1 %2198  ;;  %7109 = vst [vmem:[#allocation96_spill] sm:$0xff] %v6137_v6  ;;  %v2427_v42 = vsel %vm2352_vm3, %v2424_v36, %v2426_v27 }
 0x33f   : > { %7108 = vst [vmem:[#allocation95_spill] sm:$0xff] %v6129_v44  ;;  %2489 = vrot.lane.b32.xlu0 %v2425_v57, %s4700_s8  ;;  %v3582_v44 = vrot.slane %v3482_v26, 1  ;;  %v3020_v57 = vld [vmem:[#allocation2 + $0x428] sm:$0x3]  ;;  %v2257_v26 = vadd.f32 %v4569_v20, %v5604_v16 }
 0x340   : > { %3380 = vrot.lane.b32.xlu1 %v5749_v40, %s4700_s8  ;;  %v2753_v40 = vld [vmem:[#allocation2 + $0x50] sm:$0xfe]  ;;  %v4570_v16 = vld [vmem:[#allocation2 + $0x68] sm:$0xff] }
 0x341   : > { %v6139_v30 = vpop.permute.xlu0 %3630  ;;  %v2850_v45 = vrot.slane %v4570_v16, 1  ;;  %v6166_v43 = vadd.f32 %v5629_v37, %v2257_v26  ;;  %v3738_v16 = vld [vmem:[#allocation2 + $0x160] sm:$0x3] }
 0x342   : > { %7110 = vst [vmem:[#allocation97_spill] sm:$0xff] %v6139_v30  ;;  %v6141_v56 = vpop.permute.xlu1 %2471  ;;  %v3125_v30 = vrot.slane %v3020_v57, 2  ;;  %v3733_v57 = vld [vmem:[#allocation2 + $0xe8] sm:$0xfc] }
 0x343   : > { %7111 = vst [vmem:[#allocation98_spill] sm:$0xff] %v6141_v56  ;;  %3189 = vrot.lane.b32.xlu0 %v3124_v58, %s4701_s16  ;;  %v3584_v56 = vsel %vm2079_vm2, %v3582_v44, %v6137_v6  ;;  %v3731_v58 = vld [vmem:[#allocation2 + $0xb8] sm:$0xff]  ;;  %v2758_v44 = vld [vmem:[#allocation2 + $0xc8] sm:$0x1]  ;;  %v6175_v47 = vsel %vm2079_vm2, %v2850_v45, %v2852_v19  ;;  %v3831_v49 = vrot.slane %v3733_v57, 2 }
 0x344   : > { %2218 = vrot.lane.b32.xlu1 %v2154_v22, %s4701_s16  ;;  %v2589_v22 = vld [vmem:[#allocation2 + $0x438] sm:$0xff] }
 0x345   : > { %v6147_v24 = vpop.permute.xlu0 %2661 }
 0x346   : > { %7112 = vst [vmem:[#allocation99_spill] sm:$0xff] %v6147_v24  ;;  %v6149_v10 = vpop.permute.xlu1 %3171  ;;  %v2849_v24 = vrot.slane %v2753_v40, 1  ;;  %v3827_v40 = vrot.slane %v3731_v58, 2  ;;  %v3826_v58 = vrot.slane %v3730_v61, 2  ;;  %v2318_v61 = vld [vmem:[#allocation2 + $0x438] sm:$0xfc] }
 0x347   : > { %7113 = vst [vmem:[#allocation100_spill] sm:$0xff] %v6149_v10  ;;  %3650 = vrot.lane.b32.xlu0 %v3584_v56, %s4702_s20  ;;  %v2256_v10 = vadd.f32 %v4569_v20, %v5577_v48  ;;  %v2759_v56 = vld [vmem:[#allocation2 + $0xe0] sm:$0xfe]  ;;  %v2029_v48 = vld [vmem:[#allocation2 + $0x438] sm:$0xfe]  ;;  %v2857_v20 = vrot.slane %v2758_v44, 1 }
 0x348   : > { %2491 = vrot.lane.b32.xlu1 %v2427_v42, %s4700_s8  ;;  %v3126_v42 = vsel %vm2352_vm3, %v3123_v63, %v3125_v30  ;;  %v6172_v63 = vsel %vm2079_vm2, %v2849_v24, %v2850_v45  ;;  %v6183_v44 = vld [vmem:[#allocation2 + $0x148] sm:$0xff]  ;;  %v2155_v24 = vrot.slane %v2029_v48, 1  ;;  %v6190_v45 = vsel %vm2079_vm2, %v2854_v28, %v5427_v52  ;;  %v3739_v28 = vld [vmem:[#allocation2 + $0x178] sm:$0xfc] }
 0x349   : > { %v6158_v36 = vpop.permute.xlu0 %3362  ;;  %v6169_v30 = vadd.f32 %v5627_v35, %v2256_v10  ;;  %v3586_v35 = vsel %vm2079_vm2, %v6137_v6, %v3585_v1  ;;  %v2859_v19 = vrot.slane %v2759_v56, 1  ;;  %v6199_v1 = vsel %vm2079_vm2, %v5427_v52, %v2857_v20  ;;  %v2765_v6 = vld [vmem:[#allocation2 + $0x170] sm:$0xfe]  ;;  %v3741_v20 = vld [vmem:[#allocation2 + $0x1a8] sm:$0x3] }
 0x34a   : > { %7114 = vst [vmem:[#allocation101_spill] sm:$0xff] %v6158_v36  ;;  %v6160_v27 = vpop.permute.xlu1 %3632  ;;  %v2762_v36 = vld [vmem:[#allocation2 + $0x128] sm:$0xfe]  ;;  %v2862_v48 = vrot.slane %v2761_v41, 1  ;;  %v3834_v10 = vrot.slane %v3735_v51, 2  ;;  %v6202_v56 = vsel %vm2352_vm3, %v3827_v40, %v3829_v33  ;;  %v7122_v51 = vrot.slane %v5841_v12, 1 }
 0x34b   : > { %7115 = vst [vmem:[#allocation102_spill] sm:$0xff] %v6160_v27  ;;  %2681 = vrot.lane.b32.xlu0 %v2589_v22, %s4702_s20  ;;  %v3734_v27 = vld [vmem:[#allocation2 + $0x100] sm:$0xff]  ;;  %v3736_v22 = vld [vmem:[#allocation2 + $0x130] sm:$0xfc]  ;;  %7119 = vst [vmem:[#allocation106_spill] sm:$0xff] %v6202_v56  ;;  %v2428_v21 = vrot.slane %v2318_v61, 2 }
 0x34c   : > { %3191 = vrot.lane.b32.xlu1 %v3126_v42, %s4701_s16  ;;  %v6177_v42 = vld [vmem:[#allocation2 + $0x158] sm:$0x1]  ;;  %v3832_v62 = vrot.slane %v3734_v27, 2  ;;  %v2864_v27 = vrot.slane %v2762_v36, 1  ;;  %v3836_v57 = vrot.slane %v3736_v22, 2  ;;  %v2157_v41 = vsel %vm2079_vm2, %v2155_v24, %v7122_v51 }
 0x34d   : > { %v6179_v37 = vpop.permute.xlu0 %2200  ;;  %v2867_v52 = vrot.slane %v6177_v42, 1  ;;  %v6216_v36 = vsel %vm2079_vm2, %v2859_v19, %v5489_v3  ;;  %v3839_v22 = vrot.slane %v3738_v16, 2  ;;  %v3021_v42 = vld [vmem:[#allocation2 + $0x440] sm:$0xfc]  ;;  %v2030_v24 = vld [vmem:[#allocation2 + $0x468] sm:$0x1]  ;;  %v6228_v61 = vsel %vm2079_vm2, %v5489_v3, %v2862_v48 }
 0x34e   : > { %7116 = vst [vmem:[#allocation103_spill] sm:$0xff] %v6179_v37  ;;  %v6181_v26 = vpop.permute.xlu1 %2663  ;;  %v2767_v37 = vld [vmem:[#allocation2 + $0x1a0] sm:$0x1]  ;;  %v6219_v33 = vsel %vm2352_vm3, %v3831_v49, %v3832_v62  ;;  %7124 = vst [vmem:[#allocation110_spill] sm:$0xff] %v6228_v61  ;;  %v6231_v19 = vsel %vm2352_vm3, %v3832_v62, %v3834_v10  ;;  %v3841_v49 = vrot.slane %v3739_v28, 2  ;;  %v7129_v28 = vrot.slane %v5841_v12, 2 }
 0x34f   : > { %7117 = vst [vmem:[#allocation104_spill] sm:$0xff] %v6181_v26  ;;  %3382 = vrot.lane.b32.xlu0 %v3292_v53, %s4700_s8  ;;  %v6195_v26 = vsel %vm2352_vm3, %v3826_v58, %v3827_v40  ;;  %v3837_v53 = vrot.slane %v6183_v44, 2  ;;  %7123 = vst [vmem:[#allocation109_spill] sm:$0xff] %v6219_v33  ;;  %v2869_v44 = vrot.slane %v2765_v6, 1  ;;  %v2768_v16 = vld [vmem:[#allocation2 + $0x1b8] sm:$0xfe]  ;;  %v6235_v40 = vsel %vm2079_vm2, %v2864_v27, %v5556_v38 }
 0x350   : > { %3652 = vrot.lane.b32.xlu1 %v3586_v35, %s4702_s20  ;;  %7118 = vst [vmem:[#allocation105_spill] sm:$0xff] %v6195_v26  ;;  %v3740_v35 = vld [vmem:[#allocation2 + $0x190] sm:$0xff]  ;;  %7125 = vst [vmem:[#allocation111_spill] sm:$0xff] %v6231_v19  ;;  %v3742_v6 = vld [vmem:[#allocation2 + $0x1c0] sm:$0xfc]  ;;  %v3844_v33 = vrot.slane %v3741_v20, 2 }
 0x351   : > { %v6205_v11 = vpop.permute.xlu0 %2473  ;;  %v3842_v51 = vrot.slane %v3740_v35, 2  ;;  %v2770_v56 = vld [vmem:[#allocation2 + $0x1e8] sm:$0x1]  ;;  %v3744_v26 = vld [vmem:[#allocation2 + $0x1f0] sm:$0x3]  ;;  %v2430_v35 = vsel %vm2352_vm3, %v2428_v21, %v7129_v28  ;;  %v3127_v19 = vrot.slane %v3021_v42, 2  ;;  %v6257_v20 = vsel %vm2079_vm2, %v2869_v44, %v5619_v25 }
 0x352   : > { %7120 = vst [vmem:[#allocation107_spill] sm:$0xff] %v6205_v11  ;;  %v6207_v58 = vpop.permute.xlu1 %3364  ;;  %v2872_v11 = vrot.slane %v2767_v37, 1  ;;  %v2771_v62 = vld [vmem:[#allocation2 + $0x200] sm:$0xfe]  ;;  %v3745_v10 = vld [vmem:[#allocation2 + $0x208] sm:$0xfc]  ;;  %v6250_v37 = vsel %vm2079_vm2, %v5556_v38, %v2867_v52 }
 0x353   : > { %7121 = vst [vmem:[#allocation108_spill] sm:$0xff] %v6207_v58  ;;  %v6221_v58 = vld [vmem:[#allocation2 + $0x1d8] sm:$0xff]  ;;  %2220 = vrot.lane.b32.xlu0 %v2157_v41, %s4701_s16  ;;  %v6238_v41 = vsel %vm2352_vm3, %v3836_v57, %v3837_v53  ;;  %v2158_v61 = vrot.slane %v2030_v24, 1  ;;  %v6253_v57 = vsel %vm2352_vm3, %v3837_v53, %v3839_v22  ;;  %7131 = vst [vmem:[#allocation116_spill] sm:$0xff] %v6257_v20  ;;  %v3484_v21 = vld [vmem:[#allocation2 + $0x440] sm:$0xfe] }
 0x354   : > { %2683 = vrot.lane.b32.xlu1 %v5841_v12, %s4702_s20  ;;  %7126 = vst [vmem:[#allocation112_spill] sm:$0xff] %v6238_v41  ;;  %7130 = vst [vmem:[#allocation115_spill] sm:$0xff] %v6253_v57  ;;  %v2319_v42 = vld [vmem:[#allocation2 + $0x468] sm:$0x3]  ;;  %v6263_v24 = vsel %vm2352_vm3, %v3841_v49, %v3842_v51  ;;  %v3846_v38 = vrot.slane %v3742_v6, 2  ;;  %v3847_v53 = vrot.slane %v6221_v58, 2  ;;  %v6270_v44 = vsel %vm2079_vm2, %v5619_v25, %v2872_v11 }
 0x355   : > { %v6240_v3 = vpop.permute.xlu0 %3173  ;;  %7132 = vst [vmem:[#allocation117_spill] sm:$0xff] %v6263_v24  ;;  %v2877_v52 = vrot.slane %v2770_v56, 1  ;;  %v2773_v22 = vld [vmem:[#allocation2 + $0x230] sm:$0x1]  ;;  %v6266_v28 = vld [vmem:[#allocation2 + $0x268] sm:$0xff]  ;;  %7133 = vst [vmem:[#allocation118_spill] sm:$0xff] %v6270_v44 }
 0x356   : > { %7127 = vst [vmem:[#allocation113_spill] sm:$0xff] %v6240_v3  ;;  %v6242_v48 = vpop.permute.xlu1 %2202  ;;  %v3746_v3 = vld [vmem:[#allocation2 + $0x220] sm:$0xff]  ;;  %v3747_v27 = vld [vmem:[#allocation2 + $0x238] sm:$0x3]  ;;  %v2774_v57 = vld [vmem:[#allocation2 + $0x248] sm:$0xfe] }
 0x357   : > { %7128 = vst [vmem:[#allocation114_spill] sm:$0xff] %v6242_v48  ;;  %v2874_v48 = vrot.slane %v2768_v16, 1  ;;  %2493 = vrot.lane.b32.xlu0 %v2430_v35, %s4700_s8  ;;  %v6273_v16 = vsel %vm2352_vm3, %v3842_v51, %v3844_v33  ;;  %v3849_v35 = vrot.slane %v3744_v26, 2  ;;  %v6276_v49 = vrot.slane %v5850_v2, 1  ;;  %v3748_v56 = vld [vmem:[#allocation2 + $0x250] sm:$0xfc] }
 0x358   : > { %3384 = vrot.lane.b32.xlu1 %v5850_v2, %s4700_s8  ;;  %7134 = vst [vmem:[#allocation119_spill] sm:$0xff] %v6273_v16  ;;  %v2776_v24 = vld [vmem:[#allocation2 + $0x278] sm:$0x1]  ;;  %v7137_v41 = vrot.slane %v5850_v2, 2  ;;  %v7138_v11 = vrot.slane %v5841_v12, 1  ;;  %v3587_v26 = vrot.slane %v3484_v21, 1 }
 0x359   : > { %v6278_v6 = vpop.permute.xlu0 %3634  ;;  %v2431_v51 = vrot.slane %v2319_v42, 2  ;;  %v6290_v16 = vsel %vm2079_vm2, %v2874_v48, %v5667_v13  ;;  %v2879_v44 = vrot.slane %v2771_v62, 1  ;;  %v3852_v20 = vrot.slane %v3746_v3, 2  ;;  %v3750_v42 = vld [vmem:[#allocation2 + $0x280] sm:$0x3] }
 0x35a   : > { %7135 = vst [vmem:[#allocation120_spill] sm:$0xff] %v6278_v6  ;;  %v6280_v58 = vpop.permute.xlu1 %2475  ;;  %v3129_v25 = vsel %vm2352_vm3, %v3127_v19, %v7137_v41  ;;  %v2159_v33 = vsel %vm2079_vm2, %v7138_v11, %v2158_v61  ;;  %v3851_v6 = vrot.slane %v3745_v10, 2  ;;  %v6295_v19 = vsel %vm2352_vm3, %v3846_v38, %v3847_v53  ;;  %v6302_v10 = vld [vmem:[#allocation2 + $0x290] sm:$0xfe] }
 0x35b   : > { %7136 = vst [vmem:[#allocation121_spill] sm:$0xff] %v6280_v58  ;;  %3193 = vrot.lane.b32.xlu0 %v3129_v25, %s4701_s16  ;;  %v3022_v58 = vld [vmem:[#allocation2 + $0x470] sm:$0x3]  ;;  %v6299_v61 = vsel %vm2079_vm2, %v5667_v13, %v2877_v52  ;;  %v2882_v41 = vrot.slane %v2773_v22, 1  ;;  %v3854_v21 = vrot.slane %v3747_v27, 2  ;;  %v2884_v48 = vrot.slane %v2774_v57, 1 }
 0x35c   : > { %2222 = vrot.lane.b32.xlu1 %v2159_v33, %s4701_s16  ;;  %v3856_v11 = vrot.slane %v3748_v56, 2  ;;  %v3857_v62 = vrot.slane %v6266_v28, 2  ;;  %v2887_v3 = vrot.slane %v2776_v24, 1  ;;  %v6309_v38 = vsel %vm2352_vm3, %v3847_v53, %v3849_v35  ;;  %v4571_v22 = vld [vmem:[#allocation2 + $0x48] sm:$0xff]  ;;  %v3485_v53 = vld [vmem:[#allocation2 + $0x470] sm:$0x1] }
 0x35d   : > { %v6304_v25 = vpop.permute.xlu0 %2665  ;;  %v3589_v13 = vsel %vm2079_vm2, %v3587_v26, %v6276_v49  ;;  %v7140_v27 = vrot.slane %v5841_v12, 2  ;;  %v3130_v52 = vrot.slane %v3022_v58, 2  ;;  %v2258_v24 = vadd.f32 %v4571_v22, %v5659_v8 }
 0x35e   : > { %v6306_v33 = vpop.permute.xlu1 %3175  ;;  %v6319_v28 = vsel %vm2079_vm2, %v2879_v44, %v5742_v9  ;;  %v6322_v56 = vsel %vm2352_vm3, %v3851_v6, %v3852_v20  ;;  %v6328_v12 = vsel %vm2079_vm2, %v5742_v9, %v2882_v41  ;;  %v6331_v35 = vsel %vm2352_vm3, %v3852_v20, %v3854_v21  ;;  %v2779_v44 = vld [vmem:[#allocation2 + $0x2c0] sm:$0x1]  ;;  %v6347_v20 = vld [vmem:[#allocation2 + $0x298] sm:$0xfc]  ;;  %v2782_v21 = vld [vmem:[#allocation2 + $0x308] sm:$0x1] }
 0x35f   : > { %7139 = vst [vmem:[#allocation122_spill] sm:$0xff] %v6306_v33  ;;  %v2432_v57 = vsel %vm2352_vm3, %v7140_v27, %v2431_v51  ;;  %3654 = vrot.lane.b32.xlu0 %v3589_v13, %s4702_s20  ;;  %v3859_v8 = vrot.slane %v3750_v42, 2  ;;  %v2889_v58 = vrot.slane %v6302_v10, 1  ;;  %v2721_v6 = vadd.f32 %v5648_v59, %v6169_v30  ;;  %v2780_v41 = vld [vmem:[#allocation2 + $0x2d8] sm:$0xfe]  ;;  %v4572_v30 = vld [vmem:[#allocation2 + $0x2a8] sm:$0xff] }
 0x360   : > { %2495 = vrot.lane.b32.xlu1 %v2432_v57, %s4700_s8  ;;  %v6338_v26 = vsel %vm2079_vm2, %v2884_v48, %v5801_v7  ;;  %v6341_v51 = vsel %vm2352_vm3, %v3856_v11, %v3857_v62  ;;  %v6345_v9 = vsel %vm2079_vm2, %v5801_v7, %v2887_v3  ;;  %v2722_v59 = vadd.f32 %v5650_v60, %v6166_v43  ;;  %v2591_v13 = vld [vmem:[#allocation2 + $0x480] sm:$0xff]  ;;  %v3023_v60 = vld [vmem:[#allocation2 + $0x488] sm:$0xfc]  ;;  %v6365_v43 = vld [vmem:[#allocation2 + $0x2b0] sm:$0xff] }
 0x361   : > { %v6349_v42 = vpop.permute.xlu0 %3366  ;;  %v2890_v48 = vrot.slane %v4572_v30, 1  ;;  %v7143_v11 = vrot.slane %v5850_v2, 2  ;;  %v3590_v7 = vrot.slane %v3485_v53, 1  ;;  %v4573_v3 = vld [vmem:[#allocation2 + $0x60] sm:$0xff]  ;;  %v2531_v22 = vadd.f32 %v5657_v5, %v2258_v24  ;;  %v3970_v30 = vld [vmem:[%s4851_s13] sm:$0xff] }
 0x362   : > { %7141 = vst [vmem:[#allocation123_spill] sm:$0xff] %v6349_v42  ;;  %v6351_v10 = vpop.permute.xlu1 %3636  ;;  %v2259_v57 = vadd.f32 %v4573_v3, %v5671_v15  ;;  %v2892_v33 = vrot.slane %v2779_v44, 1  ;;  %v4574_v42 = vld [vmem:[#allocation2 + $0x2f0] sm:$0xff]  ;;  %v6363_v2 = vsel %vm2352_vm3, %v3857_v62, %v3859_v8  ;;  %v2894_v53 = vrot.slane %v2780_v41, 1  ;;  %4002 = vst.msk [vmem:[%s6379_s11] sm:$0xff] %vm468_vm1, %v3970_v30 }
 0x363   : > { %7142 = vst [vmem:[#allocation124_spill] sm:$0xff] %v6351_v10  ;;  %v3131_v27 = vsel %vm2352_vm3, %v7143_v11, %v3130_v52  ;;  %v2895_v10 = vrot.slane %v4574_v42, 1  ;;  %2685 = vrot.lane.b32.xlu0 %v2591_v13, %s4702_s20  ;;  %v3861_v52 = vrot.slane %v6347_v20, 2  ;;  %v2897_v15 = vrot.slane %v2782_v21, 1  ;;  %v4575_v42 = vld [vmem:[#allocation2 + $0x90] sm:$0xff] }
 0x364   : > { %3195 = vrot.lane.b32.xlu1 %v3131_v27, %s4701_s16  ;;  %v2961_v5 = vadd.f32 %v6172_v63, %v2721_v6  ;;  %v2723_v24 = vadd.f32 %v5677_v29, %v2531_v22  ;;  %v2532_v44 = vadd.f32 %v5679_v31, %v2259_v57  ;;  %v2260_v13 = vadd.f32 %v4575_v42, %v5693_v54  ;;  %v3294_v63 = vld [vmem:[#allocation2 + $0x488] sm:$0xff]  ;;  %v3024_v30 = vld [vmem:[#allocation2 + $0x4b8] sm:$0x3]  ;;  %v3972_v42 = vld [vmem:[%s4851_s13 + $0x10] sm:$0xff] }
 0x365   : > { %v6373_v11 = vpop.permute.xlu0 %2204  ;;  %v2962_v8 = vadd.f32 %v6175_v47, %v2722_v59  ;;  %v3591_v29 = vsel %vm2079_vm2, %v6276_v49, %v3590_v7  ;;  %v3132_v31 = vrot.slane %v3023_v60, 2  ;;  %v3133_v6 = vrot.slane %v5878_v39, 2  ;;  %v3486_v47 = vld [vmem:[#allocation2 + $0x488] sm:$0xfe]  ;;  %v6417_v60 = vld [vmem:[#allocation2 + $0x320] sm:$0xfe] }
 0x366   : > { %v6375_v62 = vpop.permute.xlu1 %2667  ;;  %v3233_v54 = vadd.f32 %v5669_v14, %v2961_v5  ;;  %v2724_v20 = vadd.f32 %v5695_v0, %v2532_v44  ;;  %v2533_v41 = vadd.f32 %v5702_v17, %v2260_v13  ;;  %v7014_v21 = vrot.slane %v6365_v43, 2  ;;  %v7145_v13 = vld [vmem:[#allocation13_spill] sm:$0xff]  ;;  %4004 = vst.msk [vmem:[%s6379_s11 + $0x10] sm:$0xff] %vm468_vm1, %v3972_v42  ;;  %v6458_v42 = vld [vmem:[#allocation2 + $0x338] sm:$0xff] }
 0x367   : > { %3386 = vrot.lane.b32.xlu0 %v3294_v63, %s4700_s8  ;;  %v6394_v59 = vsel %vm2079_vm2, %v2889_v58, %v2890_v48  ;;  %v6397_v27 = vsel %vm2079_vm2, %v2890_v48, %v2892_v33  ;;  %v6400_v7 = vsel %vm2079_vm2, %v2894_v53, %v2895_v10  ;;  %v6403_v14 = vsel %vm2079_vm2, %v2895_v10, %v2897_v15  ;;  %v4576_v33 = vld [vmem:[#allocation2 + $0xd8] sm:$0xff] }
 0x368   : > { %3656 = vrot.lane.b32.xlu1 %v3591_v29, %s4702_s20  ;;  %v3426_v0 = vadd.f32 %v5686_v55, %v3233_v54  ;;  %v3234_v17 = vadd.f32 %v5688_v34, %v2962_v8  ;;  %v2963_v3 = vadd.f32 %v6190_v45, %v2723_v24  ;;  %v2725_v57 = vadd.f32 %v5757_v18, %v2533_v41  ;;  %v4577_v18 = vld [vmem:[#allocation2 + $0xa8] sm:$0xff]  ;;  %v4578_v15 = vld [vmem:[#allocation2 + $0x498] sm:$0xff]  ;;  %v7147_v54 = vld [vmem:[#allocation21_spill] sm:$0xff] }
 0x369   : > { %v6409_v22 = vpop.permute.xlu0 %2477  ;;  %v2262_v48 = vadd.f32 %v4576_v33, %v5773_v46  ;;  %v3134_v10 = vsel %vm2352_vm3, %v3132_v31, %v3133_v6  ;;  %v3592_v55 = vrot.slane %v3486_v47, 1  ;;  %v6420_v34 = vrot.slane %v5878_v39, 1  ;;  %v7146_v63 = vld [vmem:[#allocation14_spill] sm:$0xff]  ;;  %v4579_v31 = vld [vmem:[#allocation2 + $0xf0] sm:$0xff]  ;;  %v7148_v47 = vld [vmem:[#allocation24_spill] sm:$0xff] }
 0x36a   : > { %v6411_v58 = vpop.permute.xlu1 %3368  ;;  %v2261_v45 = vadd.f32 %v4577_v18, %v5727_v4  ;;  %v2964_v53 = vadd.f32 %v6199_v1, %v2724_v20  ;;  %v6427_v46 = vsel %vm2352_vm3, %v3861_v52, %v7014_v21  ;;  %v3427_v5 = vadd.f32 %v5704_v32, %v3234_v17  ;;  %v7144_v1 = vld [vmem:[#allocation18_spill] sm:$0xff]  ;;  %v3974_v52 = vld [vmem:[%s4851_s13 + $0x20] sm:$0xff]  ;;  %v1943_v17 = vld [vmem:[#allocation2 + $0x120] sm:$0xff] }
 0x36b   : > { %3197 = vrot.lane.b32.xlu0 %v3134_v10, %s4701_s16  ;;  %v3235_v24 = vadd.f32 %v5725_v23, %v2963_v3  ;;  %v3698_v4 = vadd.f32 %v5744_v50, %v3426_v0  ;;  %v2535_v44 = vadd.f32 %v7144_v1, %v2262_v48  ;;  %v2263_v20 = vadd.f32 %v4579_v31, %v7147_v54  ;;  %v3971_v48 = vld [vmem:[%s4851_s13 + $0x8] sm:$0xff]  ;;  %v3976_v10 = vld [vmem:[%s4851_s13 + $0x30] sm:$0xff] }
 0x36c   : > { %2687 = vrot.lane.b32.xlu1 %v4578_v15, %s4702_s20  ;;  %v2534_v8 = vadd.f32 %v7145_v13, %v2261_v45  ;;  %v3236_v29 = vadd.f32 %v7146_v63, %v2964_v53  ;;  %v2899_v41 = vrot.slane %v6417_v60, 1  ;;  %4006 = vst.msk [vmem:[%s6379_s11 + $0x20] sm:$0xff] %vm468_vm1, %v3974_v52  ;;  %v2965_v50 = vadd.f32 %v6216_v36, %v2725_v57  ;;  %v7149_v60 = vld [vmem:[#allocation15_spill] sm:$0xff]  ;;  %v7151_v15 = vld [vmem:[#allocation28_spill] sm:$0xff]  ;;  %v7154_v13 = vld [vmem:[#allocation17_spill] sm:$0xff] }
 0x36d   : > { %v6441_v32 = vpop.permute.xlu0 %3177  ;;  %v2727_v0 = vadd.f32 %v7148_v47, %v2535_v44  ;;  %v3594_v3 = vsel %vm2079_vm2, %v3592_v55, %v6420_v34  ;;  %v3135_v33 = vrot.slane %v3024_v30, 2  ;;  %v3428_v18 = vadd.f32 %v7149_v60, %v3235_v24  ;;  %v7150_v45 = vld [vmem:[#allocation23_spill] sm:$0xff]  ;;  %v3487_v44 = vld [vmem:[#allocation2 + $0x4b8] sm:$0x1]  ;;  %4003 = vst.msk [vmem:[%s6379_s11 + $0x8] sm:$0xff] %vm468_vm1, %v3971_v48  ;;  %4008 = vst.msk [vmem:[%s6379_s11 + $0x30] sm:$0xff] %vm468_vm1, %v3976_v10 }
 0x36e   : > { %v6443_v23 = vpop.permute.xlu1 %2206  ;;  %v2536_v53 = vadd.f32 %v7150_v45, %v2263_v20  ;;  %v2264_v1 = vadd.f32 %v7151_v15, %v1943_v17  ;;  %v7013_v36 = vrot.slane %v6458_v42, 1  ;;  %v4581_v57 = vld [vmem:[#allocation2 + $0x4a0] sm:$0xff]  ;;  %v7152_v55 = vld [vmem:[#allocation105_spill] sm:$0xff]  ;;  %v7153_v24 = vld [vmem:[#allocation16_spill] sm:$0xff]  ;;  %v2726_v63 = vadd.f32 %v7154_v13, %v2534_v8 }
 0x36f   : > { %3658 = vrot.lane.b32.xlu0 %v3594_v3, %s4702_s20  ;;  %v3938_v30 = vadd.f32 %v7152_v55, %v3698_v4  ;;  %v3699_v52 = vadd.f32 %v7153_v24, %v3427_v5  ;;  %v7155_v31 = vld [vmem:[#allocation19_spill] sm:$0xff]  ;;  %v7156_v20 = vld [vmem:[#allocation20_spill] sm:$0xff]  ;;  %v7157_v17 = vld [vmem:[#allocation22_spill] sm:$0xff]  ;;  %v2967_v5 = vadd.f32 %v6235_v40, %v2727_v0 }
 0x370   : > { %3388 = vrot.lane.b32.xlu1 %v4581_v57, %s4700_s8  ;;  %v3429_v54 = vadd.f32 %v7155_v31, %v3236_v29  ;;  %v3237_v47 = vadd.f32 %v7156_v20, %v2965_v50  ;;  %v3700_v3 = vadd.f32 %v7157_v17, %v3428_v18  ;;  %v7158_v60 = vld [vmem:[#allocation29_spill] sm:$0xff]  ;;  %v7159_v15 = vld [vmem:[#allocation30_spill] sm:$0xff]  ;;  %v1945_v10 = vld [vmem:[#allocation2 + $0x168] sm:$0xff]  ;;  %v3136_v29 = vsel %vm2352_vm3, %v3133_v6, %v3135_v33 }
 0x371   : > { %v2728_v45 = vadd.f32 %v7158_v60, %v2536_v53  ;;  %v2537_v48 = vadd.f32 %v7159_v15, %v2264_v1  ;;  %v6475_v57 = vpop.permute.xlu0 %3638  ;;  %v7160_v8 = vld [vmem:[#allocation40_spill] sm:$0xff]  ;;  %v3595_v50 = vrot.slane %v3487_v44, 1  ;;  %v3978_v53 = vld [vmem:[%s4851_s13 + $0x40] sm:$0xff]  ;;  %v7161_v24 = vld [vmem:[#allocation26_spill] sm:$0xff]  ;;  %v6491_v20 = vsel %vm2079_vm2, %v2899_v41, %v7013_v36 }
 0x372   : > { %v6477_v4 = vpop.permute.xlu1 %2479  ;;  %v2266_v55 = vadd.f32 %v7160_v8, %v1945_v10  ;;  %v3973_v18 = vld [vmem:[%s4851_s13 + $0x18] sm:$0xff]  ;;  %v3430_v13 = vadd.f32 %v7161_v24, %v3237_v47  ;;  %4010 = vst.msk [vmem:[%s6379_s11 + $0x40] sm:$0xff] %vm468_vm1, %v3978_v53  ;;  %v7163_v39 = vld [vmem:[#allocation106_spill] sm:$0xff]  ;;  %v7164_v6 = vld [vmem:[#allocation27_spill] sm:$0xff] }
 0x373   : > { %v7162_v1 = vld [vmem:[#allocation36_spill] sm:$0xff]  ;;  %4066 = vrot.lane.b32.xlu0 %v3938_v30, %s4700_s8  ;;  %4005 = vst.msk [vmem:[%s6379_s11 + $0x18] sm:$0xff] %vm468_vm1, %v3973_v18  ;;  %v3939_v40 = vadd.f32 %v7163_v39, %v3699_v52  ;;  %v3701_v0 = vadd.f32 %v7164_v6, %v3429_v54  ;;  %v7166_v47 = vld [vmem:[#allocation42_spill] sm:$0xff]  ;;  %v7167_v41 = vld [vmem:[#allocation109_spill] sm:$0xff]  ;;  %v2968_v8 = vadd.f32 %v6250_v37, %v2728_v45 }
 0x374   : > { %v2729_v31 = vadd.f32 %v7162_v1, %v2537_v48  ;;  %3199 = vrot.lane.b32.xlu1 %v3136_v29, %s4701_s16  ;;  %v7165_v33 = vld [vmem:[#allocation32_spill] sm:$0xff]  ;;  %v2539_v17 = vadd.f32 %v7166_v47, %v2266_v55  ;;  %v3940_v60 = vadd.f32 %v7167_v41, %v3700_v3  ;;  %v7168_v15 = vld [vmem:[#allocation110_spill] sm:$0xff]  ;;  %v7170_v18 = vld [vmem:[#allocation33_spill] sm:$0xff] }
 0x375   : > { %v3239_v44 = vadd.f32 %v7165_v33, %v2967_v5  ;;  %v2966_v30 = vadd.f32 %v7168_v15, %v2726_v63  ;;  %v7169_v48 = vld [vmem:[#allocation34_spill] sm:$0xff]  ;;  %v6507_v29 = vpop.permute.xlu0 %2669  ;;  %v7172_v55 = vld [vmem:[#allocation48_spill] sm:$0xff]  ;;  %v1947_v3 = vld [vmem:[#allocation2 + $0x1b0] sm:$0xff]  ;;  %v3596_v63 = vsel %vm2079_vm2, %v6420_v34, %v3595_v50 }
 0x376   : > { %v3702_v10 = vadd.f32 %v7169_v48, %v3430_v13  ;;  %v6509_v52 = vpop.permute.xlu1 %3179  ;;  %v4582_v54 = vld [vmem:[#allocation2 + $0x138] sm:$0xff]  ;;  %v2731_v1 = vadd.f32 %v7172_v55, %v2539_v17  ;;  %v3980_v39 = vld [vmem:[%s4851_s13 + $0x50] sm:$0xff]  ;;  %v7173_v37 = vld [vmem:[#allocation25_spill] sm:$0xff] }
 0x377   : > { %v2265_v53 = vadd.f32 %v4582_v54, %v7170_v18  ;;  %v7171_v5 = vld [vmem:[#allocation38_spill] sm:$0xff]  ;;  %v3238_v45 = vadd.f32 %v7173_v37, %v2966_v30  ;;  %v7174_v6 = vld [vmem:[#allocation116_spill] sm:$0xff]  ;;  %4070 = vrot.lane.b32.xlu0 %v3940_v60, %s4700_s8  ;;  %4012 = vst.msk [vmem:[%s6379_s11 + $0x50] sm:$0xff] %vm468_vm1, %v3980_v39  ;;  %v7177_v15 = vld [vmem:[#allocation35_spill] sm:$0xff] }
 0x378   : > { %v3432_v24 = vadd.f32 %v7171_v5, %v3239_v44  ;;  %v3975_v13 = vld [vmem:[%s4851_s13 + $0x28] sm:$0xff]  ;;  %v2969_v33 = vadd.f32 %v7174_v6, %v2729_v31  ;;  %v7175_v47 = vld [vmem:[#allocation52_spill] sm:$0xff]  ;;  %3660 = vrot.lane.b32.xlu1 %v3596_v63, %s4702_s20  ;;  %v7176_v44 = vld [vmem:[#allocation111_spill] sm:$0xff] }
 0x379   : > { %v2268_v41 = vadd.f32 %v7175_v47, %v1947_v3  ;;  %4007 = vst.msk [vmem:[%s6379_s11 + $0x28] sm:$0xff] %vm468_vm1, %v3975_v13  ;;  %v3941_v17 = vadd.f32 %v7176_v44, %v3701_v0  ;;  %v2538_v50 = vadd.f32 %v7177_v15, %v2265_v53  ;;  %v7178_v48 = vld [vmem:[#allocation37_spill] sm:$0xff]  ;;  %v7179_v54 = vld [vmem:[#allocation46_spill] sm:$0xff]  ;;  %v7180_v18 = vld [vmem:[#allocation31_spill] sm:$0xff]  ;;  %v6535_v39 = vpop.permute.xlu0 %3370 }
 0x37a   : > { %v3240_v30 = vadd.f32 %v7178_v48, %v2968_v8  ;;  %v3704_v31 = vadd.f32 %v7179_v54, %v3432_v24  ;;  %v3431_v5 = vadd.f32 %v7180_v18, %v3238_v45  ;;  %v7181_v55 = vld [vmem:[#allocation112_spill] sm:$0xff]  ;;  %v7183_v37 = vld [vmem:[#allocation54_spill] sm:$0xff]  ;;  %v6537_v0 = vpop.permute.xlu1 %3640  ;;  %v7184_v53 = vld [vmem:[#allocation41_spill] sm:$0xff]  ;;  %v2971_v45 = vadd.f32 %v6290_v16, %v2731_v1 }
 0x37b   : > { %v3942_v60 = vadd.f32 %v7181_v55, %v3702_v10  ;;  %v7182_v3 = vld [vmem:[#allocation44_spill] sm:$0xff]  ;;  %v2541_v13 = vadd.f32 %v7183_v37, %v2268_v41  ;;  %v2730_v6 = vadd.f32 %v7184_v53, %v2538_v50  ;;  %v7185_v47 = vld [vmem:[#allocation43_spill] sm:$0xff]  ;;  %v7186_v24 = vld [vmem:[#allocation45_spill] sm:$0xff] }
 0x37c   : > { %v3241_v63 = vadd.f32 %v7182_v3, %v2969_v33  ;;  %v3433_v8 = vadd.f32 %v7185_v47, %v3240_v30  ;;  %v4583_v44 = vld [vmem:[#allocation2 + $0x180] sm:$0xff]  ;;  %v1949_v10 = vld [vmem:[#allocation2 + $0x1f8] sm:$0xff]  ;;  %v3977_v48 = vld [vmem:[%s4851_s13 + $0x38] sm:$0xff]  ;;  %4068 = vrot.lane.b32.xlu1 %v3939_v40, %s4700_s8 }
 0x37d   : > { %v2267_v15 = vadd.f32 %v4583_v44, %v7186_v24  ;;  %v3982_v33 = vld [vmem:[%s4851_s13 + $0x60] sm:$0xff]  ;;  %v7187_v54 = vld [vmem:[#allocation50_spill] sm:$0xff]  ;;  %v7188_v18 = vld [vmem:[#allocation60_spill] sm:$0xff]  ;;  %4074 = vrot.lane.b32.xlu0 %v3942_v60, %s4700_s8  ;;  %4009 = vst.msk [vmem:[%s6379_s11 + $0x38] sm:$0xff] %vm468_vm1, %v3977_v48 }
 0x37e   : > { %v3434_v41 = vadd.f32 %v7187_v54, %v3241_v63  ;;  %v2733_v55 = vadd.f32 %v7188_v18, %v2541_v13  ;;  %v7189_v3 = vld [vmem:[#allocation64_spill] sm:$0xff]  ;;  %4014 = vst.msk [vmem:[%s6379_s11 + $0x60] sm:$0xff] %vm468_vm1, %v3982_v33  ;;  %v7190_v50 = vld [vmem:[#allocation39_spill] sm:$0xff]  ;;  %v7191_v16 = vld [vmem:[#allocation117_spill] sm:$0xff] }
 0x37f   : > { %v2270_v37 = vadd.f32 %v7189_v3, %v1949_v10  ;;  %v3703_v30 = vadd.f32 %v7190_v50, %v3431_v5  ;;  %v3944_v1 = vadd.f32 %v7191_v16, %v3704_v31  ;;  %v7192_v53 = vld [vmem:[#allocation47_spill] sm:$0xff]  ;;  %v4584_v47 = vld [vmem:[#allocation2 + $0x1c8] sm:$0xff]  ;;  %v7193_v13 = vld [vmem:[#allocation57_spill] sm:$0xff]  ;;  %v6562_v3 = vpop.permute.xlu0 %2208  ;;  %v6564_v31 = vpop.permute.xlu1 %2671 }
 0x380   : > { %v2540_v63 = vadd.f32 %v7192_v53, %v2267_v15  ;;  %v2269_v44 = vadd.f32 %v4584_v47, %v7193_v13  ;;  %v7194_v24 = vld [vmem:[#allocation51_spill] sm:$0xff]  ;;  %v7195_v60 = vld [vmem:[#allocation56_spill] sm:$0xff]  ;;  %v7196_v40 = vld [vmem:[#allocation58_spill] sm:$0xff]  ;;  %4072 = vrot.lane.b32.xlu1 %v3941_v17, %s4700_s8 }
 0x381   : > { %v3705_v10 = vadd.f32 %v7194_v24, %v3433_v8  ;;  %v3243_v54 = vadd.f32 %v7195_v60, %v2971_v45  ;;  %v3706_v18 = vadd.f32 %v7196_v40, %v3434_v41  ;;  %v7197_v48 = vld [vmem:[#allocation66_spill] sm:$0xff]  ;;  %v1951_v5 = vld [vmem:[#allocation2 + $0x240] sm:$0xff]  ;;  %v7199_v16 = vld [vmem:[#allocation53_spill] sm:$0xff]  ;;  %4078 = vrot.lane.b32.xlu0 %v3944_v1, %s4700_s8 }
 0x382   : > { %v2543_v33 = vadd.f32 %v7197_v48, %v2270_v37  ;;  %v7198_v50 = vld [vmem:[#allocation118_spill] sm:$0xff]  ;;  %v2732_v53 = vadd.f32 %v7199_v16, %v2540_v63  ;;  %v7200_v47 = vld [vmem:[#allocation59_spill] sm:$0xff]  ;;  %v7201_v8 = vld [vmem:[#allocation77_spill] sm:$0xff]  ;;  %v2973_v37 = vadd.f32 %v6319_v28, %v2733_v55 }
 0x383   : > { %v2970_v15 = vadd.f32 %v7198_v50, %v2730_v6  ;;  %v2542_v13 = vadd.f32 %v7200_v47, %v2269_v44  ;;  %v2272_v24 = vadd.f32 %v7201_v8, %v1951_v5  ;;  %v3979_v45 = vld [vmem:[%s4851_s13 + $0x48] sm:$0xff]  ;;  %v3984_v60 = vld [vmem:[%s4851_s13 + $0x70] sm:$0xff]  ;;  %v7203_v48 = vld [vmem:[#allocation73_spill] sm:$0xff]  ;;  %v3946_v17 = vadd.f32 %v6295_v19, %v3706_v18 }
 0x384   : > { %v7202_v41 = vld [vmem:[#allocation62_spill] sm:$0xff]  ;;  %v2735_v36 = vadd.f32 %v7203_v48, %v2543_v33  ;;  %4011 = vst.msk [vmem:[%s6379_s11 + $0x48] sm:$0xff] %vm468_vm1, %v3979_v45  ;;  %4016 = vst.msk [vmem:[%s6379_s11 + $0x70] sm:$0xff] %vm468_vm1, %v3984_v60  ;;  %v7204_v6 = vld [vmem:[#allocation115_spill] sm:$0xff] }
 0x385   : > { %v3436_v40 = vadd.f32 %v7202_v41, %v3243_v54  ;;  %v3943_v63 = vadd.f32 %v7204_v6, %v3703_v30  ;;  %v7205_v44 = vld [vmem:[#allocation49_spill] sm:$0xff]  ;;  %v7207_v54 = vld [vmem:[#allocation79_spill] sm:$0xff]  ;;  %v6585_v55 = vld [vmem:[#allocation2 + $0x2c8] sm:$0x3]  ;;  %v6591_v41 = vpop.permute.xlu0 %2481  ;;  %v6593_v30 = vpop.permute.xlu1 %3372  ;;  %4082 = vrot.lane.b32.xlu0 %v3946_v17, %s4700_s8 }
 0x386   : > { %v3242_v5 = vadd.f32 %v7205_v44, %v2970_v15  ;;  %v7206_v50 = vld [vmem:[#allocation65_spill] sm:$0xff]  ;;  %v2545_v28 = vadd.f32 %v7207_v54, %v2272_v24  ;;  %v7208_v33 = vld [vmem:[#allocation119_spill] sm:$0xff]  ;;  %v7209_v47 = vld [vmem:[#allocation68_spill] sm:$0xff]  ;;  %v2972_v24 = vadd.f32 %v6299_v61, %v2732_v53 }
 0x387   : > { %v2734_v16 = vadd.f32 %v7206_v50, %v2542_v13  ;;  %v3945_v1 = vadd.f32 %v7208_v33, %v3705_v10  ;;  %v3245_v8 = vadd.f32 %v7209_v47, %v2973_v37  ;;  %v7210_v45 = vld [vmem:[#allocation71_spill] sm:$0xff]  ;;  %v4585_v48 = vld [vmem:[#allocation2 + $0x210] sm:$0xff]  ;;  %v7213_v10 = vld [vmem:[#allocation86_spill] sm:$0xff]  ;;  %v2975_v33 = vadd.f32 %v6338_v26, %v2735_v36  ;;  %4076 = vrot.lane.b32.xlu1 %v3943_v63, %s4700_s8 }
 0x388   : > { %v3708_v60 = vadd.f32 %v7210_v45, %v3436_v40  ;;  %v7211_v15 = vld [vmem:[#allocation55_spill] sm:$0xff]  ;;  %v7212_v6 = vld [vmem:[#allocation69_spill] sm:$0xff]  ;;  %v2737_v50 = vadd.f32 %v7213_v10, %v2545_v28  ;;  %v1953_v19 = vld [vmem:[#allocation2 + $0x288] sm:$0xff] }
 0x389   : > { %v3435_v13 = vadd.f32 %v7211_v15, %v3242_v5  ;;  %v2271_v44 = vadd.f32 %v4585_v48, %v7212_v6  ;;  %v3981_v18 = vld [vmem:[%s4851_s13 + $0x58] sm:$0xff]  ;;  %v3986_v37 = vld [vmem:[%s4851_s13 + $0x80] sm:$0xff]  ;;  %v7214_v54 = vld [vmem:[#allocation75_spill] sm:$0xff]  ;;  %v2974_v26 = vadd.f32 %v6328_v12, %v2734_v16 }
 0x38a   : > { %v3438_v40 = vadd.f32 %v7214_v54, %v3245_v8  ;;  %v7215_v47 = vld [vmem:[#allocation90_spill] sm:$0xff]  ;;  %4013 = vst.msk [vmem:[%s6379_s11 + $0x58] sm:$0xff] %vm468_vm1, %v3981_v18  ;;  %4018 = vst.msk [vmem:[%s6379_s11 + $0x80] sm:$0xff] %vm468_vm1, %v3986_v37  ;;  %v7216_v61 = vld [vmem:[#allocation61_spill] sm:$0xff]  ;;  %v3948_v17 = vadd.f32 %v6322_v56, %v3708_v60  ;;  %v6621_v37 = vpop.permute.xlu0 %3181  ;;  %v2977_v56 = vadd.f32 %v6394_v59, %v2737_v50 }
 0x38b   : > { %v2274_v45 = vadd.f32 %v7215_v47, %v1953_v19  ;;  %v3244_v53 = vadd.f32 %v7216_v61, %v2972_v24  ;;  %v7217_v5 = vld [vmem:[#allocation63_spill] sm:$0xff]  ;;  %v7218_v15 = vld [vmem:[#allocation72_spill] sm:$0xff]  ;;  %v7219_v48 = vld [vmem:[#allocation81_spill] sm:$0xff]  ;;  %4080 = vrot.lane.b32.xlu1 %v3945_v1, %s4700_s8 }
 0x38c   : > { %v3707_v28 = vadd.f32 %v7217_v5, %v3435_v13  ;;  %v2544_v8 = vadd.f32 %v7218_v15, %v2271_v44  ;;  %v6615_v36 = vld [vmem:[#allocation2 + $0x2e0] sm:$0xfc]  ;;  %v3247_v63 = vadd.f32 %v7219_v48, %v2975_v33  ;;  %v7220_v6 = vld [vmem:[#allocation84_spill] sm:$0xff]  ;;  %v6623_v13 = vpop.permute.xlu1 %2210  ;;  %v7223_v54 = vld [vmem:[#allocation78_spill] sm:$0xff]  ;;  %4086 = vrot.lane.b32.xlu0 %v3948_v17, %s4700_s8 }
 0x38d   : > { %v3710_v10 = vadd.f32 %v7220_v6, %v3438_v40  ;;  %v7221_v19 = vld [vmem:[#allocation92_spill] sm:$0xff]  ;;  %v7222_v24 = vld [vmem:[#allocation67_spill] sm:$0xff]  ;;  %v4586_v16 = vld [vmem:[#allocation2 + $0x258] sm:$0xff]  ;;  %v3866_v21 = vrot.slane %v6615_v36, 2 }
 0x38e   : > { %v2547_v18 = vadd.f32 %v7221_v19, %v2274_v45  ;;  %v3437_v44 = vadd.f32 %v7222_v24, %v3244_v53  ;;  %v2736_v12 = vadd.f32 %v7223_v54, %v2544_v8  ;;  %v7224_v47 = vld [vmem:[#allocation82_spill] sm:$0xff]  ;;  %v1955_v60 = vld [vmem:[#allocation2 + $0x2d0] sm:$0xff]  ;;  %v3988_v40 = vld [vmem:[%s4851_s13 + $0x90] sm:$0xff]  ;;  %v3947_v59 = vadd.f32 %v6309_v38, %v3707_v28  ;;  %v6651_v38 = vpop.permute.xlu0 %3642 }
 0x38f   : > { %v2273_v61 = vadd.f32 %v4586_v16, %v7224_v47  ;;  %v3983_v33 = vld [vmem:[%s4851_s13 + $0x68] sm:$0xff]  ;;  %v7225_v5 = vld [vmem:[#allocation88_spill] sm:$0xff]  ;;  %v7226_v15 = vld [vmem:[#allocation99_spill] sm:$0xff]  ;;  %4020 = vst.msk [vmem:[%s6379_s11 + $0x90] sm:$0xff] %vm468_vm1, %v3988_v40  ;;  %v3950_v36 = vadd.f32 %v6341_v51, %v3710_v10 }
 0x390   : > { %v3440_v45 = vadd.f32 %v7225_v5, %v3247_v63  ;;  %v2739_v48 = vadd.f32 %v7226_v15, %v2547_v18  ;;  %v7227_v6 = vld [vmem:[#allocation103_spill] sm:$0xff]  ;;  %4015 = vst.msk [vmem:[%s6379_s11 + $0x68] sm:$0xff] %vm468_vm1, %v3983_v33  ;;  %v7228_v50 = vld [vmem:[#allocation74_spill] sm:$0xff]  ;;  %v7229_v8 = vld [vmem:[#allocation76_spill] sm:$0xff]  ;;  %v6653_v28 = vpop.permute.xlu1 %2483  ;;  %4084 = vrot.lane.b32.xlu1 %v3947_v59, %s4700_s8 }
 0x391   : > { %v2276_v19 = vadd.f32 %v7227_v6, %v1955_v60  ;;  %v3246_v53 = vadd.f32 %v7228_v50, %v2974_v26  ;;  %v3709_v63 = vadd.f32 %v7229_v8, %v3437_v44  ;;  %v7230_v18 = vld [vmem:[#allocation85_spill] sm:$0xff]  ;;  %v6645_v54 = vld [vmem:[#allocation2 + $0x2f8] sm:$0xff]  ;;  %v7233_v60 = vld [vmem:[#allocation107_spill] sm:$0xff]  ;;  %4090 = vrot.lane.b32.xlu0 %v3950_v36, %s4700_s8 }
 0x392   : > { %v2546_v24 = vadd.f32 %v7230_v18, %v2273_v61  ;;  %v7231_v17 = vld [vmem:[#allocation94_spill] sm:$0xff]  ;;  %v7232_v16 = vld [vmem:[#allocation97_spill] sm:$0xff]  ;;  %v3757_v40 = vld [vmem:[#allocation2 + $0x328] sm:$0xfc]  ;;  %v2976_v61 = vadd.f32 %v6345_v9, %v2736_v12  ;;  %v2979_v8 = vadd.f32 %v6400_v7, %v2739_v48  ;;  %v3867_v18 = vrot.slane %v6645_v54, 2 }
 0x393   : > { %v3249_v1 = vadd.f32 %v7231_v17, %v2977_v56  ;;  %v3712_v47 = vadd.f32 %v7232_v16, %v3440_v45  ;;  %v2549_v33 = vadd.f32 %v7233_v60, %v2276_v19  ;;  %v7234_v26 = vld [vmem:[#allocation80_spill] sm:$0xff]  ;;  %v7235_v5 = vld [vmem:[#allocation91_spill] sm:$0xff]  ;;  %v3990_v45 = vld [vmem:[%s4851_s13 + $0xa0] sm:$0xff] }
 0x394   : > { %v3439_v44 = vadd.f32 %v7234_v26, %v3246_v53  ;;  %v2738_v15 = vadd.f32 %v7235_v5, %v2546_v24  ;;  %v4587_v51 = vld [vmem:[#allocation2 + $0x2a0] sm:$0xff]  ;;  %v3985_v6 = vld [vmem:[%s4851_s13 + $0x78] sm:$0xff]  ;;  %v7237_v50 = vld [vmem:[#allocation101_spill] sm:$0xff]  ;;  %4022 = vst.msk [vmem:[%s6379_s11 + $0xa0] sm:$0xff] %vm468_vm1, %v3990_v45  ;;  %v6680_v5 = vpop.permute.xlu0 %2673 }
 0x395   : > { %v7236_v10 = vld [vmem:[#allocation95_spill] sm:$0xff]  ;;  %v3442_v19 = vadd.f32 %v7237_v50, %v3249_v1  ;;  %v2741_v17 = vadd.f32 %v6304_v25, %v2549_v33  ;;  %4017 = vst.msk [vmem:[%s6379_s11 + $0x78] sm:$0xff] %vm468_vm1, %v3985_v6  ;;  %v7239_v53 = vld [vmem:[#allocation89_spill] sm:$0xff]  ;;  %v7240_v48 = vld [vmem:[#allocation98_spill] sm:$0xff]  ;;  %v3871_v1 = vrot.slane %v3757_v40, 2  ;;  %v3949_v25 = vadd.f32 %v6331_v35, %v3709_v63 }
 0x396   : > { %v2275_v56 = vadd.f32 %v4587_v51, %v7236_v10  ;;  %v6665_v16 = vld [vmem:[#allocation2 + $0x340] sm:$0xff]  ;;  %v3711_v7 = vadd.f32 %v7239_v53, %v3439_v44  ;;  %v3952_v60 = vadd.f32 %v6427_v46, %v3712_v47  ;;  %v7241_v36 = vld [vmem:[#allocation113_spill] sm:$0xff]  ;;  %v7242_v59 = vld [vmem:[#allocation120_spill] sm:$0xff]  ;;  %v6682_v51 = vpop.permute.xlu1 %3183  ;;  %v2978_v44 = vadd.f32 %v6397_v27, %v2738_v15 }
 0x397   : > { %v7238_v9 = vld [vmem:[#allocation87_spill] sm:$0xff]  ;;  %v3251_v33 = vadd.f32 %v7241_v36, %v2979_v8  ;;  %v3714_v26 = vadd.f32 %v7242_v59, %v3442_v19  ;;  %v3872_v35 = vrot.slane %v6665_v16, 2  ;;  %v3987_v63 = vld [vmem:[%s4851_s13 + $0x88] sm:$0xff]  ;;  %v3989_v46 = vld [vmem:[%s4851_s13 + $0x98] sm:$0xff]  ;;  %v2981_v8 = vadd.f32 %v6491_v20, %v2741_v17  ;;  %4088 = vrot.lane.b32.xlu1 %v3949_v25, %s4700_s8 }
 0x398   : > { %v3248_v12 = vadd.f32 %v7238_v9, %v2976_v61  ;;  %v2548_v24 = vadd.f32 %v7240_v48, %v2275_v56  ;;  %v7243_v61 = vld [vmem:[#allocation93_spill] sm:$0xff]  ;;  %v7244_v56 = vld [vmem:[#allocation104_spill] sm:$0xff]  ;;  %v7245_v6 = vld [vmem:[#allocation114_spill] sm:$0xff]  ;;  %4094 = vrot.lane.b32.xlu0 %v3952_v60, %s4700_s8  ;;  %4019 = vst.msk [vmem:[%s6379_s11 + $0x88] sm:$0xff] %vm468_vm1, %v3987_v63  ;;  %v3951_v27 = vadd.f32 %v6363_v2, %v3711_v7  ;;  %v6710_v7 = vpop.permute.xlu0 %3374 }
 0x399   : > { %v4588_v47 = vld [vmem:[#allocation2 + $0x2e8] sm:$0xff]  ;;  %v7246_v50 = vld [vmem:[#allocation123_spill] sm:$0xff]  ;;  %v2785_v9 = vld [vmem:[#allocation2 + $0x350] sm:$0x1]  ;;  %4021 = vst.msk [vmem:[%s6379_s11 + $0x98] sm:$0xff] %vm468_vm1, %v3989_v46  ;;  %v3868_v20 = vsel %vm2352_vm3, %v3866_v21, %v3867_v18  ;;  %v3253_v25 = vadd.f32 %v6441_v32, %v2981_v8  ;;  %v3873_v32 = vsel %vm2352_vm3, %v3871_v1, %v3872_v35 }
 0x39a   : > { %v3441_v10 = vadd.f32 %v7243_v61, %v3248_v12  ;;  %v2740_v40 = vadd.f32 %v7244_v56, %v2548_v24  ;;  %v2277_v45 = vadd.f32 %v4588_v47, %v7245_v6  ;;  %v3444_v19 = vadd.f32 %v7246_v50, %v3251_v33  ;;  %v7247_v15 = vld [vmem:[#allocation100_spill] sm:$0xff]  ;;  %v7248_v53 = vld [vmem:[#allocation102_spill] sm:$0xff]  ;;  %v3756_v17 = vld [vmem:[#allocation2 + $0x310] sm:$0x3]  ;;  %v3645_v61 = vpop.permute.xlu1 %3644 }
 0x39b   : > { %v3250_v12 = vadd.f32 %v7247_v15, %v2978_v44  ;;  %v3954_v24 = vadd.f32 %v3868_v20, %v3714_v26  ;;  %v7249_v60 = vld [vmem:[#allocation121_spill] sm:$0xff]  ;;  %v6708_v2 = vld [vmem:[#allocation2 + $0x388] sm:$0xff]  ;;  %v7251_v44 = vrot.slane %v6365_v43, 2  ;;  %v3991_v56 = vld [vmem:[%s4851_s13 + $0xa8] sm:$0xff]  ;;  %v3869_v47 = vrot.slane %v3756_v17, 2  ;;  %4092 = vrot.lane.b32.xlu1 %v3951_v27, %s4700_s8 }
 0x39c   : > { %v3713_v48 = vadd.f32 %v7248_v53, %v3441_v10  ;;  %v2550_v36 = vadd.f32 %v7249_v60, %v2277_v45  ;;  %v3716_v33 = vadd.f32 %v6475_v57, %v3444_v19  ;;  %v3760_v59 = vld [vmem:[#allocation2 + $0x370] sm:$0xfc]  ;;  %v7250_v10 = vrot.slane %v6585_v55, 2  ;;  %v7252_v63 = vld [vmem:[#allocation108_spill] sm:$0xff]  ;;  %v1957_v6 = vld [vmem:[#allocation2 + $0x318] sm:$0xff]  ;;  %4023 = vst.msk [vmem:[%s6379_s11 + $0xa8] sm:$0xff] %vm468_vm1, %v3991_v56  ;;  %v6734_v27 = vpop.permute.xlu0 %2212 }
 0x39d   : > { %v2980_v26 = vadd.f32 %v6403_v14, %v2740_v40  ;;  %v2902_v57 = vrot.slane %v2785_v9, 1  ;;  %v3443_v46 = vadd.f32 %v7252_v63, %v3250_v12  ;;  %v3446_v55 = vadd.f32 %v6535_v39, %v3253_v25  ;;  %4098 = vrot.lane.b32.xlu0 %v3954_v24, %s4700_s8  ;;  %v2786_v1 = vld [vmem:[#allocation2 + $0x368] sm:$0xfe]  ;;  %v7253_v19 = vld [vmem:[#allocation122_spill] sm:$0xff]  ;;  %v3992_v17 = vld [vmem:[%s4851_s13 + $0xb0] sm:$0xff] }
 0x39e   : > { %v3865_v21 = vsel %vm2352_vm3, %v7251_v44, %v7250_v10  ;;  %v2742_v45 = vadd.f32 %v6375_v62, %v2550_v36  ;;  %v2278_v14 = vadd.f32 %v6373_v11, %v1957_v6  ;;  %v3876_v40 = vrot.slane %v3760_v59, 2  ;;  %v7254_v62 = vld [vmem:[#allocation124_spill] sm:$0xff]  ;;  %v3759_v15 = vld [vmem:[#allocation2 + $0x358] sm:$0x3]  ;;  %v6736_v53 = vpop.permute.xlu1 %2675  ;;  %4024 = vst.msk [vmem:[%s6379_s11 + $0xb0] sm:$0xff] %vm468_vm1, %v3992_v17 }
 0x39f   : > { %v3953_v43 = vadd.f32 %v3865_v21, %v3713_v48  ;;  %v3877_v50 = vrot.slane %v6708_v2, 2  ;;  %v3252_v8 = vadd.f32 %v7253_v19, %v2980_v26  ;;  %v3715_v9 = vadd.f32 %v7254_v62, %v3443_v46  ;;  %v3762_v10 = vld [vmem:[#allocation2 + $0x3a0] sm:$0x3]  ;;  %v3993_v26 = vld [vmem:[%s4851_s13 + $0xb8] sm:$0xff]  ;;  %v2788_v56 = vld [vmem:[#allocation2 + $0x398] sm:$0x1] }
 0x3a0   : > { %v3956_v39 = vadd.f32 %v3873_v32, %v3716_v33  ;;  %v3718_v12 = vadd.f32 %v6651_v38, %v3446_v55  ;;  %v2551_v48 = vadd.f32 %v6409_v22, %v2278_v14  ;;  %v7255_v11 = vrot.slane %v6458_v42, 1  ;;  %v6755_v44 = vpop.permute.xlu0 %2485  ;;  %4025 = vst.msk [vmem:[%s6379_s11 + $0xb8] sm:$0xff] %vm468_vm1, %v3993_v26  ;;  %v3763_v46 = vld [vmem:[#allocation2 + $0x3b8] sm:$0xfc] }
 0x3a1   : > { %v3445_v24 = vadd.f32 %v6411_v58, %v3252_v8  ;;  %v2904_v36 = vrot.slane %v2786_v1, 1  ;;  %4096 = vrot.lane.b32.xlu1 %v3953_v43, %s4700_s8  ;;  %v3870_v22 = vsel %vm2352_vm3, %v3867_v18, %v3869_v47  ;;  %v3874_v38 = vrot.slane %v3759_v15, 2  ;;  %v7256_v18 = vld [vmem:[#allocation70_spill] sm:$0xff]  ;;  %v3764_v47 = vld [vmem:[#allocation2 + $0x3d0] sm:$0xff] }
 0x3a2   : > { %v2903_v20 = vsel %vm2079_vm2, %v7255_v11, %v2902_v57  ;;  %4102 = vrot.lane.b32.xlu0 %v3956_v39, %s4700_s8  ;;  %v2743_v42 = vadd.f32 %v6507_v29, %v2551_v48  ;;  %v3878_v25 = vsel %vm2352_vm3, %v3876_v40, %v3877_v50  ;;  %v3955_v58 = vadd.f32 %v3870_v22, %v3715_v9  ;;  %v3377_v21 = vpop.permute.xlu1 %3376  ;;  %v3994_v9 = vld [vmem:[%s4851_s13 + $0xc0] sm:$0xff]  ;;  %v3995_v26 = vld [vmem:[%s4851_s13 + $0xc8] sm:$0xff] }
 0x3a3   : > { %v2982_v60 = vadd.f32 %v2903_v20, %v2742_v45  ;;  %v3717_v59 = vadd.f32 %v6537_v0, %v3445_v24  ;;  %v3958_v2 = vadd.f32 %v3878_v25, %v3718_v12  ;;  %v2906_v29 = vsel %vm2079_vm2, %v2904_v36, %v7256_v18  ;;  %4026 = vst.msk [vmem:[%s6379_s11 + $0xc0] sm:$0xff] %vm468_vm1, %v3994_v9  ;;  %v1959_v36 = vld [vmem:[#allocation2 + $0x360] sm:$0xff] }
 0x3a4   : > { %v3875_v32 = vsel %vm2352_vm3, %v3872_v35, %v3874_v38  ;;  %v2983_v57 = vadd.f32 %v2906_v29, %v2743_v42  ;;  %v3879_v63 = vrot.slane %v3762_v10, 2  ;;  %v3186_v45 = vpop.permute.xlu0 %3185  ;;  %v2907_v14 = vrot.slane %v2788_v56, 1  ;;  %v2789_v38 = vld [vmem:[#allocation2 + $0x3b0] sm:$0xfe]  ;;  %4027 = vst.msk [vmem:[%s6379_s11 + $0xc8] sm:$0xff] %vm468_vm1, %v3995_v26 }
 0x3a5   : > { %v3254_v33 = vadd.f32 %v6509_v52, %v2982_v60  ;;  %4100 = vrot.lane.b32.xlu1 %v3955_v58, %s4700_s8  ;;  %v4589_v52 = vld [vmem:[#allocation2 + $0x330] sm:$0xff]  ;;  %v3881_v16 = vrot.slane %v3763_v46, 2  ;;  %v3882_v35 = vrot.slane %v3764_v47, 2  ;;  %v2280_v42 = vadd.f32 %v6562_v3, %v1959_v36  ;;  %v7257_v3 = vld [vmem:[#allocation83_spill] sm:$0xff] }
 0x3a6   : > { %4106 = vrot.lane.b32.xlu0 %v3958_v2, %s4700_s8  ;;  %v2279_v0 = vadd.f32 %v4589_v52, %v6443_v23  ;;  %v6769_v55 = vpop.permute.xlu1 %2214  ;;  %v3255_v23 = vadd.f32 %v6621_v37, %v2983_v57  ;;  %v3880_v19 = vsel %vm2352_vm3, %v3877_v50, %v3879_v63 }
 0x3a7   : > { %v3447_v54 = vadd.f32 %v6593_v30, %v3254_v33  ;;  %v3957_v30 = vadd.f32 %v3875_v32, %v3717_v59  ;;  %v3883_v37 = vsel %vm2352_vm3, %v3881_v16, %v3882_v35  ;;  %v2909_v59 = vrot.slane %v2789_v38, 1  ;;  %v3767_v32 = vld [vmem:[#allocation2 + $0x418] sm:$0xff]  ;;  %v7258_v38 = vld [vmem:[#allocation96_spill] sm:$0xff] }
 0x3a8   : > { %v2552_v43 = vadd.f32 %v6477_v4, %v2279_v0  ;;  %v3448_v40 = vadd.f32 %v6710_v7, %v3255_v23  ;;  %v3647_v8 = vpop.permute.xlu0 %3646  ;;  %v2908_v4 = vsel %vm2079_vm2, %v7256_v18, %v2907_v14  ;;  %v3765_v7 = vld [vmem:[#allocation2 + $0x3e8] sm:$0x3]  ;;  %v4590_v18 = vld [vmem:[#allocation2 + $0x378] sm:$0xff]  ;;  %v3766_v0 = vld [vmem:[#allocation2 + $0x400] sm:$0xfc] }
 0x3a9   : > { %v3719_v6 = vadd.f32 %v3645_v61, %v3447_v54  ;;  %4104 = vrot.lane.b32.xlu1 %v3957_v30, %s4700_s8  ;;  %v3884_v11 = vrot.slane %v3765_v7, 2  ;;  %v2911_v54 = vsel %vm2079_vm2, %v2909_v59, %v7257_v3  ;;  %v2281_v29 = vadd.f32 %v4590_v18, %v6623_v13  ;;  %v3996_v14 = vld [vmem:[%s4851_s13 + $0xd0] sm:$0xff] }
 0x3aa   : > { %v2744_v1 = vadd.f32 %v6564_v31, %v2552_v43  ;;  %v6777_v62 = vpop.permute.xlu1 %2487  ;;  %v3720_v39 = vadd.f32 %v3647_v8, %v3448_v40  ;;  %v3886_v47 = vrot.slane %v3766_v0, 2  ;;  %v3887_v30 = vrot.slane %v3767_v32, 2  ;;  %4028 = vst.msk [vmem:[%s6379_s11 + $0xd0] sm:$0xff] %vm468_vm1, %v3996_v14  ;;  %v3768_v40 = vld [vmem:[#allocation2 + $0x430] sm:$0x3] }
 0x3ab   : > { %v3959_v61 = vadd.f32 %v3880_v19, %v3719_v6  ;;  %v3885_v22 = vsel %vm2352_vm3, %v3882_v35, %v3884_v11  ;;  %v2554_v56 = vadd.f32 %v6653_v28, %v2281_v29  ;;  %v3889_v8 = vrot.slane %v3768_v40, 2  ;;  %v3771_v14 = vld [vmem:[#allocation2 + $0x478] sm:$0x3] }
 0x3ac   : > { %v2984_v31 = vadd.f32 %v2908_v4, %v2744_v1  ;;  %v3960_v15 = vadd.f32 %v3883_v37, %v3720_v39  ;;  %v6786_v12 = vpop.permute.xlu0 %2677  ;;  %v3888_v1 = vsel %vm2352_vm3, %v3886_v47, %v3887_v30 }
 0x3ad   : > { %4108 = vrot.lane.b32.xlu1 %v3959_v61, %s4700_s8  ;;  %v2746_v6 = vadd.f32 %v6736_v53, %v2554_v56 }
 0x3ae   : > { %v3188_v50 = vpop.permute.xlu1 %3187  ;;  %v3256_v48 = vadd.f32 %v6682_v51, %v2984_v31  ;;  %4110 = vrot.lane.b32.xlu0 %v3960_v15, %s4700_s8  ;;  %v2553_v51 = vadd.f32 %v6591_v41, %v2280_v42  ;;  %v2791_v41 = vld [vmem:[#allocation2 + $0x3e0] sm:$0x1]  ;;  %v3890_v31 = vsel %vm2352_vm3, %v3887_v30, %v3889_v8  ;;  %v4591_v15 = vld [vmem:[#allocation2 + $0x3a8] sm:$0xff]  ;;  %v4593_v30 = vld [vmem:[#allocation2 + $0x3f0] sm:$0xff] }
 0x3af   : > { %v2912_v46 = vrot.slane %v2791_v41, 1  ;;  %v2282_v7 = vadd.f32 %v4591_v15, %v6734_v27  ;;  %v3997_v42 = vld [vmem:[%s4851_s13 + $0xd8] sm:$0xff]  ;;  %v4000_v15 = vld [vmem:[%s4851_s13 + $0xf0] sm:$0xff] }
 0x3b0   : > { %v3449_v20 = vadd.f32 %v3377_v21, %v3256_v48  ;;  %v3379_v17 = vpop.permute.xlu0 %3378  ;;  %v2745_v2 = vadd.f32 %v6680_v5, %v2553_v51  ;;  %v2792_v48 = vld [vmem:[#allocation2 + $0x3f8] sm:$0xfe]  ;;  %4029 = vst.msk [vmem:[%s6379_s11 + $0xd8] sm:$0xff] %vm468_vm1, %v3997_v42  ;;  %4032 = vst.msk [vmem:[%s6379_s11 + $0xf0] sm:$0xff] %vm468_vm1, %v4000_v15  ;;  %v3772_v42 = vld [vmem:[#allocation2 + $0x490] sm:$0xfc] }
 0x3b1   : > { %v2913_v35 = vsel %vm2079_vm2, %v7257_v3, %v2912_v46 }
 0x3b2   : > { %v3649_v24 = vpop.permute.xlu1 %3648  ;;  %v2985_v52 = vadd.f32 %v2911_v54, %v2745_v2  ;;  %v2986_v28 = vadd.f32 %v2913_v35, %v2746_v6  ;;  %v2794_v2 = vld [vmem:[#allocation2 + $0x428] sm:$0x1]  ;;  %v4594_v6 = vld [vmem:[#allocation2 + $0x438] sm:$0xff] }
 0x3b3   : > { %v3721_v60 = vadd.f32 %v3649_v24, %v3449_v20  ;;  %v2914_v24 = vrot.slane %v2792_v48, 1  ;;  %v2917_v18 = vrot.slane %v2794_v2, 1  ;;  %v4595_v48 = vld [vmem:[#allocation2 + $0x408] sm:$0xff] }
 0x3b4   : > { %v6792_v58 = vpop.permute.xlu0 %2216  ;;  %v3257_v63 = vadd.f32 %v3186_v45, %v2985_v52  ;;  %v3258_v53 = vadd.f32 %v3188_v50, %v2986_v28  ;;  %v2555_v50 = vadd.f32 %v6755_v44, %v2282_v7  ;;  %v3769_v44 = vld [vmem:[#allocation2 + $0x448] sm:$0xfc] }
 0x3b5   : > { %v3961_v25 = vadd.f32 %v3885_v22, %v3721_v60  ;;  %v2916_v27 = vsel %vm2079_vm2, %v2914_v24, %v7258_v38  ;;  %v3891_v29 = vrot.slane %v3769_v44, 2  ;;  %v2918_v46 = vsel %vm2079_vm2, %v7258_v38, %v2917_v18  ;;  %v4596_v24 = vld [vmem:[#allocation2 + $0x450] sm:$0xff]  ;;  %v3773_v38 = vld [vmem:[#allocation2 + $0x4a8] sm:$0xff] }
 0x3b6   : > { %v6794_v33 = vpop.permute.xlu1 %2679  ;;  %v3450_v43 = vadd.f32 %v3379_v17, %v3257_v63  ;;  %v2747_v60 = vadd.f32 %v6786_v12, %v2555_v50  ;;  %v3896_v18 = vrot.slane %v3772_v42, 2 }
 0x3b7   : > { %4112 = vrot.lane.b32.xlu1 %v3961_v25, %s4700_s8  ;;  %v4592_v25 = vld [vmem:[#allocation2 + $0x3c0] sm:$0xff] }
 0x3b8   : > { %v6799_v10 = vpop.permute.xlu0 %2489  ;;  %v2283_v51 = vadd.f32 %v4592_v25, %v6769_v55  ;;  %v2987_v59 = vadd.f32 %v2916_v27, %v2747_v60  ;;  %v3998_v55 = vld [vmem:[%s4851_s13 + $0xe0] sm:$0xff]  ;;  %v2800_v27 = vld [vmem:[#allocation2 + $0x4b8] sm:$0x1] }
 0x3b9   : > { %4030 = vst.msk [vmem:[%s6379_s11 + $0xe0] sm:$0xff] %vm468_vm1, %v3998_v55 }
 0x3ba   : > { %v3381_v21 = vpop.permute.xlu1 %3380  ;;  %v2556_v12 = vadd.f32 %v6777_v62, %v2283_v51  ;;  %v2284_v62 = vadd.f32 %v4593_v30, %v6792_v58  ;;  %v3894_v58 = vrot.slane %v3771_v14, 2  ;;  %v3999_v51 = vld [vmem:[%s4851_s13 + $0xe8] sm:$0xff] }
 0x3bb   : > { %v3451_v9 = vadd.f32 %v3381_v21, %v3258_v53  ;;  %v3770_v21 = vld [vmem:[#allocation2 + $0x460] sm:$0xff]  ;;  %4031 = vst.msk [vmem:[%s6379_s11 + $0xe8] sm:$0xff] %vm468_vm1, %v3999_v51 }
 0x3bc   : > { %v3190_v57 = vpop.permute.xlu0 %3189  ;;  %v3892_v52 = vrot.slane %v3770_v21, 2  ;;  %v2748_v41 = vadd.f32 %v6794_v33, %v2556_v12  ;;  %v2557_v28 = vadd.f32 %v6799_v10, %v2284_v62  ;;  %v3775_v21 = vld [vmem:[#allocation2 + $0x4d8] sm:$0xfc]  ;;  %v3776_v12 = vld [vmem:[#allocation2 + $0x4f0] sm:$0xff] }
 0x3bd   : > { %v3259_v54 = vadd.f32 %v3190_v57, %v2987_v59  ;;  %v3902_v55 = vrot.slane %v3776_v12, 2 }
 0x3be   : > { %v6807_v5 = vpop.permute.xlu1 %2218  ;;  %v3893_v47 = vsel %vm2352_vm3, %v3891_v29, %v3892_v52  ;;  %v2988_v57 = vadd.f32 %v2918_v46, %v2748_v41  ;;  %v3897_v29 = vrot.slane %v3773_v38, 2 }
 0x3bf   : > { %v2285_v10 = vadd.f32 %v4595_v48, %v6807_v5 }
 0x3c0   : > { %v3651_v23 = vpop.permute.xlu0 %3650 }
 0x3c1   : > { %v3722_v16 = vadd.f32 %v3651_v23, %v3450_v43  ;;  %v2795_v23 = vld [vmem:[#allocation2 + $0x440] sm:$0xfe] }
 0x3c2   : > { %v6811_v13 = vpop.permute.xlu1 %2491  ;;  %v2919_v53 = vrot.slane %v2795_v23, 1 }
 0x3c3   : > { %v3962_v45 = vadd.f32 %v3888_v1, %v3722_v16  ;;  %v2798_v16 = vld [vmem:[#allocation2 + $0x488] sm:$0xfe]  ;;  %v2558_v59 = vadd.f32 %v6811_v13, %v2285_v10 }
 0x3c4   : > { %v6819_v19 = vpop.permute.xlu0 %2681  ;;  %v2924_v8 = vrot.slane %v2798_v16, 1  ;;  %v3774_v16 = vld [vmem:[#allocation2 + $0x4c0] sm:$0x3] }
 0x3c5   : > { %4114 = vrot.lane.b32.xlu0 %v3962_v45, %s4700_s8 }
 0x3c6   : > { %v3192_v61 = vpop.permute.xlu1 %3191 }
 0x3c7   : > { %v3260_v45 = vadd.f32 %v3192_v61, %v2988_v57  ;;  %v2921_v61 = vsel %vm2079_vm2, %v2919_v53, %v6276_v49  ;;  %v3898_v57 = vsel %vm2352_vm3, %v3896_v18, %v3897_v29 }
 0x3c8   : > { %v3383_v39 = vpop.permute.xlu0 %3382 }
 0x3c9   : > { %v3452_v0 = vadd.f32 %v3383_v39, %v3259_v54 }
 0x3ca   : > { %v3653_v4 = vpop.permute.xlu1 %3652 }
 0x3cb   : > { %v3723_v37 = vadd.f32 %v3653_v4, %v3451_v9  ;;  %v2749_v9 = vadd.f32 %v6819_v19, %v2557_v28  ;;  %v2926_v19 = vsel %vm2079_vm2, %v2924_v8, %v6420_v34 }
 0x3cc   : > { %v2221_v20 = vpop.permute.xlu0 %2220 }
 0x3cd   : > { %v3963_v11 = vadd.f32 %v3890_v31, %v3723_v37  ;;  %v2286_v43 = vadd.f32 %v4594_v6, %v2221_v20  ;;  %v3895_v20 = vsel %vm2352_vm3, %v3892_v52, %v3894_v58  ;;  %v2989_v50 = vadd.f32 %v2921_v61, %v2749_v9  ;;  %v7261_v9 = vld [vmem:[#allocation10_spill] sm:$0xff] }
 0x3ce   : > { %v6824_v17 = vpop.permute.xlu1 %2683  ;;  %v2927_v52 = vrot.slane %v2800_v27, 1 }
 0x3cf   : > { %4116 = vrot.lane.b32.xlu1 %v3963_v11, %s4700_s8  ;;  %v2797_v11 = vld [vmem:[#allocation2 + $0x470] sm:$0x1]  ;;  %v2750_v41 = vadd.f32 %v6824_v17, %v2558_v59 }
 0x3d0   : > { %v2494_v36 = vpop.permute.xlu0 %2493  ;;  %v2928_v17 = vsel %vm2079_vm2, %v6420_v34, %v2927_v52  ;;  %v3899_v34 = vrot.slane %v3774_v16, 2 }
 0x3d1   : > { %v2559_v40 = vadd.f32 %v2494_v36, %v2286_v43  ;;  %v7260_v43 = vld [vmem:[#allocation11_spill] sm:$0xff] }
 0x3d2   : > { %v3385_v22 = vpop.permute.xlu1 %3384  ;;  %v3900_v15 = vsel %vm2352_vm3, %v3897_v29, %v3899_v34 }
 0x3d3   : > { %v3453_v39 = vadd.f32 %v3385_v22, %v3260_v45 }
 0x3d4   : > { %v3194_v26 = vpop.permute.xlu0 %3193 }
 0x3d5   : > { %v3261_v2 = vadd.f32 %v3194_v26, %v2989_v50 }
 0x3d6   : > { %v2223_v3 = vpop.permute.xlu1 %2222 }
 0x3d7   : > { %v2287_v60 = vadd.f32 %v4596_v24, %v2223_v3  ;;  %v2922_v3 = vrot.slane %v2797_v11, 1 }
 0x3d8   : > { %v3655_v32 = vpop.permute.xlu0 %3654 }
 0x3d9   : > { %v3724_v63 = vadd.f32 %v3655_v32, %v3452_v0  ;;  %v7259_v32 = vld [vmem:[#allocation9_spill] sm:$0xff]  ;;  %v2923_v62 = vsel %vm2079_vm2, %v6276_v49, %v2922_v3  ;;  %v3777_v49 = vld [vmem:[#allocation2 + $0x508] sm:$0x3] }
 0x3da   : > { %v2496_v56 = vpop.permute.xlu1 %2495  ;;  %v2990_v6 = vadd.f32 %v2923_v62, %v2750_v41 }
 0x3db   : > { %v3964_v33 = vadd.f32 %v3893_v47, %v3724_v63  ;;  %v2560_v44 = vadd.f32 %v2496_v56, %v2287_v60  ;;  %v3901_v56 = vrot.slane %v3775_v21, 2  ;;  %v4001_v47 = vld [vmem:[%s4851_s13 + $0xf8] sm:$0xff]  ;;  %s4209_s13 = sshll.u32 %s6379_s11, 4  ;;  %s6953_s13 = int_to_ptr.vmem [resolvable:$true] %s4209_s13 }
 0x3dc   : > { %v2686_v35 = vpop.permute.xlu0 %2685  ;;  %4033 = vst.msk [vmem:[%s6379_s11 + $0xf8] sm:$0xff] %vm468_vm1, %v4001_v47  ;;  %s4627_s28 = scalar_lea.vmem %s6953_s13, 4096  ;;  %p4634_p8 = scmp.lt.s32.totalorder %s6953_s13, %s4632_s12 }
 0x3dd   : > { %4118 = vrot.lane.b32.xlu0 %v3964_v33, %s4700_s8  ;;  %v2751_v4 = vadd.f32 %v2686_v35, %v2559_v40  ;;  %v3903_v35 = vsel %vm2352_vm3, %v3901_v56, %v3902_v55  ;;  %p4628_p6 = scmp.ne.s32.totalorder %s6953_s13, %s4627_s28 }
 0x3de   : > { %v6844_v1 = vpop.permute.xlu1 %3195 }
 0x3df   : > { %v2991_v22 = vadd.f32 %v2926_v19, %v2751_v4  ;;  %v3262_v40 = vadd.f32 %v6844_v1, %v2990_v6  ;;  %v3904_v4 = vrot.slane %v3777_v49, 2  ;;  %p4629_p12 = pnand %p4628_p6, %p7263_p11 }
 0x3e0   : > { %v3387_v37 = vpop.permute.xlu0 %3386 }
 0x3e1   : > { %v3454_v0 = vadd.f32 %v3387_v37, %v3261_v2  ;;  %v3905_v61 = vsel %vm2352_vm3, %v3902_v55, %v3904_v4  ;;  %p4630_p13 = pneg %p4629_p12 }
 0x3e2   : > { %v3657_v31 = vpop.permute.xlu1 %3656 }
 0x3e3   : > { %v3725_v7 = vadd.f32 %v3657_v31, %v3453_v39 }
 0x3e4   : > { %v3198_v25 = vpop.permute.xlu0 %3197 }
 0x3e5   : > { %v3965_v36 = vadd.f32 %v3895_v20, %v3725_v7  ;;  %v3263_v54 = vadd.f32 %v3198_v25, %v2991_v22  ;;  %v7262_v7 = vld [vmem:[#allocation12_spill] sm:$0xff] }
 0x3e6   : > { %v2688_v5 = vpop.permute.xlu1 %2687 }
 0x3e7   : > { %4120 = vrot.lane.b32.xlu1 %v3965_v36, %s4700_s8  ;;  %v3456_v13 = vadd.f32 %v7259_v32, %v3263_v54  ;;  %v2752_v26 = vadd.f32 %v2688_v5, %v2560_v44 }
 0x3e8   : > { %v3659_v63 = vpop.permute.xlu0 %3658 }
 0x3e9   : > { %v3726_v30 = vadd.f32 %v3659_v63, %v3454_v0  ;;  %v3728_v23 = vadd.f32 %v7260_v43, %v3456_v13  ;;  %v2992_v14 = vadd.f32 %v2928_v17, %v2752_v26 }
 0x3ea   : > { %v3389_v46 = vpop.permute.xlu1 %3388 }
 0x3eb   : > { %v3966_v33 = vadd.f32 %v3898_v57, %v3726_v30  ;;  %v3968_v58 = vadd.f32 %v3903_v35, %v3728_v23  ;;  %v3455_v8 = vadd.f32 %v3389_v46, %v3262_v40 }
 0x3ec   : > { %v4067_v28 = vpop.permute.xlu0 %4066 }
 0x3ed   : > { %4163 = vst.msk [vmem:[%s6379_s11] sm:$0xff] %vm4162_vm7, %v4067_v28  ;;  %4122 = vrot.lane.b32.xlu0 %v3966_v33, %s4700_s8 }
 0x3ee   : > { %v3200_v45 = vpop.permute.xlu1 %3199 }
 0x3ef   : > { %v3264_v53 = vadd.f32 %v3200_v45, %v2992_v14 }
 0x3f0   : > { %v4071_v37 = vpop.permute.xlu0 %4070 }
 0x3f1   : > { %v3457_v39 = vadd.f32 %v7261_v9, %v3264_v53  ;;  %4165 = vst.msk [vmem:[%s6379_s11 + $0x10] sm:$0xff] %vm4162_vm7, %v4071_v37  ;;  %4126 = vrot.lane.b32.xlu0 %v3968_v58, %s4700_s8 }
 0x3f2   : > { %v3661_v31 = vpop.permute.xlu1 %3660 }
 0x3f3   : > { %v3727_v1 = vadd.f32 %v3661_v31, %v3455_v8  ;;  %v3729_v48 = vadd.f32 %v7262_v7, %v3457_v39 }
 0x3f4   : > { %v4075_v11 = vpop.permute.xlu0 %4074 }
 0x3f5   : > { %v3967_v10 = vadd.f32 %v3900_v15, %v3727_v1  ;;  %4167 = vst.msk [vmem:[%s6379_s11 + $0x20] sm:$0xff] %vm4162_vm7, %v4075_v11  ;;  %v3969_v19 = vadd.f32 %v3905_v61, %v3729_v48 }
 0x3f6   : > { %v4069_v20 = vpop.permute.xlu1 %4068 }
 0x3f7   : > { %4164 = vst.msk [vmem:[%s6379_s11 + $0x8] sm:$0xff] %vm4162_vm7, %v4069_v20  ;;  %4124 = vrot.lane.b32.xlu1 %v3967_v10, %s4700_s8 }
 0x3f8   : > { %v4079_v50 = vpop.permute.xlu0 %4078 }
 0x3f9   : > { %4169 = vst.msk [vmem:[%s6379_s11 + $0x30] sm:$0xff] %vm4162_vm7, %v4079_v50 }
 0x3fa   : > { %v4073_v24 = vpop.permute.xlu1 %4072 }
 0x3fb   : > { %4166 = vst.msk [vmem:[%s6379_s11 + $0x18] sm:$0xff] %vm4162_vm7, %v4073_v24  ;;  %4128 = vrot.lane.b32.xlu1 %v3969_v19, %s4700_s8  ;;  %s4633_s8 = scalar_lea.vmem %s4632_s12, 8192 }
 0x3fc   : > { %v4083_v60 = vpop.permute.xlu0 %4082  ;;  %p4635_p10 = scmp.lt.s32.totalorder %s4633_s8, %s4627_s28 }
 0x3fd   : > { %4171 = vst.msk [vmem:[%s6379_s11 + $0x40] sm:$0xff] %vm4162_vm7, %v4083_v60 }
 0x3fe   : > { %v4077_v36 = vpop.permute.xlu1 %4076  ;;  %p4636_p0 = por %p4635_p10, %p4634_p8 }
 0x3ff   : > { %4168 = vst.msk [vmem:[%s6379_s11 + $0x28] sm:$0xff] %vm4162_vm7, %v4077_v36 }
 0x400   : > { %v4087_v22 = vpop.permute.xlu0 %4086  ;;  %p4637_p2 = pnand %p4636_p0, %p4630_p13 }
 0x401   : > { %4173 = vst.msk [vmem:[%s6379_s11 + $0x50] sm:$0xff] %vm4162_vm7, %v4087_v22 }
 0x402   : > { %v4081_v42 = vpop.permute.xlu1 %4080 }
 0x403   : > { %4170 = vst.msk [vmem:[%s6379_s11 + $0x38] sm:$0xff] %vm4162_vm7, %v4081_v42 }
 0x404   : > { %v4091_v38 = vpop.permute.xlu0 %4090 }
 0x405   : > { %4175 = vst.msk [vmem:[%s6379_s11 + $0x60] sm:$0xff] %vm4162_vm7, %v4091_v38 }
 0x406   : > { %v4085_v27 = vpop.permute.xlu1 %4084 }
 0x407   : > { %4172 = vst.msk [vmem:[%s6379_s11 + $0x48] sm:$0xff] %vm4162_vm7, %v4085_v27 }
 0x40a   : > { %v4095_v25 = vpop.permute.xlu0 %4094  ;;  %v4089_v5 = vpop.permute.xlu1 %4088 }
 0x40b   : > { %4177 = vst.msk [vmem:[%s6379_s11 + $0x70] sm:$0xff] %vm4162_vm7, %v4095_v25  ;;  %4174 = vst.msk [vmem:[%s6379_s11 + $0x58] sm:$0xff] %vm4162_vm7, %v4089_v5 }
 0x40e   : > { %v4093_v59 = vpop.permute.xlu1 %4092 }
 0x40f   : > { %v4099_v51 = vpop.permute.xlu0 %4098  ;;  %4176 = vst.msk [vmem:[%s6379_s11 + $0x68] sm:$0xff] %vm4162_vm7, %v4093_v59 }
 0x410   : > { %4179 = vst.msk [vmem:[%s6379_s11 + $0x80] sm:$0xff] %vm4162_vm7, %v4099_v51 }
 0x413   : > { %v4097_v44 = vpop.permute.xlu1 %4096 }
 0x414   : > { %v4103_v2 = vpop.permute.xlu0 %4102  ;;  %4178 = vst.msk [vmem:[%s6379_s11 + $0x78] sm:$0xff] %vm4162_vm7, %v4097_v44 }
 0x415   : > { %4181 = vst.msk [vmem:[%s6379_s11 + $0x90] sm:$0xff] %vm4162_vm7, %v4103_v2 }
 0x417   : > { %v4101_v12 = vpop.permute.xlu1 %4100 }
 0x418   : > { %v4107_v21 = vpop.permute.xlu0 %4106  ;;  %4180 = vst.msk [vmem:[%s6379_s11 + $0x88] sm:$0xff] %vm4162_vm7, %v4101_v12 }
 0x419   : > { %4183 = vst.msk [vmem:[%s6379_s11 + $0xa0] sm:$0xff] %vm4162_vm7, %v4107_v21 }
 0x41b   : > { %v4105_v54 = vpop.permute.xlu1 %4104 }
 0x41c   : > { %4182 = vst.msk [vmem:[%s6379_s11 + $0x98] sm:$0xff] %vm4162_vm7, %v4105_v54 }
 0x41f   : > { %v4109_v3 = vpop.permute.xlu1 %4108 }
 0x420   : > { %4184 = vst.msk [vmem:[%s6379_s11 + $0xa8] sm:$0xff] %vm4162_vm7, %v4109_v3  ;;  %v4111_v18 = vpop.permute.xlu0 %4110 }
 0x421   : > { %4185 = vst.msk [vmem:[%s6379_s11 + $0xb0] sm:$0xff] %vm4162_vm7, %v4111_v18 }
 0x429   : > { %v4113_v29 = vpop.permute.xlu1 %4112 }
 0x42a   : > { %4186 = vst.msk [vmem:[%s6379_s11 + $0xb8] sm:$0xff] %vm4162_vm7, %v4113_v29 }
 0x437   : > { %v4115_v52 = vpop.permute.xlu0 %4114 }
 0x438   : > { %4187 = vst.msk [vmem:[%s6379_s11 + $0xc0] sm:$0xff] %vm4162_vm7, %v4115_v52 }
 0x441   : > { %v4117_v41 = vpop.permute.xlu1 %4116 }
 0x442   : > { %4188 = vst.msk [vmem:[%s6379_s11 + $0xc8] sm:$0xff] %vm4162_vm7, %v4117_v41 }
 0x44f   : > { %v4119_v0 = vpop.permute.xlu0 %4118 }
 0x450   : > { %4189 = vst.msk [vmem:[%s6379_s11 + $0xd0] sm:$0xff] %vm4162_vm7, %v4119_v0 }
 0x459   : > { %v4121_v32 = vpop.permute.xlu1 %4120 }
 0x45a   : > { %4190 = vst.msk [vmem:[%s6379_s11 + $0xd8] sm:$0xff] %vm4162_vm7, %v4121_v32 }
 0x45f   : > { %v4123_v13 = vpop.permute.xlu0 %4122 }
 0x460   : > { %4191 = vst.msk [vmem:[%s6379_s11 + $0xe0] sm:$0xff] %vm4162_vm7, %v4123_v13 }
 0x463   : > { %v4127_v26 = vpop.permute.xlu0 %4126 }
 0x464   : > { %4193 = vst.msk [vmem:[%s6379_s11 + $0xf0] sm:$0xff] %vm4162_vm7, %v4127_v26 }
 0x469   : > { %v4125_v56 = vpop.permute.xlu1 %4124 }
 0x46a   : > { %4192 = vst.msk [vmem:[%s6379_s11 + $0xe8] sm:$0xff] %vm4162_vm7, %v4125_v56 }
 0x46d   : > { %v4129_v55 = vpop.permute.xlu1 %4128 }
 0x46e   : > { %4194 = vst.msk [vmem:[%s6379_s11 + $0xf8] sm:$0xff] %vm4162_vm7, %v4129_v55 }
 0x46f   : > { %4640 = shalt.err (!%p4637_p2)
}
 0x470   : > { %s4641_s16 = scalar_lea.hbm %s6951_s17, 4096  ;;  %s4645_s20 = scalar_lea.hbm %s7005_s6, 8192 }
 0x471   : > { %p4642_p4 = scmp.ne.s32.totalorder %s6951_s17, %s4641_s16  ;;  %p4646_p9 = scmp.lt.u32.totalorder %s6951_s17, %s7005_s6 }
 0x472   : > { %p4647_p1 = scmp.lt.u32.totalorder %s4645_s20, %s4641_s16  ;;  %p4649_p6 = scmp.lt.u32.totalorder %s4641_s16, %s6951_s17 }
 0x473   : > { %p4643_p5 = pnand %p4642_p4, %p7263_p11 }
 0x474   : > { %p4648_p3 = por %p4647_p1, %p4646_p9 }
 0x475   : > { %p4644_p7 = pneg %p4643_p5 }
 0x476   : > { %p4650_p12 = por %p4649_p6, %p4648_p3 }
 0x478   : > { %p4651_p13 = pnand %p4650_p12, %p4644_p7 }
 0x47a   : > { %4654 = shalt.err (!%p4651_p13)
}
 0x47b   : > { %s4704_s14 = smov 128   ;;  %s4705_s15 = smov 8  }
 0x47c   : > { %4479 = dma.vmem_to_hbm [thread:$0]  (%p7263_p11), %s6953_s13, 4096, %s6951_s17, %s4196_s26, %s4704_s14, %s4704_s14, %s4705_s15  }
 0x47d PF: > { %s4224_s28 = sand.u32 1, %s4681_s21   ;;  %p7264_p8 = scmp.ne.s32.totalorder %s7018_s10, 0 }
 0x47e   : > { %p7265_p10 = scmp.ge.s32.totalorder %s4693_s24, 2  ;;  %s4225_s25 = scalar_lea.sflag [#allocation5], %s4224_s28 }
 0x480   : > { %p4486_p0 = pnand %p7265_p10, %p7264_p8 }
 0x482   : > { %4676 = dma.done.wait (!%p4486_p0), %s4225_s25, 4096  }
 0x483   : > { %4678 = vsyncadd (!%p4486_p0), %s4225_s25, 4294963200  ;;  %p19_p2 = scmp.ge.s32.totalorder %s4766_s27, 4   ;;  %s7266_s21 = smov %s4685_s22 }
 0x484   : > { %s7267_s22 = smov %s4689_s23  ;;  %s7268_s23 = smov %s4778_s30 }
 0x485   : > { %s7269_s24 = smov %s4766_s27  ;;  %21 = sbr.rel (!%p19_p2) target bundleno = 5 (0x5), region = 91 }
 0x48c   :  { %4230 = vsyncpa [#allocation4], 1 }
 0x48d   :  { %4232 = vsyncpa [#allocation4 + $0x1], 1 }
 0x48e   :  { %4233 = vsyncpa [#allocation5], 1 }
 0x48f   :  { %4235 = vsyncpa [#allocation5 + $0x1], 1 }

</bundles_post_ra>
